<compile_context>
chip_gen: v7x
topology: tpu7x:2x2x1
jax: 0.10.0
libtpu: 0.0.40
codegen_flags: <defaults>
</compile_context>

<pallas_src>
import functools

import jax
import jax.numpy as jnp
from jax.experimental import pallas as pl
from jax.experimental.pallas import tpu as pltpu


# ----------------------------------------------------------------------------
# Fused kernel: entire forward pass for one batch element per grid step.
# ----------------------------------------------------------------------------
def _fused_kernel(x_ref, w1_ref, s1_ref, w2_ref, s2_ref, w3_ref, s3_ref,
                  wfc1_ref, bfc1_ref, wfc2_ref, bfc2_ref,
                  o_ref,
                  xpad_ref, h1_ref, h2_ref, a3_ref):
    f32 = jnp.float32
    bf16 = jnp.bfloat16

    # ---------------- stage 1: conv1(K=7, pad=3) + BN(folded) + ReLU + pool ---
    k1 = w1_ref.shape[0]
    pad1 = k1 // 2
    l1 = x_ref.shape[1]                       # 96
    c1 = w1_ref.shape[2]                      # 64

    # Zero only the halo rows (interior is fully overwritten below).
    xpad_ref[:pad1, :] = jnp.zeros((pad1, xpad_ref.shape[1]), xpad_ref.dtype)
    xpad_ref[pad1 + l1:, :] = jnp.zeros((pad1, xpad_ref.shape[1]), xpad_ref.dtype)
    xpad_ref[pad1:pad1 + l1, :] = x_ref[0]    # zero-padded input in VMEM

    acc = jnp.zeros((l1, c1), f32)
    for k in range(k1):                       # shifted-matmul accumulation
        acc = acc + jnp.dot(xpad_ref[k:k + l1, :], w1_ref[k],
                            preferred_element_type=f32)
    y = jnp.maximum(acc + s1_ref[...], 0.0)                     # shift + ReLU
    y = jnp.max(y.reshape(l1 // 2, 2, c1), axis=1)              # MaxPool1d(2)

    k2 = w2_ref.shape[0]
    pad2 = k2 // 2
    l2 = l1 // 2
    h1_ref[:pad2, :] = jnp.zeros((pad2, h1_ref.shape[1]), h1_ref.dtype)
    h1_ref[pad2 + l2:, :] = jnp.zeros((pad2, h1_ref.shape[1]), h1_ref.dtype)
    h1_ref[pad2:pad2 + l2, :] = y.astype(bf16)

    # ---------------- stage 2: conv2(K=5, pad=2) + BN + ReLU + pool -----------
    c2 = w2_ref.shape[2]                      # 128
    acc = jnp.zeros((l2, c2), f32)
    for k in range(k2):
        acc = acc + jnp.dot(h1_ref[k:k + l2, :], w2_ref[k],
                            preferred_element_type=f32)
    y = jnp.maximum(acc + s2_ref[...], 0.0)
    y = jnp.max(y.reshape(l2 // 2, 2, c2), axis=1)

    k3 = w3_ref.shape[0]
    pad3 = k3 // 2
    l3 = l2 // 2
    h2_ref[:pad3, :] = jnp.zeros((pad3, h2_ref.shape[1]), h2_ref.dtype)
    h2_ref[pad3 + l3:, :] = jnp.zeros((pad3, h2_ref.shape[1]), h2_ref.dtype)
    h2_ref[pad3:pad3 + l3, :] = y.astype(bf16)

    # ---------------- stage 3: conv3(K=3, pad=1) + BN + ReLU + pool -----------
    c3 = w3_ref.shape[2]                      # 256
    acc = jnp.zeros((l3, c3), f32)
    for k in range(k3):
        acc = acc + jnp.dot(h2_ref[k:k + l3, :], w3_ref[k],
                            preferred_element_type=f32)
    y = jnp.maximum(acc + s3_ref[...], 0.0)
    y = jnp.max(y.reshape(l3 // 2, 2, c3), axis=1)              # (12, 256)
    a3_ref[...] = y.astype(bf16)

    # ---------------- head: fc1 -> dropout(identity) -> fc2 -> log_softmax ----
    # TODO(synk): nn.Dropout is identity at inference; train-mode masking not implemented.
    l4 = l3 // 2                                                # 12
    nh = wfc1_ref.shape[2]                                      # 128
    h = jnp.zeros((1, nh), f32)
    for l in range(l4):                       # fc1 over pre-permuted weights
        h = h + jnp.dot(a3_ref[l:l + 1, :], wfc1_ref[l],
                        preferred_element_type=f32)
    h = h + bfc1_ref[...]

    logits = jnp.dot(h.astype(bf16), wfc2_ref[...],
                     preferred_element_type=f32) + bfc2_ref[...]  # padded to 128
    m = jnp.max(logits, axis=-1, keepdims=True)
    z = logits - m
    lse = jnp.log(jnp.sum(jnp.exp(z), axis=-1, keepdims=True))
    o_ref[0] = z - lse


# ----------------------------------------------------------------------------
# Wrapper: one pallas_call for the whole network.
# ----------------------------------------------------------------------------
@functools.partial(jax.jit, static_argnames=("num_classes",))
def simple_1d_cnn_forward(x_ncl, p, *, num_classes):
    """x_ncl: (B, num_channels, L) float32; L must reduce to 12 after 3 pools."""
    b, cin, l0 = x_ncl.shape
    x_blc = jnp.transpose(x_ncl, (0, 2, 1)).astype(jnp.bfloat16)   # (B, L, Cin)

    k1, _, c1 = p["w1"].shape
    k2, _, c2 = p["w2"].shape
    k3, _, c3 = p["w3"].shape
    l2, l3, l4 = l0 // 2, l0 // 4, l0 // 8
    nh = p["wfc1"].shape[2]
    ncpad = p["wfc2"].shape[1]

    out_pad = pl.pallas_call(
        _fused_kernel,
        out_shape=jax.ShapeDtypeStruct((b, 1, ncpad), jnp.float32),
        grid=(b,),
        in_specs=[
            pl.BlockSpec((1, l0, cin), lambda i: (i, 0, 0)),   # activations
            pl.BlockSpec((k1, cin, c1), lambda i: (0, 0, 0)),  # conv1 (BN-folded)
            pl.BlockSpec((1, c1), lambda i: (0, 0)),           # shift1
            pl.BlockSpec((k2, c1, c2), lambda i: (0, 0, 0)),   # conv2
            pl.BlockSpec((1, c2), lambda i: (0, 0)),           # shift2
            pl.BlockSpec((k3, c2, c3), lambda i: (0, 0, 0)),   # conv3
            pl.BlockSpec((1, c3), lambda i: (0, 0)),           # shift3
            pl.BlockSpec((l4, c3, nh), lambda i: (0, 0, 0)),   # fc1 (pre-permuted)
            pl.BlockSpec((1, nh), lambda i: (0, 0)),           # fc1 bias
            pl.BlockSpec((nh, ncpad), lambda i: (0, 0)),       # fc2 (lane-padded)
            pl.BlockSpec((1, ncpad), lambda i: (0, 0)),        # fc2 bias (padded)
        ],
        out_specs=pl.BlockSpec((1, 1, ncpad), lambda i: (i, 0, 0)),
        scratch_shapes=[
            pltpu.VMEM((l0 + 2 * (k1 // 2), cin), jnp.bfloat16),  # padded input
            pltpu.VMEM((l2 + 2 * (k2 // 2), c1), jnp.bfloat16),   # padded act1
            pltpu.VMEM((l3 + 2 * (k3 // 2), c2), jnp.bfloat16),   # padded act2
            pltpu.VMEM((l4, c3), jnp.bfloat16),                   # act3
        ],
        compiler_params=pltpu.CompilerParams(
            dimension_semantics=("parallel",)),
    )(x_blc, p["w1"], p["s1"], p["w2"], p["s2"], p["w3"], p["s3"],
      p["wfc1"], p["bfc1"], p["wfc2"], p["bfc2"])

    return out_pad[:, 0, :num_classes]


# ----------------------------------------------------------------------------
# Pure-JAX reference (same folded params, same bf16 cast points) for checking.
# ----------------------------------------------------------------------------
def reference_forward(x_ncl, p, num_classes):
    f32, bf16 = jnp.float32, jnp.bfloat16
    x = jnp.transpose(x_ncl, (0, 2, 1)).astype(bf16)               # (B, L, Cin)

    def conv_block(x_blc, w_kco, shift):
        k = w_kco.shape[0]
        pad = k // 2
        b, l, _ = x_blc.shape
        cout = w_kco.shape[2]
        xp = jnp.pad(x_blc, ((0, 0), (pad, pad), (0, 0)))
        acc = jnp.zeros((b, l, cout), f32)
        for kk in range(k):
            acc = acc + jnp.einsum("blc,cd->bld", xp[:, kk:kk + l, :], w_kco[kk],
                                   preferred_element_type=f32)
        y = jnp.maximum(acc + shift[None, :, :], 0.0)
        y = jnp.max(y.reshape(b, l // 2, 2, cout), axis=2)
        return y.astype(bf16)

    y = conv_block(x, p["w1"], p["s1"])
    y = conv_block(y, p["w2"], p["s2"])
    y = conv_block(y, p["w3"], p["s3"])                            # (B, 12, 256)
    h = jnp.einsum("blc,lcn->bn", y, p["wfc1"],
                   preferred_element_type=jnp.float32) + p["bfc1"]
    logits = jnp.dot(h.astype(bf16), p["wfc2"][:, :num_classes],
                     preferred_element_type=jnp.float32) + p["bfc2"][:, :num_classes]
    return jax.nn.log_softmax(logits, axis=-1)


# ----------------------------------------------------------------------------
# Parameter construction: fold BN into conv weights, pre-permute fc1, pad fc2.
# ----------------------------------------------------------------------------
def make_params(key, num_channels, num_classes, eps=1e-5):
    def nrm(k, shape, std):
        return (std * jax.random.normal(k, shape)).astype(jnp.float32)

    keys = jax.random.split(key, 16)
    p = {}
    conv_cfg = [(num_channels, 64, 7), (64, 128, 5), (128, 256, 3)]
    for i, (cin, cout, k) in enumerate(conv_cfg, start=1):
        kw, kb, kg, kbeta, km, kv = jax.random.split(keys[i], 6)
        w = nrm(kw, (cout, cin, k), (1.0 / (cin * k)) ** 0.5)   # torch (Cout,Cin,K)
        bias = nrm(kb, (cout,), 0.05)
        gamma = 1.0 + nrm(kg, (cout,), 0.05)
        beta = nrm(kbeta, (cout,), 0.05)
        mean = nrm(km, (cout,), 0.05)
        var = 0.5 + jnp.abs(nrm(kv, (cout,), 0.1))

        scale = gamma / jnp.sqrt(var + eps)
        shift = beta + scale * (bias - mean)
        w_kco = jnp.transpose(w, (2, 1, 0)) * scale[None, None, :]  # (K,Cin,Cout)
        p[f"w{i}"] = w_kco.astype(jnp.bfloat16)
        p[f"s{i}"] = shift[None, :].astype(jnp.float32)

    d_in, nh = 256 * 12, 128
    fc1_w = nrm(keys[10], (d_in, nh), (1.0 / d_in) ** 0.5)       # rows = channel-major flatten
    # Pre-permute rows so the kernel consumes the (L=12, C=256) conv output directly.
    p["wfc1"] = jnp.transpose(fc1_w.reshape(256, 12, nh), (1, 0, 2)).astype(jnp.bfloat16)
    p["bfc1"] = nrm(keys[11], (1, nh), 0.05)

    fc2_w = nrm(keys[12], (nh, num_classes), (1.0 / nh) ** 0.5)
    fc2_b = nrm(keys[13], (1, num_classes), 0.05)
    ncpad = max(128, ((num_classes + 127) // 128) * 128)         # lane-dense output slab
    p["wfc2"] = jnp.zeros((nh, ncpad), jnp.float32).at[:, :num_classes].set(fc2_w).astype(jnp.bfloat16)
    p["bfc2"] = jnp.full((1, ncpad), -1e9, jnp.float32).at[:, :num_classes].set(fc2_b)
    return p


if __name__ == "__main__":
    num_channels, num_classes = 4, 10
    batch, length = 2, 96                    # 96 -> 48 -> 24 -> 12 = 256*12 for fc1
    key = jax.random.PRNGKey(0)
    kx, kp = jax.random.split(key)
    x = jax.random.normal(kx, (batch, num_channels, length), dtype=jnp.float32)
    params = make_params(kp, num_channels, num_classes)

    out = simple_1d_cnn_forward(x, params, num_classes=num_classes)
    out = jax.block_until_ready(out)
    assert out.shape == (batch, num_classes)
    assert bool(jnp.all(jnp.isfinite(out)))
    # log_softmax rows should sum to ~1 in prob space
    assert jnp.allclose(jnp.sum(jnp.exp(out), axis=1), 1.0, atol=1e-4)

    # Numerical check against a pure-JAX reference using the same folded params.
    ref = jax.block_until_ready(reference_forward(x, params, num_classes))
    assert jnp.allclose(out, ref, atol=2e-2, rtol=2e-2), (
        f"max abs diff {float(jnp.max(jnp.abs(out - ref)))}")
    print("KERNEL_OK")
</pallas_src>

<mosaic_0001>
module attributes {stable_mosaic.version = 11 : i64} {
  func.func @_fused_kernel(%arg0: i32, %arg1: memref<1x96x4xbf16, #tpu.memory_space<vmem>>, %arg2: memref<7x4x64xbf16, #tpu.memory_space<vmem>>, %arg3: memref<1x64xf32, #tpu.memory_space<vmem>>, %arg4: memref<5x64x128xbf16, #tpu.memory_space<vmem>>, %arg5: memref<1x128xf32, #tpu.memory_space<vmem>>, %arg6: memref<3x128x256xbf16, #tpu.memory_space<vmem>>, %arg7: memref<1x256xf32, #tpu.memory_space<vmem>>, %arg8: memref<12x256x128xbf16, #tpu.memory_space<vmem>>, %arg9: memref<1x128xf32, #tpu.memory_space<vmem>>, %arg10: memref<128x128xbf16, #tpu.memory_space<vmem>>, %arg11: memref<1x128xf32, #tpu.memory_space<vmem>>, %arg12: memref<1x1x128xf32, #tpu.memory_space<vmem>>, %arg13: memref<102x4xbf16, #tpu.memory_space<vmem>>, %arg14: memref<52x64xbf16, #tpu.memory_space<vmem>>, %arg15: memref<26x128xbf16, #tpu.memory_space<vmem>>, %arg16: memref<12x256xbf16, #tpu.memory_space<vmem>>) attributes {dimension_semantics = [#tpu.dimension_semantics<parallel>], iteration_bounds = array<i64: 2>, scalar_prefetch = 0 : i64, scratch_operands = 4 : i64, tpu.core_type = #tpu.core_type<tc>, window_params = [{transform_indices = @transform_0, window_bounds = array<i64: 1, 96, 4>}, {pipeline_mode = #tpu.pipeline_mode<synchronous>, transform_indices = @transform_1, window_bounds = array<i64: 7, 4, 64>}, {pipeline_mode = #tpu.pipeline_mode<synchronous>, transform_indices = @transform_2, window_bounds = array<i64: 1, 64>}, {pipeline_mode = #tpu.pipeline_mode<synchronous>, transform_indices = @transform_3, window_bounds = array<i64: 5, 64, 128>}, {pipeline_mode = #tpu.pipeline_mode<synchronous>, transform_indices = @transform_4, window_bounds = array<i64: 1, 128>}, {pipeline_mode = #tpu.pipeline_mode<synchronous>, transform_indices = @transform_5, window_bounds = array<i64: 3, 128, 256>}, {pipeline_mode = #tpu.pipeline_mode<synchronous>, transform_indices = @transform_6, window_bounds = array<i64: 1, 256>}, {pipeline_mode = #tpu.pipeline_mode<synchronous>, transform_indices = @transform_7, window_bounds = array<i64: 12, 256, 128>}, {pipeline_mode = #tpu.pipeline_mode<synchronous>, transform_indices = @transform_8, window_bounds = array<i64: 1, 128>}, {pipeline_mode = #tpu.pipeline_mode<synchronous>, transform_indices = @transform_9, window_bounds = array<i64: 128, 128>}, {pipeline_mode = #tpu.pipeline_mode<synchronous>, transform_indices = @transform_10, window_bounds = array<i64: 1, 128>}, {transform_indices = @transform_11, window_bounds = array<i64: 1, 1, 128>}]} {
    %cst = arith.constant 0.000000e+00 : bf16
    %0 = vector.broadcast %cst : bf16 to vector<3x4xbf16>
    %c0 = arith.constant 0 : index
    %c0_0 = arith.constant 0 : index
    %1 = vector.load %arg13[%c0, %c0_0] : memref<102x4xbf16, #tpu.memory_space<vmem>>, vector<3x4xbf16>
    tpu.vector_store %arg13[%c0, %c0_0], %0 {strides = array<i32>} : memref<102x4xbf16, #tpu.memory_space<vmem>>, vector<3x4xbf16>,
    %cst_1 = arith.constant 0.000000e+00 : bf16
    %2 = vector.broadcast %cst_1 : bf16 to vector<3x4xbf16>
    %c99 = arith.constant 99 : index
    %c0_2 = arith.constant 0 : index
    %3 = vector.load %arg13[%c99, %c0_2] : memref<102x4xbf16, #tpu.memory_space<vmem>>, vector<3x4xbf16>
    tpu.vector_store %arg13[%c99, %c0_2], %2 {strides = array<i32>} : memref<102x4xbf16, #tpu.memory_space<vmem>>, vector<3x4xbf16>,
    %c0_3 = arith.constant 0 : index
    %c0_4 = arith.constant 0 : index
    %c0_5 = arith.constant 0 : index
    %4 = vector.load %arg1[%c0_3, %c0_4, %c0_5] : memref<1x96x4xbf16, #tpu.memory_space<vmem>>, vector<1x96x4xbf16>
    %5 = vector.shape_cast %4 : vector<1x96x4xbf16> to vector<96x4xbf16>
    %c3 = arith.constant 3 : index
    %c0_6 = arith.constant 0 : index
    %6 = vector.load %arg13[%c3, %c0_6] : memref<102x4xbf16, #tpu.memory_space<vmem>>, vector<96x4xbf16>
    tpu.vector_store %arg13[%c3, %c0_6], %5 {strides = array<i32>} : memref<102x4xbf16, #tpu.memory_space<vmem>>, vector<96x4xbf16>,
    %cst_7 = arith.constant 0.000000e+00 : f32
    %7 = vector.broadcast %cst_7 : f32 to vector<96x64xf32>
    %c0_8 = arith.constant 0 : index
    %c0_9 = arith.constant 0 : index
    %8 = vector.load %arg13[%c0_8, %c0_9] : memref<102x4xbf16, #tpu.memory_space<vmem>>, vector<96x4xbf16>
    %c0_10 = arith.constant 0 : index
    %c0_11 = arith.constant 0 : index
    %c0_12 = arith.constant 0 : index
    %9 = vector.load %arg2[%c0_10, %c0_11, %c0_12] : memref<7x4x64xbf16, #tpu.memory_space<vmem>>, vector<1x4x64xbf16>
    %10 = vector.shape_cast %9 : vector<1x4x64xbf16> to vector<4x64xbf16>
    %cst_13 = arith.constant dense<0.000000e+00> : vector<96x64xf32>
    %11 = tpu.matmul %8, %10, %cst_13 {dimension_numbers = #tpu.dot_dimension_numbers<[1], [0], [0], [1], [0, 0, 1, 1], [], []>} : vector<96x4xbf16>, vector<4x64xbf16>, vector<96x64xf32> -> vector<96x64xf32>
    %12 = arith.addf %7, %11 : vector<96x64xf32>
    %c1 = arith.constant 1 : index
    %c0_14 = arith.constant 0 : index
    %13 = vector.load %arg13[%c1, %c0_14] : memref<102x4xbf16, #tpu.memory_space<vmem>>, vector<96x4xbf16>
    %c1_15 = arith.constant 1 : index
    %c0_16 = arith.constant 0 : index
    %c0_17 = arith.constant 0 : index
    %14 = vector.load %arg2[%c1_15, %c0_16, %c0_17] : memref<7x4x64xbf16, #tpu.memory_space<vmem>>, vector<1x4x64xbf16>
    %15 = vector.shape_cast %14 : vector<1x4x64xbf16> to vector<4x64xbf16>
    %cst_18 = arith.constant dense<0.000000e+00> : vector<96x64xf32>
    %16 = tpu.matmul %13, %15, %cst_18 {dimension_numbers = #tpu.dot_dimension_numbers<[1], [0], [0], [1], [0, 0, 1, 1], [], []>} : vector<96x4xbf16>, vector<4x64xbf16>, vector<96x64xf32> -> vector<96x64xf32>
    %17 = arith.addf %12, %16 : vector<96x64xf32>
    %c2 = arith.constant 2 : index
    %c0_19 = arith.constant 0 : index
    %18 = vector.load %arg13[%c2, %c0_19] : memref<102x4xbf16, #tpu.memory_space<vmem>>, vector<96x4xbf16>
    %c2_20 = arith.constant 2 : index
    %c0_21 = arith.constant 0 : index
    %c0_22 = arith.constant 0 : index
    %19 = vector.load %arg2[%c2_20, %c0_21, %c0_22] : memref<7x4x64xbf16, #tpu.memory_space<vmem>>, vector<1x4x64xbf16>
    %20 = vector.shape_cast %19 : vector<1x4x64xbf16> to vector<4x64xbf16>
    %cst_23 = arith.constant dense<0.000000e+00> : vector<96x64xf32>
    %21 = tpu.matmul %18, %20, %cst_23 {dimension_numbers = #tpu.dot_dimension_numbers<[1], [0], [0], [1], [0, 0, 1, 1], [], []>} : vector<96x4xbf16>, vector<4x64xbf16>, vector<96x64xf32> -> vector<96x64xf32>
    %22 = arith.addf %17, %21 : vector<96x64xf32>
    %c3_24 = arith.constant 3 : index
    %c0_25 = arith.constant 0 : index
    %23 = vector.load %arg13[%c3_24, %c0_25] : memref<102x4xbf16, #tpu.memory_space<vmem>>, vector<96x4xbf16>
    %c3_26 = arith.constant 3 : index
    %c0_27 = arith.constant 0 : index
    %c0_28 = arith.constant 0 : index
    %24 = vector.load %arg2[%c3_26, %c0_27, %c0_28] : memref<7x4x64xbf16, #tpu.memory_space<vmem>>, vector<1x4x64xbf16>
    %25 = vector.shape_cast %24 : vector<1x4x64xbf16> to vector<4x64xbf16>
    %cst_29 = arith.constant dense<0.000000e+00> : vector<96x64xf32>
    %26 = tpu.matmul %23, %25, %cst_29 {dimension_numbers = #tpu.dot_dimension_numbers<[1], [0], [0], [1], [0, 0, 1, 1], [], []>} : vector<96x4xbf16>, vector<4x64xbf16>, vector<96x64xf32> -> vector<96x64xf32>
    %27 = arith.addf %22, %26 : vector<96x64xf32>
    %c4 = arith.constant 4 : index
    %c0_30 = arith.constant 0 : index
    %28 = vector.load %arg13[%c4, %c0_30] : memref<102x4xbf16, #tpu.memory_space<vmem>>, vector<96x4xbf16>
    %c4_31 = arith.constant 4 : index
    %c0_32 = arith.constant 0 : index
    %c0_33 = arith.constant 0 : index
    %29 = vector.load %arg2[%c4_31, %c0_32, %c0_33] : memref<7x4x64xbf16, #tpu.memory_space<vmem>>, vector<1x4x64xbf16>
    %30 = vector.shape_cast %29 : vector<1x4x64xbf16> to vector<4x64xbf16>
    %cst_34 = arith.constant dense<0.000000e+00> : vector<96x64xf32>
    %31 = tpu.matmul %28, %30, %cst_34 {dimension_numbers = #tpu.dot_dimension_numbers<[1], [0], [0], [1], [0, 0, 1, 1], [], []>} : vector<96x4xbf16>, vector<4x64xbf16>, vector<96x64xf32> -> vector<96x64xf32>
    %32 = arith.addf %27, %31 : vector<96x64xf32>
    %c5 = arith.constant 5 : index
    %c0_35 = arith.constant 0 : index
    %33 = vector.load %arg13[%c5, %c0_35] : memref<102x4xbf16, #tpu.memory_space<vmem>>, vector<96x4xbf16>
    %c5_36 = arith.constant 5 : index
    %c0_37 = arith.constant 0 : index
    %c0_38 = arith.constant 0 : index
    %34 = vector.load %arg2[%c5_36, %c0_37, %c0_38] : memref<7x4x64xbf16, #tpu.memory_space<vmem>>, vector<1x4x64xbf16>
    %35 = vector.shape_cast %34 : vector<1x4x64xbf16> to vector<4x64xbf16>
    %cst_39 = arith.constant dense<0.000000e+00> : vector<96x64xf32>
    %36 = tpu.matmul %33, %35, %cst_39 {dimension_numbers = #tpu.dot_dimension_numbers<[1], [0], [0], [1], [0, 0, 1, 1], [], []>} : vector<96x4xbf16>, vector<4x64xbf16>, vector<96x64xf32> -> vector<96x64xf32>
    %37 = arith.addf %32, %36 : vector<96x64xf32>
    %c6 = arith.constant 6 : index
    %c0_40 = arith.constant 0 : index
    %38 = vector.load %arg13[%c6, %c0_40] : memref<102x4xbf16, #tpu.memory_space<vmem>>, vector<96x4xbf16>
    %c6_41 = arith.constant 6 : index
    %c0_42 = arith.constant 0 : index
    %c0_43 = arith.constant 0 : index
    %39 = vector.load %arg2[%c6_41, %c0_42, %c0_43] : memref<7x4x64xbf16, #tpu.memory_space<vmem>>, vector<1x4x64xbf16>
    %40 = vector.shape_cast %39 : vector<1x4x64xbf16> to vector<4x64xbf16>
    %cst_44 = arith.constant dense<0.000000e+00> : vector<96x64xf32>
    %41 = tpu.matmul %38, %40, %cst_44 {dimension_numbers = #tpu.dot_dimension_numbers<[1], [0], [0], [1], [0, 0, 1, 1], [], []>} : vector<96x4xbf16>, vector<4x64xbf16>, vector<96x64xf32> -> vector<96x64xf32>
    %42 = arith.addf %37, %41 : vector<96x64xf32>
    %c0_45 = arith.constant 0 : index
    %c0_46 = arith.constant 0 : index
    %43 = vector.load %arg3[%c0_45, %c0_46] : memref<1x64xf32, #tpu.memory_space<vmem>>, vector<1x64xf32>
    %44 = vector.broadcast %43 : vector<1x64xf32> to vector<96x64xf32>
    %45 = arith.addf %42, %44 : vector<96x64xf32>
    %cst_47 = arith.constant 0.000000e+00 : f32
    %46 = vector.broadcast %cst_47 : f32 to vector<96x64xf32>
    %47 = arith.maximumf %45, %46 : vector<96x64xf32>
    %48 = vector.shape_cast %47 : vector<96x64xf32> to vector<48x2x64xf32>
    %cst_48 = arith.constant dense<0xFF800000> : vector<48x64xf32>
    %49 = vector.multi_reduction <maximumf>, %48, %cst_48 [1] : vector<48x2x64xf32> to vector<48x64xf32>
    %cst_49 = arith.constant 0.000000e+00 : bf16
    %50 = vector.broadcast %cst_49 : bf16 to vector<2x64xbf16>
    %c0_50 = arith.constant 0 : index
    %c0_51 = arith.constant 0 : index
    %51 = vector.load %arg14[%c0_50, %c0_51] : memref<52x64xbf16, #tpu.memory_space<vmem>>, vector<2x64xbf16>
    tpu.vector_store %arg14[%c0_50, %c0_51], %50 {strides = array<i32>} : memref<52x64xbf16, #tpu.memory_space<vmem>>, vector<2x64xbf16>,
    %cst_52 = arith.constant 0.000000e+00 : bf16
    %52 = vector.broadcast %cst_52 : bf16 to vector<2x64xbf16>
    %c50 = arith.constant 50 : index
    %c0_53 = arith.constant 0 : index
    %53 = vector.load %arg14[%c50, %c0_53] : memref<52x64xbf16, #tpu.memory_space<vmem>>, vector<2x64xbf16>
    tpu.vector_store %arg14[%c50, %c0_53], %52 {strides = array<i32>} : memref<52x64xbf16, #tpu.memory_space<vmem>>, vector<2x64xbf16>,
    %54 = arith.truncf %49 : vector<48x64xf32> to vector<48x64xbf16>
    %c2_54 = arith.constant 2 : index
    %c0_55 = arith.constant 0 : index
    %55 = vector.load %arg14[%c2_54, %c0_55] : memref<52x64xbf16, #tpu.memory_space<vmem>>, vector<48x64xbf16>
    tpu.vector_store %arg14[%c2_54, %c0_55], %54 {strides = array<i32>} : memref<52x64xbf16, #tpu.memory_space<vmem>>, vector<48x64xbf16>,
    %cst_56 = arith.constant 0.000000e+00 : f32
    %56 = vector.broadcast %cst_56 : f32 to vector<48x128xf32>
    %c0_57 = arith.constant 0 : index
    %c0_58 = arith.constant 0 : index
    %57 = vector.load %arg14[%c0_57, %c0_58] : memref<52x64xbf16, #tpu.memory_space<vmem>>, vector<48x64xbf16>
    %c0_59 = arith.constant 0 : index
    %c0_60 = arith.constant 0 : index
    %c0_61 = arith.constant 0 : index
    %58 = vector.load %arg4[%c0_59, %c0_60, %c0_61] : memref<5x64x128xbf16, #tpu.memory_space<vmem>>, vector<1x64x128xbf16>
    %59 = vector.shape_cast %58 : vector<1x64x128xbf16> to vector<64x128xbf16>
    %cst_62 = arith.constant dense<0.000000e+00> : vector<48x128xf32>
    %60 = tpu.matmul %57, %59, %cst_62 {dimension_numbers = #tpu.dot_dimension_numbers<[1], [0], [0], [1], [0, 0, 1, 1], [], []>} : vector<48x64xbf16>, vector<64x128xbf16>, vector<48x128xf32> -> vector<48x128xf32>
    %61 = arith.addf %56, %60 : vector<48x128xf32>
    %c1_63 = arith.constant 1 : index
    %c0_64 = arith.constant 0 : index
    %62 = vector.load %arg14[%c1_63, %c0_64] : memref<52x64xbf16, #tpu.memory_space<vmem>>, vector<48x64xbf16>
    %c1_65 = arith.constant 1 : index
    %c0_66 = arith.constant 0 : index
    %c0_67 = arith.constant 0 : index
    %63 = vector.load %arg4[%c1_65, %c0_66, %c0_67] : memref<5x64x128xbf16, #tpu.memory_space<vmem>>, vector<1x64x128xbf16>
    %64 = vector.shape_cast %63 : vector<1x64x128xbf16> to vector<64x128xbf16>
    %cst_68 = arith.constant dense<0.000000e+00> : vector<48x128xf32>
    %65 = tpu.matmul %62, %64, %cst_68 {dimension_numbers = #tpu.dot_dimension_numbers<[1], [0], [0], [1], [0, 0, 1, 1], [], []>} : vector<48x64xbf16>, vector<64x128xbf16>, vector<48x128xf32> -> vector<48x128xf32>
    %66 = arith.addf %61, %65 : vector<48x128xf32>
    %c2_69 = arith.constant 2 : index
    %c0_70 = arith.constant 0 : index
    %67 = vector.load %arg14[%c2_69, %c0_70] : memref<52x64xbf16, #tpu.memory_space<vmem>>, vector<48x64xbf16>
    %c2_71 = arith.constant 2 : index
    %c0_72 = arith.constant 0 : index
    %c0_73 = arith.constant 0 : index
    %68 = vector.load %arg4[%c2_71, %c0_72, %c0_73] : memref<5x64x128xbf16, #tpu.memory_space<vmem>>, vector<1x64x128xbf16>
    %69 = vector.shape_cast %68 : vector<1x64x128xbf16> to vector<64x128xbf16>
    %cst_74 = arith.constant dense<0.000000e+00> : vector<48x128xf32>
    %70 = tpu.matmul %67, %69, %cst_74 {dimension_numbers = #tpu.dot_dimension_numbers<[1], [0], [0], [1], [0, 0, 1, 1], [], []>} : vector<48x64xbf16>, vector<64x128xbf16>, vector<48x128xf32> -> vector<48x128xf32>
    %71 = arith.addf %66, %70 : vector<48x128xf32>
    %c3_75 = arith.constant 3 : index
    %c0_76 = arith.constant 0 : index
    %72 = vector.load %arg14[%c3_75, %c0_76] : memref<52x64xbf16, #tpu.memory_space<vmem>>, vector<48x64xbf16>
    %c3_77 = arith.constant 3 : index
    %c0_78 = arith.constant 0 : index
    %c0_79 = arith.constant 0 : index
    %73 = vector.load %arg4[%c3_77, %c0_78, %c0_79] : memref<5x64x128xbf16, #tpu.memory_space<vmem>>, vector<1x64x128xbf16>
    %74 = vector.shape_cast %73 : vector<1x64x128xbf16> to vector<64x128xbf16>
    %cst_80 = arith.constant dense<0.000000e+00> : vector<48x128xf32>
    %75 = tpu.matmul %72, %74, %cst_80 {dimension_numbers = #tpu.dot_dimension_numbers<[1], [0], [0], [1], [0, 0, 1, 1], [], []>} : vector<48x64xbf16>, vector<64x128xbf16>, vector<48x128xf32> -> vector<48x128xf32>
    %76 = arith.addf %71, %75 : vector<48x128xf32>
    %c4_81 = arith.constant 4 : index
    %c0_82 = arith.constant 0 : index
    %77 = vector.load %arg14[%c4_81, %c0_82] : memref<52x64xbf16, #tpu.memory_space<vmem>>, vector<48x64xbf16>
    %c4_83 = arith.constant 4 : index
    %c0_84 = arith.constant 0 : index
    %c0_85 = arith.constant 0 : index
    %78 = vector.load %arg4[%c4_83, %c0_84, %c0_85] : memref<5x64x128xbf16, #tpu.memory_space<vmem>>, vector<1x64x128xbf16>
    %79 = vector.shape_cast %78 : vector<1x64x128xbf16> to vector<64x128xbf16>
    %cst_86 = arith.constant dense<0.000000e+00> : vector<48x128xf32>
    %80 = tpu.matmul %77, %79, %cst_86 {dimension_numbers = #tpu.dot_dimension_numbers<[1], [0], [0], [1], [0, 0, 1, 1], [], []>} : vector<48x64xbf16>, vector<64x128xbf16>, vector<48x128xf32> -> vector<48x128xf32>
    %81 = arith.addf %76, %80 : vector<48x128xf32>
    %c0_87 = arith.constant 0 : index
    %c0_88 = arith.constant 0 : index
    %82 = vector.load %arg5[%c0_87, %c0_88] : memref<1x128xf32, #tpu.memory_space<vmem>>, vector<1x128xf32>
    %83 = vector.broadcast %82 : vector<1x128xf32> to vector<48x128xf32>
    %84 = arith.addf %81, %83 : vector<48x128xf32>
    %cst_89 = arith.constant 0.000000e+00 : f32
    %85 = vector.broadcast %cst_89 : f32 to vector<48x128xf32>
    %86 = arith.maximumf %84, %85 : vector<48x128xf32>
    %87 = vector.shape_cast %86 : vector<48x128xf32> to vector<24x2x128xf32>
    %cst_90 = arith.constant dense<0xFF800000> : vector<24x128xf32>
    %88 = vector.multi_reduction <maximumf>, %87, %cst_90 [1] : vector<24x2x128xf32> to vector<24x128xf32>
    %cst_91 = arith.constant 0.000000e+00 : bf16
    %89 = vector.broadcast %cst_91 : bf16 to vector<1x128xbf16>
    %c0_92 = arith.constant 0 : index
    %c0_93 = arith.constant 0 : index
    %90 = vector.load %arg15[%c0_92, %c0_93] : memref<26x128xbf16, #tpu.memory_space<vmem>>, vector<1x128xbf16>
    tpu.vector_store %arg15[%c0_92, %c0_93], %89 {strides = array<i32>} : memref<26x128xbf16, #tpu.memory_space<vmem>>, vector<1x128xbf16>,
    %cst_94 = arith.constant 0.000000e+00 : bf16
    %91 = vector.broadcast %cst_94 : bf16 to vector<1x128xbf16>
    %c25 = arith.constant 25 : index
    %c0_95 = arith.constant 0 : index
    %92 = vector.load %arg15[%c25, %c0_95] : memref<26x128xbf16, #tpu.memory_space<vmem>>, vector<1x128xbf16>
    tpu.vector_store %arg15[%c25, %c0_95], %91 {strides = array<i32>} : memref<26x128xbf16, #tpu.memory_space<vmem>>, vector<1x128xbf16>,
    %93 = arith.truncf %88 : vector<24x128xf32> to vector<24x128xbf16>
    %c1_96 = arith.constant 1 : index
    %c0_97 = arith.constant 0 : index
    %94 = vector.load %arg15[%c1_96, %c0_97] : memref<26x128xbf16, #tpu.memory_space<vmem>>, vector<24x128xbf16>
    tpu.vector_store %arg15[%c1_96, %c0_97], %93 {strides = array<i32>} : memref<26x128xbf16, #tpu.memory_space<vmem>>, vector<24x128xbf16>,
    %cst_98 = arith.constant 0.000000e+00 : f32
    %95 = vector.broadcast %cst_98 : f32 to vector<24x256xf32>
    %c0_99 = arith.constant 0 : index
    %c0_100 = arith.constant 0 : index
    %96 = vector.load %arg15[%c0_99, %c0_100] : memref<26x128xbf16, #tpu.memory_space<vmem>>, vector<24x128xbf16>
    %c0_101 = arith.constant 0 : index
    %c0_102 = arith.constant 0 : index
    %c0_103 = arith.constant 0 : index
    %97 = vector.load %arg6[%c0_101, %c0_102, %c0_103] : memref<3x128x256xbf16, #tpu.memory_space<vmem>>, vector<1x128x256xbf16>
    %98 = vector.shape_cast %97 : vector<1x128x256xbf16> to vector<128x256xbf16>
    %cst_104 = arith.constant dense<0.000000e+00> : vector<24x256xf32>
    %99 = tpu.matmul %96, %98, %cst_104 {dimension_numbers = #tpu.dot_dimension_numbers<[1], [0], [0], [1], [0, 0, 1, 1], [], []>} : vector<24x128xbf16>, vector<128x256xbf16>, vector<24x256xf32> -> vector<24x256xf32>
    %100 = arith.addf %95, %99 : vector<24x256xf32>
    %c1_105 = arith.constant 1 : index
    %c0_106 = arith.constant 0 : index
    %101 = vector.load %arg15[%c1_105, %c0_106] : memref<26x128xbf16, #tpu.memory_space<vmem>>, vector<24x128xbf16>
    %c1_107 = arith.constant 1 : index
    %c0_108 = arith.constant 0 : index
    %c0_109 = arith.constant 0 : index
    %102 = vector.load %arg6[%c1_107, %c0_108, %c0_109] : memref<3x128x256xbf16, #tpu.memory_space<vmem>>, vector<1x128x256xbf16>
    %103 = vector.shape_cast %102 : vector<1x128x256xbf16> to vector<128x256xbf16>
    %cst_110 = arith.constant dense<0.000000e+00> : vector<24x256xf32>
    %104 = tpu.matmul %101, %103, %cst_110 {dimension_numbers = #tpu.dot_dimension_numbers<[1], [0], [0], [1], [0, 0, 1, 1], [], []>} : vector<24x128xbf16>, vector<128x256xbf16>, vector<24x256xf32> -> vector<24x256xf32>
    %105 = arith.addf %100, %104 : vector<24x256xf32>
    %c2_111 = arith.constant 2 : index
    %c0_112 = arith.constant 0 : index
    %106 = vector.load %arg15[%c2_111, %c0_112] : memref<26x128xbf16, #tpu.memory_space<vmem>>, vector<24x128xbf16>
    %c2_113 = arith.constant 2 : index
    %c0_114 = arith.constant 0 : index
    %c0_115 = arith.constant 0 : index
    %107 = vector.load %arg6[%c2_113, %c0_114, %c0_115] : memref<3x128x256xbf16, #tpu.memory_space<vmem>>, vector<1x128x256xbf16>
    %108 = vector.shape_cast %107 : vector<1x128x256xbf16> to vector<128x256xbf16>
    %cst_116 = arith.constant dense<0.000000e+00> : vector<24x256xf32>
    %109 = tpu.matmul %106, %108, %cst_116 {dimension_numbers = #tpu.dot_dimension_numbers<[1], [0], [0], [1], [0, 0, 1, 1], [], []>} : vector<24x128xbf16>, vector<128x256xbf16>, vector<24x256xf32> -> vector<24x256xf32>
    %110 = arith.addf %105, %109 : vector<24x256xf32>
    %c0_117 = arith.constant 0 : index
    %c0_118 = arith.constant 0 : index
    %111 = vector.load %arg7[%c0_117, %c0_118] : memref<1x256xf32, #tpu.memory_space<vmem>>, vector<1x256xf32>
    %112 = vector.broadcast %111 : vector<1x256xf32> to vector<24x256xf32>
    %113 = arith.addf %110, %112 : vector<24x256xf32>
    %cst_119 = arith.constant 0.000000e+00 : f32
    %114 = vector.broadcast %cst_119 : f32 to vector<24x256xf32>
    %115 = arith.maximumf %113, %114 : vector<24x256xf32>
    %116 = vector.shape_cast %115 : vector<24x256xf32> to vector<12x2x256xf32>
    %cst_120 = arith.constant dense<0xFF800000> : vector<12x256xf32>
    %117 = vector.multi_reduction <maximumf>, %116, %cst_120 [1] : vector<12x2x256xf32> to vector<12x256xf32>
    %118 = arith.truncf %117 : vector<12x256xf32> to vector<12x256xbf16>
    %c0_121 = arith.constant 0 : index
    %c0_122 = arith.constant 0 : index
    %119 = vector.load %arg16[%c0_121, %c0_122] : memref<12x256xbf16, #tpu.memory_space<vmem>>, vector<12x256xbf16>
    tpu.vector_store %arg16[%c0_121, %c0_122], %118 {strides = array<i32>} : memref<12x256xbf16, #tpu.memory_space<vmem>>, vector<12x256xbf16>,
    %cst_123 = arith.constant 0.000000e+00 : f32
    %120 = vector.broadcast %cst_123 : f32 to vector<1x128xf32>
    %c0_124 = arith.constant 0 : index
    %c0_125 = arith.constant 0 : index
    %121 = vector.load %arg16[%c0_124, %c0_125] : memref<12x256xbf16, #tpu.memory_space<vmem>>, vector<1x256xbf16>
    %c0_126 = arith.constant 0 : index
    %c0_127 = arith.constant 0 : index
    %c0_128 = arith.constant 0 : index
    %122 = vector.load %arg8[%c0_126, %c0_127, %c0_128] : memref<12x256x128xbf16, #tpu.memory_space<vmem>>, vector<1x256x128xbf16>
    %123 = vector.shape_cast %122 : vector<1x256x128xbf16> to vector<256x128xbf16>
    %cst_129 = arith.constant dense<0.000000e+00> : vector<1x128xf32>
    %124 = tpu.matmul %121, %123, %cst_129 {dimension_numbers = #tpu.dot_dimension_numbers<[1], [0], [0], [1], [0, 0, 1, 1], [], []>} : vector<1x256xbf16>, vector<256x128xbf16>, vector<1x128xf32> -> vector<1x128xf32>
    %125 = arith.addf %120, %124 : vector<1x128xf32>
    %c1_130 = arith.constant 1 : index
    %c0_131 = arith.constant 0 : index
    %126 = vector.load %arg16[%c1_130, %c0_131] : memref<12x256xbf16, #tpu.memory_space<vmem>>, vector<1x256xbf16>
    %c1_132 = arith.constant 1 : index
    %c0_133 = arith.constant 0 : index
    %c0_134 = arith.constant 0 : index
    %127 = vector.load %arg8[%c1_132, %c0_133, %c0_134] : memref<12x256x128xbf16, #tpu.memory_space<vmem>>, vector<1x256x128xbf16>
    %128 = vector.shape_cast %127 : vector<1x256x128xbf16> to vector<256x128xbf16>
    %cst_135 = arith.constant dense<0.000000e+00> : vector<1x128xf32>
    %129 = tpu.matmul %126, %128, %cst_135 {dimension_numbers = #tpu.dot_dimension_numbers<[1], [0], [0], [1], [0, 0, 1, 1], [], []>} : vector<1x256xbf16>, vector<256x128xbf16>, vector<1x128xf32> -> vector<1x128xf32>
    %130 = arith.addf %125, %129 : vector<1x128xf32>
    %c2_136 = arith.constant 2 : index
    %c0_137 = arith.constant 0 : index
    %131 = vector.load %arg16[%c2_136, %c0_137] : memref<12x256xbf16, #tpu.memory_space<vmem>>, vector<1x256xbf16>
    %c2_138 = arith.constant 2 : index
    %c0_139 = arith.constant 0 : index
    %c0_140 = arith.constant 0 : index
    %132 = vector.load %arg8[%c2_138, %c0_139, %c0_140] : memref<12x256x128xbf16, #tpu.memory_space<vmem>>, vector<1x256x128xbf16>
    %133 = vector.shape_cast %132 : vector<1x256x128xbf16> to vector<256x128xbf16>
    %cst_141 = arith.constant dense<0.000000e+00> : vector<1x128xf32>
    %134 = tpu.matmul %131, %133, %cst_141 {dimension_numbers = #tpu.dot_dimension_numbers<[1], [0], [0], [1], [0, 0, 1, 1], [], []>} : vector<1x256xbf16>, vector<256x128xbf16>, vector<1x128xf32> -> vector<1x128xf32>
    %135 = arith.addf %130, %134 : vector<1x128xf32>
    %c3_142 = arith.constant 3 : index
    %c0_143 = arith.constant 0 : index
    %136 = vector.load %arg16[%c3_142, %c0_143] : memref<12x256xbf16, #tpu.memory_space<vmem>>, vector<1x256xbf16>
    %c3_144 = arith.constant 3 : index
    %c0_145 = arith.constant 0 : index
    %c0_146 = arith.constant 0 : index
    %137 = vector.load %arg8[%c3_144, %c0_145, %c0_146] : memref<12x256x128xbf16, #tpu.memory_space<vmem>>, vector<1x256x128xbf16>
    %138 = vector.shape_cast %137 : vector<1x256x128xbf16> to vector<256x128xbf16>
    %cst_147 = arith.constant dense<0.000000e+00> : vector<1x128xf32>
    %139 = tpu.matmul %136, %138, %cst_147 {dimension_numbers = #tpu.dot_dimension_numbers<[1], [0], [0], [1], [0, 0, 1, 1], [], []>} : vector<1x256xbf16>, vector<256x128xbf16>, vector<1x128xf32> -> vector<1x128xf32>
    %140 = arith.addf %135, %139 : vector<1x128xf32>
    %c4_148 = arith.constant 4 : index
    %c0_149 = arith.constant 0 : index
    %141 = vector.load %arg16[%c4_148, %c0_149] : memref<12x256xbf16, #tpu.memory_space<vmem>>, vector<1x256xbf16>
    %c4_150 = arith.constant 4 : index
    %c0_151 = arith.constant 0 : index
    %c0_152 = arith.constant 0 : index
    %142 = vector.load %arg8[%c4_150, %c0_151, %c0_152] : memref<12x256x128xbf16, #tpu.memory_space<vmem>>, vector<1x256x128xbf16>
    %143 = vector.shape_cast %142 : vector<1x256x128xbf16> to vector<256x128xbf16>
    %cst_153 = arith.constant dense<0.000000e+00> : vector<1x128xf32>
    %144 = tpu.matmul %141, %143, %cst_153 {dimension_numbers = #tpu.dot_dimension_numbers<[1], [0], [0], [1], [0, 0, 1, 1], [], []>} : vector<1x256xbf16>, vector<256x128xbf16>, vector<1x128xf32> -> vector<1x128xf32>
    %145 = arith.addf %140, %144 : vector<1x128xf32>
    %c5_154 = arith.constant 5 : index
    %c0_155 = arith.constant 0 : index
    %146 = vector.load %arg16[%c5_154, %c0_155] : memref<12x256xbf16, #tpu.memory_space<vmem>>, vector<1x256xbf16>
    %c5_156 = arith.constant 5 : index
    %c0_157 = arith.constant 0 : index
    %c0_158 = arith.constant 0 : index
    %147 = vector.load %arg8[%c5_156, %c0_157, %c0_158] : memref<12x256x128xbf16, #tpu.memory_space<vmem>>, vector<1x256x128xbf16>
    %148 = vector.shape_cast %147 : vector<1x256x128xbf16> to vector<256x128xbf16>
    %cst_159 = arith.constant dense<0.000000e+00> : vector<1x128xf32>
    %149 = tpu.matmul %146, %148, %cst_159 {dimension_numbers = #tpu.dot_dimension_numbers<[1], [0], [0], [1], [0, 0, 1, 1], [], []>} : vector<1x256xbf16>, vector<256x128xbf16>, vector<1x128xf32> -> vector<1x128xf32>
    %150 = arith.addf %145, %149 : vector<1x128xf32>
    %c6_160 = arith.constant 6 : index
    %c0_161 = arith.constant 0 : index
    %151 = vector.load %arg16[%c6_160, %c0_161] : memref<12x256xbf16, #tpu.memory_space<vmem>>, vector<1x256xbf16>
    %c6_162 = arith.constant 6 : index
    %c0_163 = arith.constant 0 : index
    %c0_164 = arith.constant 0 : index
    %152 = vector.load %arg8[%c6_162, %c0_163, %c0_164] : memref<12x256x128xbf16, #tpu.memory_space<vmem>>, vector<1x256x128xbf16>
    %153 = vector.shape_cast %152 : vector<1x256x128xbf16> to vector<256x128xbf16>
    %cst_165 = arith.constant dense<0.000000e+00> : vector<1x128xf32>
    %154 = tpu.matmul %151, %153, %cst_165 {dimension_numbers = #tpu.dot_dimension_numbers<[1], [0], [0], [1], [0, 0, 1, 1], [], []>} : vector<1x256xbf16>, vector<256x128xbf16>, vector<1x128xf32> -> vector<1x128xf32>
    %155 = arith.addf %150, %154 : vector<1x128xf32>
    %c7 = arith.constant 7 : index
    %c0_166 = arith.constant 0 : index
    %156 = vector.load %arg16[%c7, %c0_166] : memref<12x256xbf16, #tpu.memory_space<vmem>>, vector<1x256xbf16>
    %c7_167 = arith.constant 7 : index
    %c0_168 = arith.constant 0 : index
    %c0_169 = arith.constant 0 : index
    %157 = vector.load %arg8[%c7_167, %c0_168, %c0_169] : memref<12x256x128xbf16, #tpu.memory_space<vmem>>, vector<1x256x128xbf16>
    %158 = vector.shape_cast %157 : vector<1x256x128xbf16> to vector<256x128xbf16>
    %cst_170 = arith.constant dense<0.000000e+00> : vector<1x128xf32>
    %159 = tpu.matmul %156, %158, %cst_170 {dimension_numbers = #tpu.dot_dimension_numbers<[1], [0], [0], [1], [0, 0, 1, 1], [], []>} : vector<1x256xbf16>, vector<256x128xbf16>, vector<1x128xf32> -> vector<1x128xf32>
    %160 = arith.addf %155, %159 : vector<1x128xf32>
    %c8 = arith.constant 8 : index
    %c0_171 = arith.constant 0 : index
    %161 = vector.load %arg16[%c8, %c0_171] : memref<12x256xbf16, #tpu.memory_space<vmem>>, vector<1x256xbf16>
    %c8_172 = arith.constant 8 : index
    %c0_173 = arith.constant 0 : index
    %c0_174 = arith.constant 0 : index
    %162 = vector.load %arg8[%c8_172, %c0_173, %c0_174] : memref<12x256x128xbf16, #tpu.memory_space<vmem>>, vector<1x256x128xbf16>
    %163 = vector.shape_cast %162 : vector<1x256x128xbf16> to vector<256x128xbf16>
    %cst_175 = arith.constant dense<0.000000e+00> : vector<1x128xf32>
    %164 = tpu.matmul %161, %163, %cst_175 {dimension_numbers = #tpu.dot_dimension_numbers<[1], [0], [0], [1], [0, 0, 1, 1], [], []>} : vector<1x256xbf16>, vector<256x128xbf16>, vector<1x128xf32> -> vector<1x128xf32>
    %165 = arith.addf %160, %164 : vector<1x128xf32>
    %c9 = arith.constant 9 : index
    %c0_176 = arith.constant 0 : index
    %166 = vector.load %arg16[%c9, %c0_176] : memref<12x256xbf16, #tpu.memory_space<vmem>>, vector<1x256xbf16>
    %c9_177 = arith.constant 9 : index
    %c0_178 = arith.constant 0 : index
    %c0_179 = arith.constant 0 : index
    %167 = vector.load %arg8[%c9_177, %c0_178, %c0_179] : memref<12x256x128xbf16, #tpu.memory_space<vmem>>, vector<1x256x128xbf16>
    %168 = vector.shape_cast %167 : vector<1x256x128xbf16> to vector<256x128xbf16>
    %cst_180 = arith.constant dense<0.000000e+00> : vector<1x128xf32>
    %169 = tpu.matmul %166, %168, %cst_180 {dimension_numbers = #tpu.dot_dimension_numbers<[1], [0], [0], [1], [0, 0, 1, 1], [], []>} : vector<1x256xbf16>, vector<256x128xbf16>, vector<1x128xf32> -> vector<1x128xf32>
    %170 = arith.addf %165, %169 : vector<1x128xf32>
    %c10 = arith.constant 10 : index
    %c0_181 = arith.constant 0 : index
    %171 = vector.load %arg16[%c10, %c0_181] : memref<12x256xbf16, #tpu.memory_space<vmem>>, vector<1x256xbf16>
    %c10_182 = arith.constant 10 : index
    %c0_183 = arith.constant 0 : index
    %c0_184 = arith.constant 0 : index
    %172 = vector.load %arg8[%c10_182, %c0_183, %c0_184] : memref<12x256x128xbf16, #tpu.memory_space<vmem>>, vector<1x256x128xbf16>
    %173 = vector.shape_cast %172 : vector<1x256x128xbf16> to vector<256x128xbf16>
    %cst_185 = arith.constant dense<0.000000e+00> : vector<1x128xf32>
    %174 = tpu.matmul %171, %173, %cst_185 {dimension_numbers = #tpu.dot_dimension_numbers<[1], [0], [0], [1], [0, 0, 1, 1], [], []>} : vector<1x256xbf16>, vector<256x128xbf16>, vector<1x128xf32> -> vector<1x128xf32>
    %175 = arith.addf %170, %174 : vector<1x128xf32>
    %c11 = arith.constant 11 : index
    %c0_186 = arith.constant 0 : index
    %176 = vector.load %arg16[%c11, %c0_186] : memref<12x256xbf16, #tpu.memory_space<vmem>>, vector<1x256xbf16>
    %c11_187 = arith.constant 11 : index
    %c0_188 = arith.constant 0 : index
    %c0_189 = arith.constant 0 : index
    %177 = vector.load %arg8[%c11_187, %c0_188, %c0_189] : memref<12x256x128xbf16, #tpu.memory_space<vmem>>, vector<1x256x128xbf16>
    %178 = vector.shape_cast %177 : vector<1x256x128xbf16> to vector<256x128xbf16>
    %cst_190 = arith.constant dense<0.000000e+00> : vector<1x128xf32>
    %179 = tpu.matmul %176, %178, %cst_190 {dimension_numbers = #tpu.dot_dimension_numbers<[1], [0], [0], [1], [0, 0, 1, 1], [], []>} : vector<1x256xbf16>, vector<256x128xbf16>, vector<1x128xf32> -> vector<1x128xf32>
    %180 = arith.addf %175, %179 : vector<1x128xf32>
    %c0_191 = arith.constant 0 : index
    %c0_192 = arith.constant 0 : index
    %181 = vector.load %arg9[%c0_191, %c0_192] : memref<1x128xf32, #tpu.memory_space<vmem>>, vector<1x128xf32>
    %182 = arith.addf %180, %181 : vector<1x128xf32>
    %183 = arith.truncf %182 : vector<1x128xf32> to vector<1x128xbf16>
    %c0_193 = arith.constant 0 : index
    %c0_194 = arith.constant 0 : index
    %184 = vector.load %arg10[%c0_193, %c0_194] : memref<128x128xbf16, #tpu.memory_space<vmem>>, vector<128x128xbf16>
    %cst_195 = arith.constant dense<0.000000e+00> : vector<1x128xf32>
    %185 = tpu.matmul %183, %184, %cst_195 {dimension_numbers = #tpu.dot_dimension_numbers<[1], [0], [0], [1], [0, 0, 1, 1], [], []>} : vector<1x128xbf16>, vector<128x128xbf16>, vector<1x128xf32> -> vector<1x128xf32>
    %c0_196 = arith.constant 0 : index
    %c0_197 = arith.constant 0 : index
    %186 = vector.load %arg11[%c0_196, %c0_197] : memref<1x128xf32, #tpu.memory_space<vmem>>, vector<1x128xf32>
    %187 = arith.addf %185, %186 : vector<1x128xf32>
    %cst_198 = arith.constant dense<0xFF800000> : vector<1xf32>
    %188 = vector.multi_reduction <maximumf>, %187, %cst_198 [1] : vector<1x128xf32> to vector<1xf32>
    %189 = vector.shape_cast %188 : vector<1xf32> to vector<1x1xf32>
    %190 = vector.broadcast %189 : vector<1x1xf32> to vector<1x128xf32>
    %191 = arith.subf %187, %190 : vector<1x128xf32>
    %192 = math.exp %191 : vector<1x128xf32>
    %cst_199 = arith.constant dense<0.000000e+00> : vector<1xf32>
    %193 = vector.multi_reduction <add>, %192, %cst_199 [1] : vector<1x128xf32> to vector<1xf32>
    %194 = vector.shape_cast %193 : vector<1xf32> to vector<1x1xf32>
    %195 = math.log %194 : vector<1x1xf32>
    %196 = vector.broadcast %195 : vector<1x1xf32> to vector<1x128xf32>
    %197 = arith.subf %191, %196 : vector<1x128xf32>
    %c0_200 = arith.constant 0 : index
    %c0_201 = arith.constant 0 : index
    %c0_202 = arith.constant 0 : index
    %198 = vector.load %arg12[%c0_200, %c0_201, %c0_202] : memref<1x1x128xf32, #tpu.memory_space<vmem>>, vector<1x1x128xf32>
    %199 = vector.shape_cast %198 : vector<1x1x128xf32> to vector<1x128xf32>
    %200 = vector.shape_cast %197 : vector<1x128xf32> to vector<1x1x128xf32>
    tpu.vector_store %arg12[%c0_200, %c0_201, %c0_202], %200 {strides = array<i32>} : memref<1x1x128xf32, #tpu.memory_space<vmem>>, vector<1x1x128xf32>,
    return
  }
  func.func @transform_0(%arg0: i32) -> (i32, i32, i32) {
    %c0_i32 = arith.constant 0 : i32
    %c0_i32_0 = arith.constant 0 : i32
    %c0_i32_1 = arith.constant 0 : i32
    return %arg0, %c0_i32, %c0_i32_0 : i32, i32, i32
  }
  func.func @transform_1(%arg0: i32) -> (i32, i32, i32) {
    %c0_i32 = arith.constant 0 : i32
    %c0_i32_0 = arith.constant 0 : i32
    %c0_i32_1 = arith.constant 0 : i32
    %c0_i32_2 = arith.constant 0 : i32
    return %c0_i32, %c0_i32_0, %c0_i32_1 : i32, i32, i32
  }
  func.func @transform_2(%arg0: i32) -> (i32, i32) {
    %c0_i32 = arith.constant 0 : i32
    %c0_i32_0 = arith.constant 0 : i32
    %c0_i32_1 = arith.constant 0 : i32
    return %c0_i32, %c0_i32_0 : i32, i32
  }
  func.func @transform_3(%arg0: i32) -> (i32, i32, i32) {
    %c0_i32 = arith.constant 0 : i32
    %c0_i32_0 = arith.constant 0 : i32
    %c0_i32_1 = arith.constant 0 : i32
    %c0_i32_2 = arith.constant 0 : i32
    return %c0_i32, %c0_i32_0, %c0_i32_1 : i32, i32, i32
  }
  func.func @transform_4(%arg0: i32) -> (i32, i32) {
    %c0_i32 = arith.constant 0 : i32
    %c0_i32_0 = arith.constant 0 : i32
    %c0_i32_1 = arith.constant 0 : i32
    return %c0_i32, %c0_i32_0 : i32, i32
  }
  func.func @transform_5(%arg0: i32) -> (i32, i32, i32) {
    %c0_i32 = arith.constant 0 : i32
    %c0_i32_0 = arith.constant 0 : i32
    %c0_i32_1 = arith.constant 0 : i32
    %c0_i32_2 = arith.constant 0 : i32
    return %c0_i32, %c0_i32_0, %c0_i32_1 : i32, i32, i32
  }
  func.func @transform_6(%arg0: i32) -> (i32, i32) {
    %c0_i32 = arith.constant 0 : i32
    %c0_i32_0 = arith.constant 0 : i32
    %c0_i32_1 = arith.constant 0 : i32
    return %c0_i32, %c0_i32_0 : i32, i32
  }
  func.func @transform_7(%arg0: i32) -> (i32, i32, i32) {
    %c0_i32 = arith.constant 0 : i32
    %c0_i32_0 = arith.constant 0 : i32
    %c0_i32_1 = arith.constant 0 : i32
    %c0_i32_2 = arith.constant 0 : i32
    return %c0_i32, %c0_i32_0, %c0_i32_1 : i32, i32, i32
  }
  func.func @transform_8(%arg0: i32) -> (i32, i32) {
    %c0_i32 = arith.constant 0 : i32
    %c0_i32_0 = arith.constant 0 : i32
    %c0_i32_1 = arith.constant 0 : i32
    return %c0_i32, %c0_i32_0 : i32, i32
  }
  func.func @transform_9(%arg0: i32) -> (i32, i32) {
    %c0_i32 = arith.constant 0 : i32
    %c0_i32_0 = arith.constant 0 : i32
    %c0_i32_1 = arith.constant 0 : i32
    return %c0_i32, %c0_i32_0 : i32, i32
  }
  func.func @transform_10(%arg0: i32) -> (i32, i32) {
    %c0_i32 = arith.constant 0 : i32
    %c0_i32_0 = arith.constant 0 : i32
    %c0_i32_1 = arith.constant 0 : i32
    return %c0_i32, %c0_i32_0 : i32, i32
  }
  func.func @transform_11(%arg0: i32) -> (i32, i32, i32) {
    %c0_i32 = arith.constant 0 : i32
    %c0_i32_0 = arith.constant 0 : i32
    %c0_i32_1 = arith.constant 0 : i32
    return %arg0, %c0_i32, %c0_i32_0 : i32, i32, i32
  }
}

</mosaic_0001>

<bundles_post_ra>
// kernel: simple_1d_cnn_forward.1
= control target key start
LH: loop header
LB: loop body
LE: loop exit
PB: predicated region body
PF: predicated region fallthrough
CT: control target
= control target key end

     0   :  { %s10229_s0 = inlined_call_operand.vmem [shape: bf16[2,96,4], index: 0, kind: input, shape index: {}]   ;;  %s10230_s1 = inlined_call_operand.vmem [shape: bf16[7,4,64], index: 1, kind: input, shape index: {}]   ;;  %s10231_s2 = inlined_call_operand.vmem [shape: f32[1,64], index: 2, kind: input, shape index: {}]   ;;  %s10232_s3 = inlined_call_operand.hbm [shape: bf16[5,64,128], index: 3, kind: input, shape index: {}]   ;;  %s10233_s4 = inlined_call_operand.vmem [shape: f32[1,128], index: 4, kind: input, shape index: {}]   ;;  %s10234_s5 = inlined_call_operand.hbm [shape: bf16[3,128,256], index: 5, kind: input, shape index: {}]   ;;  %s10235_s6 = inlined_call_operand.vmem [shape: f32[1,256], index: 6, kind: input, shape index: {}]   ;;  %s10236_s7 = inlined_call_operand.hbm [shape: bf16[12,256,128], index: 7, kind: input, shape index: {}]   ;;  %s10237_s8 = inlined_call_operand.vmem [shape: f32[1,128], index: 8, kind: input, shape index: {}]   ;;  %s10238_s9 = inlined_call_operand.vmem [shape: bf16[128,128], index: 9, kind: input, shape index: {}]   ;;  %s10239_s10 = inlined_call_operand.vmem [shape: f32[1,128], index: 10, kind: input, shape index: {}]   ;;  %s10240_s11 = inlined_call_operand.hbm [shape: f32[2,1,128], index: 11, kind: output, shape index: {}]  }
   0x1   :  { %10257 = sst [smem:[#allocation22_spill]] %s10234_s5 }
   0x2   :  { %16 = vsyncpa [#allocation7], 0 }
   0x3   :  { %17 = vsyncpa [#allocation10], 0 }
   0x4   :  { %18 = vsyncpa [#allocation8], 0 }
   0x5   :  { %20 = vsyncpa [#allocation8 + $0x1], 0  ;;  %s8895_s17 = smov 0   ;;  %s8897_s18 = smov 0  }
   0x6   :  { %s8899_s19 = smov 0   ;;  %s8901_s20 = smov 0  }
   0x7 LB: > { %10258 = sst [smem:[#allocation16_spill]] %s8809_s17  ;;  %s8916_s21 = sadd.s32 4294967295, %s8821_s20   ;;  %s8821_s20 = sphi %s8901_s20, %s10341_s20   ;;  %s8817_s19 = sphi %s8899_s19, %s10343_s19   ;;  %s8813_s18 = sphi %s8897_s18, %s10345_s18   ;;  %s8809_s17 = sphi %s8895_s17, %s10344_s17  }
   0x8   : > { %10259 = sst [smem:[#allocation17_spill]] %s8817_s19  ;;  %s7044_s22 = sadd.s32 4294967294, %s8821_s20  }
   0x9   : > { %10260 = sst [smem:[#allocation18_spill]] %s8821_s20  ;;  %s8920_s23 = sadd.s32 1, %s8821_s20  }
   0xa   : > { %10261 = sst [smem:[#allocation19_spill]] %s8920_s23  ;;  %s269_s24 = sadd.s32 1, %s8817_s19 }
   0xb   : > { %s266_s25 = ssub.s32 %s8821_s20, %s8920_s23  ;;  %p279_p0 = scmp.ne.s32.totalorder %s8817_s19, %s8813_s18 }
   0xc   : > { %p267_p1 = scmp.eq.s32.totalorder %s266_s25, 0  ;;  %p280_p2 = scmp.eq.s32.totalorder %s8916_s21, 1 }
   0xd   : > { %p285_p3 = scmp.ne.s32.totalorder %s8813_s18, %s8809_s17  ;;  %p286_p4 = scmp.eq.s32.totalorder %s7044_s22, 1 }
   0xe   : > { %s8931_s26 = scalar_select %p267_p1, %s8817_s19, %s269_s24  }
   0xf   : > { %p8933_p5 = por %p280_p2, %p279_p0  ;;  %p8937_p6 = por %p286_p4, %p285_p3 }
  0x10   : > { %10262 = sst [smem:[#allocation20_spill]] %s8931_s26  ;;  %p7045_p7 = scmp.ge.s32.totalorder %s8821_s20, 1 }
  0x11   : > { %s10263_s27 = scalar_select %p8933_p5, 1, 0 }
  0x12   : > { %s10264_s28 = scalar_select %p8937_p6, 1, 0 }
  0x13   : > { %p293_p8 = scmp.lt.s32.totalorder %s8821_s20, 3  ;;  %p10242_p9 = scmp.eq.s32.totalorder %s8916_s21, 0 }
  0x14   : > { %10265 = sst [smem:[#allocation21_spill]] %s10264_s28  ;;  %s8823_s30 = smov [#allocation9]  }
  0x15   : > { %p8944_p10 = pnand %p7045_p7, %p293_p8  ;;  %s327_s12 = sshll.u32 %s8823_s30, 4  ;;  %s328_s12 = int_to_ptr.vmem [resolvable:$true] %s327_s12 }
  0x16   : > { %s8824_s14 = smov [#allocation6]   ;;  %s10268_s5 = sld [smem:[#allocation22_spill]] }
  0x17   : > { %s10266_s29 = scalar_select %p8944_p10, 1, 0 }
  0x18   : > { %p8276_p11 = pneg %p8944_p10  ;;  %s311_s15 = sshll.u32 %s8824_s14, 4  ;;  %s8956_s15 = int_to_ptr.vmem [resolvable:$true] %s311_s15 }
  0x1a   : > { %p8952_p12 = pnand %p10242_p9, %p8276_p11 }
  0x1c   : > { %s8667_s24 = scalar_lea.hbm %s10268_s5, 6144  ;;  %p8966_p0 = pneg %p8952_p12 }
  0x1d   : > { %p8668_p13 = scmp.ne.s32.totalorder %s10268_s5, %s8667_s24  ;;  %p8674_p3 = scmp.lt.u32.totalorder %s8667_s24, %s10268_s5 }
  0x1f   : > { %p8670_p1 = pnand %p8966_p0, %p8668_p13 }
  0x21   : > { %p8671_p2 = pneg %p8670_p1 }
  0x23   : > { %p8676_p4 = pnand %p8674_p3, %p8671_p2 }
  0x25   : > { %8679 = shalt.err (!%p8676_p4)
}
  0x26   : > { %s8680_s16 = scalar_lea.vmem %s328_s12, 6144  ;;  %p8688_p9 = scmp.lt.s32.totalorder %s328_s12, %s328_s12 }
  0x27   : > { %p8681_p7 = scmp.ne.s32.totalorder %s328_s12, %s8680_s16  ;;  %p8689_p6 = scmp.lt.s32.totalorder %s8680_s16, %s8680_s16 }
  0x29   : > { %p8683_p8 = pnand %p8681_p7, %p8966_p0  ;;  %p8690_p5 = por %p8689_p6, %p8688_p9 }
  0x2b   : > { %p8684_p11 = pneg %p8683_p8 }
  0x2d   : > { %p8691_p10 = pnand %p8690_p5, %p8684_p11 }
  0x2f   : > { %8694 = shalt.err (!%p8691_p10)
}
  0x30   : > { %s8825_s26 = smov 128   ;;  %s8826_s22 = smov 8  }
  0x31   : > { %8282 = dma.hbm_to_vmem [thread:$0]  (!%p8952_p12), %s10268_s5, 6144, %s328_s12, [#allocation10], %s8825_s26, %s8825_s26, %s8826_s22  }
  0x32   : > { %s8695_s23 = scalar_lea.hbm %s10232_s3, 2560 }
  0x33   : > { %p8696_p13 = scmp.ne.s32.totalorder %s10232_s3, %s8695_s23  ;;  %p8702_p9 = scmp.lt.u32.totalorder %s8695_s23, %s10232_s3 }
  0x35   : > { %p8698_p5 = pnand %p8696_p13, %p8966_p0 }
  0x37   : > { %p8699_p6 = pneg %p8698_p5 }
  0x39   : > { %p8704_p10 = pnand %p8702_p9, %p8699_p6 }
  0x3b   : > { %8707 = shalt.err (!%p8704_p10)
}
  0x3c   : > { %s8708_s12 = scalar_lea.vmem %s8956_s15, 2560  ;;  %p8716_p4 = scmp.lt.s32.totalorder %s8956_s15, %s8956_s15 }
  0x3d   : > { %p8709_p1 = scmp.ne.s32.totalorder %s8956_s15, %s8708_s12  ;;  %p8717_p7 = scmp.lt.s32.totalorder %s8708_s12, %s8708_s12 }
  0x3f   : > { %p8711_p2 = pnand %p8709_p1, %p8966_p0  ;;  %p8718_p8 = por %p8717_p7, %p8716_p4 }
  0x41   : > { %p8712_p3 = pneg %p8711_p2 }
  0x43   : > { %p8719_p11 = pnand %p8718_p8, %p8712_p3 }
  0x45   : > { %8722 = shalt.err (!%p8719_p11)
}
  0x46   : > { %s8827_s17 = smov 64   ;;  %s8828_s20 = smov 4  }
  0x47   : > { %8279 = dma.hbm_to_vmem [thread:$0]  (!%p8952_p12), %s10232_s3, 2560, %s8956_s15, [#allocation7], %s8827_s17, %s8827_s17, %s8828_s20  }
  0x48   : > { %s8829_s26 = smov [#allocation11]   ;;  %s8723_s25 = scalar_lea.hbm %s10236_s7, 24576 }
  0x49   : > { %s343_s22 = sshll.u32 %s8829_s26, 4  ;;  %p8724_p13 = scmp.ne.s32.totalorder %s10236_s7, %s8723_s25  ;;  %s344_s22 = int_to_ptr.vmem [resolvable:$true] %s343_s22 }
  0x4a   : > { %p8730_p9 = scmp.lt.u32.totalorder %s8723_s25, %s10236_s7 }
  0x4b   : > { %p8726_p5 = pnand %p8724_p13, %p8966_p0 }
  0x4d   : > { %p8727_p6 = pneg %p8726_p5 }
  0x4f   : > { %p8732_p10 = pnand %p8730_p9, %p8727_p6 }
  0x51   : > { %8735 = shalt.err (!%p8732_p10)
}
  0x52   : > { %s8736_s15 = scalar_lea.vmem %s344_s22, 24576  ;;  %p8744_p4 = scmp.lt.s32.totalorder %s344_s22, %s344_s22 }
  0x53   : > { %p8737_p1 = scmp.ne.s32.totalorder %s344_s22, %s8736_s15  ;;  %p8745_p7 = scmp.lt.s32.totalorder %s8736_s15, %s8736_s15 }
  0x55   : > { %p8739_p2 = pnand %p8737_p1, %p8966_p0  ;;  %p8746_p8 = por %p8745_p7, %p8744_p4 }
  0x57   : > { %p8740_p3 = pneg %p8739_p2 }
  0x59   : > { %p8747_p11 = pnand %p8746_p8, %p8740_p3 }
  0x5b   : > { %8750 = shalt.err (!%p8747_p11)
}
  0x5c   : > { %8285 = dma.hbm_to_vmem [thread:$0]  (!%p8952_p12), %s10236_s7, 24576, %s344_s22, [#allocation10], %s8827_s17, %s8827_s17, %s8828_s20  }
  0x5d   : > { %p10270_p13 = scmp.ne.s32.totalorder %s10266_s29, 0 }
  0x5e   : > { %p10271_p5 = scmp.eq.s32.totalorder (!%p10270_p13), %s8916_s21, 0 }
  0x5f   : > { %376 = sbr.rel (%p10270_p13) target bundleno = 2332 (0x91c), region = 64 }
  0x66   : > { %8796 = dma.done.wait (%p10271_p5), [#allocation7], 2560   ;;  %p10272_p0 = pmov %p10271_p5 }
  0x68   : > { %8798 = vsyncadd (%p10272_p0), [#allocation7], 4294964736  ;;  %p10273_p6 = pmov %p10272_p0 }
  0x69   : > { %p10274_p9 = pmov %p10272_p0 }
  0x6a   : > { %8800 = dma.done.wait (%p10273_p6), [#allocation10], 30720  }
  0x6b   : > { %8802 = vsyncadd (%p10274_p9), [#allocation10], 4294936576  ;;  %p423_p10 = scmp.lt.s32.totalorder %s8916_s21, 1  ;;  %vm429_vm0 = vcmask 25600   ;;  %vm430_vm1 = vsmask.f32 1280 }
  0x6c   : > { %vm10254_vm2 = vcmask 1041408   ;;  %vm9036_vm3 = vmand %vm429_vm0, %vm430_vm1  ;;  %vm436_vm4 = vsmask.f32 7942  ;;  %vm453_vm5 = vsmask.f32 5392  ;;  %vm587_vm6 = vcmask 27649  }
  0x6d   : > { %s424_s5 = scalar_select %p423_p10, %s8916_s21, 1  ;;  %v7055_v1 = vld [vmem:[%s10230_s1 + $0x2] sm:$0x3]  ;;  %v432_v2 = vld [vmem:[#allocation2] sm:$0x3]  ;;  %vm592_vm7 = vcmask 27648   ;;  %vm9068_vm8 = vmor %vm430_vm1, %vm453_vm5 }
  0x6e   : > { %8253 = vmatprep.subr.msk.bf16.mxu0 %vm10254_vm2, %v7055_v1  ;;  %v730_v4 = vsel %vm10254_vm2, %v7055_v1, 0  ;;  %v433_v5 = vsel %vm9036_vm3, 0, %v432_v2  ;;  %8254 = vmatprep.subr.msk.bf16.mxu1 %vm10254_vm2, %v7055_v1  ;;  %v9060_v17 = vld [vmem:[%s10230_s1] sm:$0x3]  ;;  %vm9074_vm9 = vmand %vm587_vm6, %vm436_vm4  ;;  %vm435_vm10 = vcmask 26625   ;;  %vm709_vm12 = vcmask 31744  }
  0x6f   : > { %s8261_s29 = smul.u32 48, %s424_s5  ;;  %7954 = vmatpush3.bf16.msra.mxu0 %v730_v4  ;;  %434 = vst [vmem:[#allocation2] sm:$0x3] %v433_v5  ;;  %8172 = vmatpush3.bf16.msra.mxu1 %v730_v4  ;;  %vm656_vm11 = vsmask.f32 7424  ;;  %vm9131_vm13 = vmand %vm435_vm10, %vm436_vm4  ;;  %vm1207_vm14 = vcmask 1045504  }
  0x70   : > { %8255 = vmatprep.subr.msk.bf16.mxu0 %vm10254_vm2, %v9060_v17  ;;  %vm915_vm15 = vcmask 1046528   ;;  %vm1341_vm0 = vsmask.f32 5376  ;;  %vm1499_vm1 = vcmask 1044480   ;;  %vm2259_vm4 = vcmask 516096   ;;  %s421_s14 = sand.u32 1, %s8813_s18  }
  0x71   : > { %s9043_s17 = scalar_lea.vmem %s10229_s0, %s8261_s29  ;;  %vm1922_vm5 = vcmask 517120   ;;  %vm2503_vm6 = vcmask 1043459   ;;  %vm2513_vm10 = vcmask 1041409   ;;  %s7508_s16 = sshll.u32 %s8916_s21, 4 }
  0x72   : > { %v441_v3 = vld [vmem:[%s9043_s17] sm:$0xf]  ;;  %v442_v6 = vld [vmem:[%s9043_s17 + $0x4] sm:$0xf]  ;;  %v443_v7 = vld [vmem:[%s9043_s17 + $0x8] sm:$0xf]  ;;  %s10187_s5 = scalar_lea.hbm %s10240_s11, %s7508_s16 }
  0x73   : > { %v444_v8 = vld [vmem:[%s9043_s17 + $0xc] sm:$0xf]  ;;  %v456_v9 = vshrl.u32 %v441_v3, 16  ;;  %v459_v10 = vshll.u32 %v441_v3, 16  ;;  %v465_v11 = vshrl.u32 %v442_v6, 16  ;;  %v468_v12 = vshll.u32 %v442_v6, 16 }
  0x74   : > { %v475_v13 = vshrl.u32 %v443_v7, 16  ;;  %v478_v14 = vshll.u32 %v443_v7, 16  ;;  %v485_v15 = vshrl.u32 %v444_v8, 16  ;;  %v488_v16 = vshll.u32 %v444_v8, 16  ;;  %v445_v22 = vld [vmem:[%s9043_s17 + $0x10] sm:$0xf] }
  0x75   : > { %v458_v18 = vrot.slane %v456_v9, 6  ;;  %v461_v19 = vrot.slane %v459_v10, 7  ;;  %v467_v20 = vrot.slane %v465_v11, 6  ;;  %v470_v21 = vrot.slane %v468_v12, 7  ;;  %v446_v27 = vld [vmem:[%s9043_s17 + $0x14] sm:$0xf] }
  0x76   : > { %v477_v23 = vrot.slane %v475_v13, 6  ;;  %v480_v24 = vrot.slane %v478_v14, 7  ;;  %v487_v25 = vrot.slane %v485_v15, 6  ;;  %v490_v26 = vrot.slane %v488_v16, 7  ;;  %v447_v42 = vld [vmem:[%s9043_s17 + $0x18] sm:$0xf] }
  0x77   : > { %v462_v29 = vor.u32 %v461_v19, %v458_v18  ;;  %v471_v30 = vor.u32 %v470_v21, %v467_v20  ;;  %v495_v31 = vshrl.u32 %v445_v22, 16  ;;  %v498_v32 = vshll.u32 %v445_v22, 16  ;;  %v589_v45 = vld [vmem:[#allocation2] sm:$0xe]  ;;  %v448_v52 = vld [vmem:[%s9043_s17 + $0x1c] sm:$0xf] }
  0x78   : > { %v481_v33 = vor.u32 %v480_v24, %v477_v23  ;;  %v491_v34 = vor.u32 %v490_v26, %v487_v25  ;;  %v505_v36 = vshrl.u32 %v446_v27, 16  ;;  %v508_v37 = vshll.u32 %v446_v27, 16  ;;  %v449_v53 = vld [vmem:[%s9043_s17 + $0x20] sm:$0xf]  ;;  %v450_v56 = vld [vmem:[%s9043_s17 + $0x24] sm:$0xf] }
  0x79   : > { %v463_v38 = vrot.slane %v462_v29, 4  ;;  %v473_v39 = vrot.slane %v471_v30, 4  ;;  %v497_v40 = vrot.slane %v495_v31, 6  ;;  %v500_v41 = vrot.slane %v498_v32, 7  ;;  %v451_v61 = vld [vmem:[%s9043_s17 + $0x28] sm:$0xf] }
  0x7a   : > { %v483_v43 = vrot.slane %v481_v33, 4  ;;  %v493_v44 = vrot.slane %v491_v34, 4  ;;  %v507_v46 = vrot.slane %v505_v36, 6  ;;  %v510_v47 = vrot.slane %v508_v37, 7  ;;  %v452_v3 = vld [vmem:[%s9043_s17 + $0x2c] sm:$0xf] }
  0x7b   : > { %v472_v48 = vsel %vm9068_vm8, %v463_v38, %v471_v30  ;;  %v482_v49 = vsel %vm9068_vm8, %v473_v39, %v481_v33  ;;  %v590_v50 = vsel %vm9074_vm9, %v462_v29, %v589_v45  ;;  %v501_v51 = vor.u32 %v500_v41, %v497_v40  ;;  %s422_s12 = scalar_lea.vmem [#allocation12], %s421_s14  ;;  %s6946_s29 = scalar_lea.sflag [#allocation8], %s421_s14 }
  0x7c   : > { %v492_v54 = vsel %vm9068_vm8, %v483_v43, %v491_v34  ;;  %591 = vst [vmem:[#allocation2] sm:$0xe] %v590_v50  ;;  %593 = vst.msk [vmem:[#allocation2 + $0x4] sm:$0xf] %vm592_vm7, %v472_v48  ;;  %v511_v55 = vor.u32 %v510_v47, %v507_v46  ;;  %v515_v59 = vshrl.u32 %v447_v42, 16  ;;  %v518_v60 = vshll.u32 %v447_v42, 16 }
  0x7d   : > { %594 = vst.msk [vmem:[#allocation2 + $0x8] sm:$0xf] %vm592_vm7, %v482_v49  ;;  %595 = vst.msk [vmem:[#allocation2 + $0xc] sm:$0xf] %vm592_vm7, %v492_v54  ;;  %v502_v57 = vsel %vm9068_vm8, %v493_v44, %v501_v51  ;;  %v503_v58 = vrot.slane %v501_v51, 4  ;;  %v525_v63 = vshrl.u32 %v448_v52, 16 }
  0x7e   : > { %596 = vst.msk [vmem:[#allocation2 + $0x10] sm:$0xf] %vm592_vm7, %v502_v57  ;;  %v513_v62 = vrot.slane %v511_v55, 4  ;;  %v528_v1 = vshll.u32 %v448_v52, 16  ;;  %v535_v2 = vshrl.u32 %v449_v53, 16  ;;  %v517_v5 = vrot.slane %v515_v59, 6 }
  0x7f   : > { %v512_v4 = vsel %vm9068_vm8, %v503_v58, %v511_v55  ;;  %v520_v6 = vrot.slane %v518_v60, 7  ;;  %v538_v7 = vshll.u32 %v449_v53, 16  ;;  %v527_v8 = vrot.slane %v525_v63, 6  ;;  %v438_v44 = vld [vmem:[#allocation2 + $0x30] sm:$0x6]  ;;  %s6958_s15 = sshll.u32 %s422_s12, 4  ;;  %s10189_s15 = int_to_ptr.vmem [resolvable:$true] %s6958_s15 }
  0x80   : > { %597 = vst.msk [vmem:[#allocation2 + $0x14] sm:$0xf] %vm592_vm7, %v512_v4  ;;  %v530_v9 = vrot.slane %v528_v1, 7  ;;  %v537_v10 = vrot.slane %v535_v2, 6  ;;  %v545_v11 = vshrl.u32 %v450_v56, 16  ;;  %v548_v14 = vshll.u32 %v450_v56, 16 }
  0x81   : > { %v521_v12 = vor.u32 %v520_v6, %v517_v5  ;;  %v540_v13 = vrot.slane %v538_v7, 7  ;;  %v555_v15 = vshrl.u32 %v451_v61, 16  ;;  %v558_v19 = vshll.u32 %v451_v61, 16  ;;  %v7075_v57 = vld [vmem:[%s10230_s1 + $0x4] sm:$0x3]  ;;  %s8751_s13 = scalar_lea.vmem %s10189_s15, 16 }
  0x82   : > { %v531_v16 = vor.u32 %v530_v9, %v527_v8  ;;  %v547_v18 = vrot.slane %v545_v11, 6  ;;  %v565_v20 = vshrl.u32 %v452_v3, 16  ;;  %v550_v30 = vrot.slane %v548_v14, 7  ;;  %v7083_v6 = vld [vmem:[%s10230_s1 + $0x6] sm:$0x3]  ;;  %p8752_p12 = scmp.ne.s32.totalorder %s10189_s15, %s8751_s13  ;;  %p10336_p1 = scmp.ne.s32.totalorder %s10263_s27, 0 }
  0x83   : > { %v607_v21 = vld [vmem:[#allocation2] sm:$0xf]  ;;  %v9101_v22 = vld [vmem:[#allocation2 + $0x4] sm:$0xf]  ;;  %v522_v23 = vsel %vm9068_vm8, %v513_v62, %v521_v12  ;;  %v541_v24 = vor.u32 %v540_v13, %v537_v10  ;;  %v523_v27 = vrot.slane %v521_v12, 4  ;;  %v557_v32 = vrot.slane %v555_v15, 6 }
  0x84   : > { %v7056_v25 = vcombine.low %v607_v21, %v9101_v22  ;;  %v9106_v26 = vld [vmem:[#allocation2 + $0x8] sm:$0xff]   ;;  %598 = vst.msk [vmem:[#allocation2 + $0x18] sm:$0xf] %vm592_vm7, %v522_v23  ;;  %v533_v29 = vrot.slane %v531_v16, 4  ;;  %v560_v33 = vrot.slane %v558_v19, 7  ;;  %v567_v34 = vrot.slane %v565_v20, 6  ;;  %p8753_p2 = pnand %p8752_p12, %p10336_p1 }
  0x85   : > { %v543_v31 = vrot.slane %v541_v24, 4  ;;  %v9110_v37 = vshll.u32 %v9106_v26, 16  ;;  %v9113_v38 = vshrl.u32 %v9106_v26, 16  ;;  %v532_v40 = vsel %vm9068_vm8, %v523_v27, %v531_v16  ;;  %v909_v62 = vld [vmem:[#allocation2] sm:$0xe]  ;;  %s8834_s21 = smov [#allocation12]  }
  0x86   : > { %v658_v35 = vshrl.u32 %v7056_v25, 16  ;;  %v660_v36 = vshll.u32 %v7056_v25, 16  ;;  %v542_v41 = vsel %vm9068_vm8, %v533_v29, %v541_v24  ;;  %v551_v42 = vor.u32 %v550_v30, %v547_v18  ;;  %599 = vst.msk [vmem:[#allocation2 + $0x1c] sm:$0xf] %vm592_vm7, %v532_v40  ;;  %p8754_p3 = pneg %p8753_p2  ;;  %s8755_s30 = sshll.u32 %s8834_s21, 4  ;;  %s8756_s30 = int_to_ptr.vmem [resolvable:$false] %s8755_s30 }
  0x87   : > { %v9115_v39 = vld [vmem:[#allocation2 + $0x10] sm:$0xff]   ;;  %v561_v43 = vor.u32 %v560_v33, %v557_v32  ;;  %v667_v46 = vrot.slane %v9110_v37, 1  ;;  %600 = vst.msk [vmem:[#allocation2 + $0x20] sm:$0xf] %vm592_vm7, %v542_v41  ;;  %v568_v47 = vshll.u32 %v452_v3, 16  ;;  %v826_v60 = vsel %vm10254_vm2, %v9060_v17, 0  ;;  %p8758_p4 = scmp.lt.s32.totalorder %s10189_s15, %s8756_s30 }
  0x88   : > { %v662_v45 = vrot.slane %v660_v36, 1  ;;  %v9125_v48 = vshll.u32 %v9115_v39, 16  ;;  %v552_v49 = vsel %vm9068_vm8, %v543_v31, %v551_v42  ;;  %v553_v50 = vrot.slane %v551_v42, 4  ;;  %v1201_v17 = vld [vmem:[#allocation2] sm:$0xc]  ;;  %s8757_s17 = scalar_lea.vmem %s8756_s30, 32 }
  0x89   : > { %v671_v53 = vor.u32 %v9113_v38, %v667_v46  ;;  %601 = vst.msk [vmem:[#allocation2 + $0x24] sm:$0xf] %vm592_vm7, %v552_v49  ;;  %v563_v54 = vrot.slane %v561_v43, 4  ;;  %v570_v55 = vrot.slane %v568_v47, 7  ;;  %v439_v63 = vsel %vm9131_vm13, 0, %v438_v44  ;;  %p8759_p7 = scmp.lt.s32.totalorder %s8757_s17, %s8751_s13 }
  0x8a   : > { %v663_v52 = vor.u32 %v662_v45, %v658_v35  ;;  %v675_v56 = vrot.slane %v9125_v48, 1  ;;  %v562_v58 = vsel %vm9068_vm8, %v553_v50, %v561_v43  ;;  %440 = vst [vmem:[#allocation2 + $0x30] sm:$0x6] %v439_v63  ;;  %v9160_v3 = vcombine.low %v909_v62, %v9101_v22  ;;  %v1493_v43 = vld [vmem:[#allocation2] sm:$0x8] }
  0x8b   : > { %v571_v61 = vor.u32 %v570_v55, %v567_v34  ;;  %602 = vst.msk [vmem:[#allocation2 + $0x28] sm:$0xf] %vm592_vm7, %v562_v58  ;;  %v7092_v5 = vcombine.low %v1201_v17, %v9101_v22  ;;  %v948_v28 = vsel %vm10254_vm2, %v7075_v57, 0  ;;  %v917_v11 = vrot.slane %v9106_v26, 1  ;;  %v9229_v50 = vld [vmem:[%s10230_s1 + $0x8] sm:$0x3]  ;;  %p8760_p8 = por %p8759_p7, %p8758_p4 }
  0x8c   : > { %v668_v59 = vsel %vm656_vm11, %v663_v52, %v667_v46  ;;  %v676_v1 = vsel %vm656_vm11, %v671_v53, %v675_v56  ;;  %v916_v8 = vrot.slane %v9160_v3, 1  ;;  %v1051_v12 = vshrl.u32 %v9160_v3, 16 }
  0x8d   : > { %7955 = vmatprep.mubr.msk.bf16.mxu0 %vm709_vm12, %v668_v59  ;;  %v572_v2 = vsel %vm9068_vm8, %v563_v54, %v571_v61  ;;  %v573_v4 = vrot.slane %v571_v61, 4  ;;  %v1208_v10 = vrot.slane %v7092_v5, 2  ;;  %v1209_v13 = vrot.slane %v9106_v26, 2  ;;  %p8761_p11 = pnand %p8760_p8, %p8754_p3 }
  0x8e   : > { %7956 = vmatmul.mubr.msk.bf16.vlgmr.msra.gmra.mrb[0].mxu0 %vm709_vm12, %v676_v1  ;;  %603 = vst.msk [vmem:[#allocation2 + $0x2c] sm:$0xf] %vm592_vm7, %v572_v2  ;;  %v919_v15 = vrot.slane %v9115_v39, 1  ;;  %v9177_v16 = vsel %vm10254_vm2, %v7083_v6, 0  ;;  %v10253_v18 = vrot.slane %v9115_v39, 2  ;;  %v1054_v0 = vshll.u32 %v9160_v3, 16 }
  0x8f   : > { %7968 = vmatpush3.bf16.msra.mxu0 %v826_v60  ;;  %7969 = vmatprep.mubr.msk.bf16.mxu0 %vm709_vm12, %v7056_v25  ;;  %v1058_v20 = vrot.slane %v9113_v38, 1  ;;  %v9185_v21 = vsel %vm1207_vm14, %v1208_v10, %v1209_v13  ;;  %v9194_v24 = vrot.slane %v1051_v12, 1  ;;  %v9198_v25 = vld [vmem:[#allocation2 + $0x18] sm:$0xff]   ;;  %v9201_v27 = vshrl.u32 %v9115_v39, 16 }
  0x90   : > { %8256 = vmatprep.subr.msk.bf16.mxu0 %vm10254_vm2, %v7075_v57  ;;  %v9173_v14 = vld [vmem:[#allocation2 + $0x20] sm:$0xff]   ;;  %v9190_v23 = vsel %vm1207_vm14, %v1209_v13, %v10253_v18  ;;  %v1343_v31 = vshrl.u32 %v7092_v5, 16  ;;  %v9206_v32 = vrot.slane %v1054_v0, 2  ;;  %v1346_v33 = vshll.u32 %v7092_v5, 16 }
  0x91   : > { %v604_v7 = vld [vmem:[#allocation2 + $0x30] sm:$0x3]  ;;  %v10252_v29 = vrot.slane %v9173_v14, 2  ;;  %v1350_v34 = vrot.slane %v9113_v38, 2  ;;  %v1351_v35 = vrot.slane %v9110_v37, 3  ;;  %v1059_v36 = vrot.slane %v9110_v37, 2 }
  0x92   : > { %v605_v9 = vsel %vm9036_vm3, %v573_v4, %v604_v7  ;;  %v1345_v41 = vrot.slane %v1343_v31, 2  ;;  %v1354_v42 = vrot.slane %v9201_v27, 2  ;;  %v9220_v44 = vshll.u32 %v9198_v25, 16 }
  0x93   : > { %606 = vst [vmem:[#allocation2 + $0x30] sm:$0x3] %v605_v9  ;;  %v9223_v45 = vshrl.u32 %v9198_v25, 16  ;;  %v1348_v46 = vrot.slane %v1346_v33, 3  ;;  %v1352_v47 = vor.u32 %v1351_v35, %v1350_v34  ;;  %v1355_v49 = vrot.slane %v9125_v48, 3 }
  0x94   : > { %v9233_v52 = vshll.u32 %v9173_v14, 16  ;;  %v9236_v53 = vshrl.u32 %v9173_v14, 16  ;;  %v1359_v58 = vrot.slane %v9220_v44, 3  ;;  %v7108_v62 = vcombine.low %v1493_v43, %v9101_v22 }
  0x95   : > { %v9180_v19 = vld [vmem:[#allocation2 + $0x28] sm:$0xff]   ;;  %v1349_v54 = vor.u32 %v1348_v46, %v1345_v41  ;;  %v1356_v55 = vor.u32 %v1355_v49, %v1354_v42  ;;  %v1358_v57 = vrot.slane %v9223_v45, 2  ;;  %v918_v3 = vsel %vm915_vm15, %v916_v8, %v917_v11 }
  0x96   : > { %v10250_v30 = vrot.slane %v9180_v19, 2  ;;  %v9243_v59 = vshll.u32 %v9180_v19, 16  ;;  %v9246_v60 = vshrl.u32 %v9180_v19, 16  ;;  %v1362_v2 = vrot.slane %v9236_v53, 2 }
  0x97   : > { %v9249_v61 = vsel %vm1341_vm0, %v1349_v54, %v1352_v47  ;;  %v9255_v63 = vsel %vm1341_vm0, %v1352_v47, %v1356_v55  ;;  %v1360_v1 = vor.u32 %v1359_v58, %v1358_v57  ;;  %v1363_v17 = vrot.slane %v9233_v52, 3  ;;  %v9310_v57 = vld [vmem:[%s10230_s1 + $0xa] sm:$0x3] }
  0x98   : > { %v9216_v40 = vsel %vm1207_vm14, %v10252_v29, %v10250_v30  ;;  %v921_v4 = vrot.slane %v9198_v25, 1  ;;  %v1366_v5 = vrot.slane %v9246_v60, 2  ;;  %v1367_v22 = vrot.slane %v9243_v59, 3 }
  0x99   : > { %v9271_v7 = vsel %vm1341_vm0, %v1356_v55, %v1360_v1  ;;  %v1364_v9 = vor.u32 %v1363_v17, %v1362_v2  ;;  %v1500_v8 = vrot.slane %v7108_v62, 3  ;;  %v679_v12 = vor.u32 %v9201_v27, %v675_v56 }
  0x9a   : > { %7970 = vmatmul.mubr.msk.bf16.vlgmr.msra.gmra.mrb[0].mxu0 %vm709_vm12, %v9106_v26  ;;  %v9273_v10 = vor.u32 %v1367_v22, %v1366_v5  ;;  %v923_v13 = vrot.slane %v9173_v14, 1  ;;  %v9279_v0 = vld [vmem:[#allocation2 + $0x30] ss:$0 sps:$4 sm:$0x11]   ;;  %v1501_v35 = vrot.slane %v9106_v26, 3  ;;  %v1503_v41 = vrot.slane %v9115_v39, 3 }
  0x9b   : > { %7982 = vmatpush3.bf16.msra.mxu0 %v948_v28  ;;  %7973 = vmatprep.mubr.msk.bf16.mxu0 %vm709_vm12, %v9115_v39  ;;  %v9268_v28 = vsel %vm10254_vm2, %v9229_v50, 0  ;;  %v9281_v31 = vld [vmem:[#allocation2 + $0x30] ss:$0 sps:$4 sm:$0x33]   ;;  %v9284_v33 = vsel %vm1341_vm0, %v1360_v1, %v1364_v9  ;;  %v683_v56 = vrot.slane %v9220_v44, 1  ;;  %v691_v43 = vrot.slane %v9233_v52, 1 }
  0x9c   : > { %8257 = vmatprep.subr.msk.bf16.mxu0 %vm10254_vm2, %v7083_v6  ;;  %v9286_v34 = vld [vmem:[#allocation2 + $0x30] ss:$0 sps:$4 sm:$0x77]   ;;  %v9292_v42 = vsel %vm1341_vm0, %v1364_v9, %v9273_v10  ;;  %v1505_v46 = vrot.slane %v9198_v25, 3  ;;  %v9299_v49 = vsel %vm1499_vm1, %v1500_v8, %v1501_v35  ;;  %v9302_v54 = vsel %vm1499_vm1, %v1501_v35, %v1503_v41  ;;  %v9331_v35 = vld [vmem:[%s10230_s1 + $0xc] sm:$0x3] }
  0x9d   : > { %v1507_v55 = vrot.slane %v9173_v14, 3  ;;  %v684_v58 = vsel %vm656_vm11, %v679_v12, %v683_v56  ;;  %v687_v62 = vor.u32 %v9223_v45, %v683_v56  ;;  %v695_v2 = vor.u32 %v9236_v53, %v691_v43 }
  0x9e   : > { %v9315_v1 = vsel %vm1499_vm1, %v1503_v41, %v1505_v46  ;;  %v1066_v17 = vrot.slane %v9223_v45, 1  ;;  %7959 = vmatprep.mubr.msk.bf16.mxu1 %vm709_vm12, %v684_v58  ;;  %v699_v22 = vrot.slane %v9243_v59, 1  ;;  %v705_v9 = vshll.u32 %v9279_v0, 16 }
  0x9f   : > { %v9322_v5 = vsel %vm1499_vm1, %v1505_v46, %v1507_v55  ;;  %v1070_v8 = vrot.slane %v9236_v53, 1  ;;  %v1071_v12 = vrot.slane %v9233_v52, 2  ;;  %v692_v45 = vsel %vm656_vm11, %v687_v62, %v691_v43 }
  0xa0   : > { %v1079_v41 = vshrl.u32 %v9281_v31, 16  ;;  %v1082_v56 = vshll.u32 %v9281_v31, 16  ;;  %v1371_v46 = vshrl.u32 %v9286_v34, 16  ;;  %7960 = vmatmul.mubr.msk.bf16.vlgmr.msra.gmra.mrb[0].mxu1 %vm709_vm12, %v692_v45  ;;  %v700_v53 = vsel %vm656_vm11, %v695_v2, %v699_v22 }
  0xa1   : > { %v1374_v52 = vshll.u32 %v9286_v34, 16  ;;  %7963 = vmatprep.mubr.msk.bf16.mxu1 %vm709_vm12, %v700_v53  ;;  %v703_v58 = vor.u32 %v9246_v60, %v699_v22  ;;  %v707_v30 = vrot.slane %v705_v9, 1  ;;  %v920_v62 = vsel %vm915_vm15, %v917_v11, %v919_v15 }
  0xa2   : > { %7974 = vmatmul.mubr.msk.bf16.gmra.mrb[4].mxu0 %vm709_vm12, %v9198_v25  ;;  %v925_v2 = vrot.slane %v9180_v19, 1  ;;  %v1398_v45 = vsel %vm10254_vm2, %v9310_v57, 0  ;;  %v1213_v53 = vrot.slane %v9198_v25, 2  ;;  %v927_v22 = vrot.slane %v9279_v0, 1 }
  0xa3   : > { %7977 = vmatprep.mubr.msk.bf16.mxu0 %vm709_vm12, %v9173_v14  ;;  %v1074_v9 = vrot.slane %v9246_v60, 1  ;;  %v1075_v26 = vrot.slane %v9243_v59, 2  ;;  %v1081_v11 = vrot.slane %v1079_v41, 1  ;;  %v1532_v29 = vsel %vm10254_vm2, %v9331_v35, 0 }
  0xa4   : > { %v1084_v18 = vrot.slane %v1082_v56, 2  ;;  %v1373_v47 = vrot.slane %v1371_v46, 2  ;;  %v1376_v51 = vrot.slane %v1374_v52, 3  ;;  %v708_v6 = vsel %vm656_vm11, %v703_v58, %v707_v30 }
  0xa5   : > { %vm1049_vm3 = vsmask.f32 6400  ;;  %v924_v59 = vsel %vm915_vm15, %v921_v4, %v923_v13  ;;  %v1057_v30 = vor.u32 %v9206_v32, %v9194_v24  ;;  %v928_v25 = vsel %vm915_vm15, %v925_v2, %v927_v22 }
  0xa6   : > { %v10285_v24 = vrot.slane %v9220_v44, 2  ;;  %v1085_v44 = vor.u32 %v1084_v18, %v1081_v11  ;;  %v10287_v18 = vrot.slane %v9173_v14, 2  ;;  %v1377_v14 = vor.u32 %v1376_v51, %v1373_v47 }
  0xa7   : > { %vm2505_vm7 = vcmask 1044484   ;;  %vm2507_vm8 = vcmask 1045509   ;;  %vm2509_vm9 = vcmask 1046534   ;;  %vm2515_vm13 = vcmask 1042434  }
  0xa8   : > { %7964 = vmatmul.mubr.msk.bf16.gmra.mrb[4].mxu1 %vm709_vm12, %v708_v6  ;;  %v10284_v6 = vrot.slane %v9125_v48, 2  ;;  %v1068_v32 = vor.u32 %v10285_v24, %v1066_v17  ;;  %v9483_v17 = vld [vmem:[%s10231_s2] ss:$0 sm:$0xff] }
  0xaa   : > { %7978 = vmatmul.mubr.msk.bf16.gmra.mrb[8].mxu0 %vm709_vm12, %v9180_v19 }
  0xab   : > { %7983 = vmatprep.mubr.msk.bf16.mxu0 %vm709_vm12, %v918_v3  ;;  %v10251_v3 = vrot.slane %v9180_v19, 3 }
  0xad   : > { %v9346_v43 = vsel %vm1499_vm1, %v1507_v55, %v10251_v3  ;;  %v922_v55 = vsel %vm915_vm15, %v919_v15, %v921_v4  ;;  %v1219_v3 = vrot.slane %v9281_v31, 2  ;;  %v1511_v15 = vrot.slane %v9286_v34, 3 }
  0xae   : > { %v10283_v4 = vrot.slane %v9201_v27, 1  ;;  %v1216_v34 = vsel %vm1207_vm14, %v1213_v53, %v10287_v18 }
  0xb2   : > { %7984 = vmatmul.mubr.msk.bf16.vlgmr.msra.gmra.mrb[0].mxu0 %vm709_vm12, %v920_v62 }
  0xb3   : > { %7996 = vmatpush3.bf16.msra.mxu0 %v9177_v16  ;;  %7987 = vmatprep.mubr.msk.bf16.mxu0 %vm709_vm12, %v922_v55  ;;  %v926_v16 = vsel %vm915_vm15, %v923_v13, %v925_v2  ;;  %v1064_v13 = vor.u32 %v10284_v6, %v10283_v4 }
  0xb4   : > { %8258 = vmatprep.subr.msk.bf16.mxu0 %vm10254_vm2, %v9229_v50  ;;  %v1060_v50 = vor.u32 %v1059_v36, %v1058_v20  ;;  %v1072_v20 = vor.u32 %v1071_v12, %v1070_v8  ;;  %v1076_v36 = vor.u32 %v1075_v26, %v1074_v9 }
  0xb5   : > { %v1069_v37 = vsel %vm1049_vm3, %v1064_v13, %v1068_v32 }
  0xb6   : > { %v1061_v60 = vsel %vm1049_vm3, %v1057_v30, %v1060_v50  ;;  %v1065_v38 = vsel %vm1049_vm3, %v1060_v50, %v1064_v13  ;;  %v1073_v48 = vsel %vm1049_vm3, %v1068_v32, %v1072_v20  ;;  %v1077_v27 = vsel %vm1049_vm3, %v1072_v20, %v1076_v36 }
  0xb7   : > { %v1086_v0 = vsel %vm1049_vm3, %v1076_v36, %v1085_v44 }
  0xba   : > { %7988 = vmatmul.mubr.msk.bf16.gmra.mrb[4].mxu0 %vm709_vm12, %v924_v59 }
  0xbb   : > { %7991 = vmatprep.mubr.msk.bf16.mxu0 %vm709_vm12, %v926_v16 }
  0xc2   : > { %7992 = vmatmul.mubr.msk.bf16.gmra.mrb[8].mxu0 %vm709_vm12, %v928_v25 }
  0xc3   : > { %7997 = vmatprep.mubr.msk.bf16.mxu0 %vm709_vm12, %v1061_v60 }
  0xca   : > { %7998 = vmatmul.mubr.msk.bf16.vlgmr.msra.gmra.mrb[0].mxu0 %vm709_vm12, %v1065_v38 }
  0xcb   : > { %8010 = vmatpush3.bf16.msra.mxu0 %v9268_v28  ;;  %8001 = vmatprep.mubr.msk.bf16.mxu0 %vm709_vm12, %v1069_v37  ;;  %v10286_v28 = vrot.slane %v9115_v39, 2  ;;  %v10288_v39 = vrot.slane %v9180_v19, 2 }
  0xcc   : > { %8259 = vmatprep.subr.msk.bf16.mxu0 %vm10254_vm2, %v9310_v57 }
  0xcd   : > { %v1214_v31 = vsel %vm1207_vm14, %v10286_v28, %v1213_v53 }
  0xd2   : > { %8002 = vmatmul.mubr.msk.bf16.gmra.mrb[4].mxu0 %vm709_vm12, %v1073_v48 }
  0xd3   : > { %8005 = vmatprep.mubr.msk.bf16.mxu0 %vm709_vm12, %v1077_v27 }
  0xda   : > { %8006 = vmatmul.mubr.msk.bf16.gmra.mrb[8].mxu0 %vm709_vm12, %v1086_v0 }
  0xdb   : > { %8011 = vmatprep.mubr.msk.bf16.mxu0 %vm709_vm12, %v9185_v21  ;;  %v1220_v21 = vsel %vm1207_vm14, %v10288_v39, %v1219_v3  ;;  %v8831_v3 = vmov 0  }
  0xdc   : > { %2260 = vst.msk [vmem:[#allocation3] sm:$0x1] %vm2259_vm4, %v8831_v3 }
  0xe2   : > { %8012 = vmatmul.mubr.msk.bf16.vlgmr.msra.gmra.mrb[0].mxu0 %vm709_vm12, %v9190_v23  ;;  %v1378_v23 = vsel %vm1341_vm0, %v9273_v10, %v1377_v14  ;;  %vm2565_vm0 = vcmask 519169  }
  0xe3   : > { %8024 = vmatpush3.bf16.msra.mxu0 %v1398_v45  ;;  %8015 = vmatprep.mubr.msk.bf16.mxu0 %vm709_vm12, %v1214_v31 }
  0xe4   : > { %8260 = vmatprep.subr.msk.bf16.mxu0 %vm10254_vm2, %v9331_v35  ;;  %vm2668_vm2 = vcmask 523264  }
  0xea   : > { %8016 = vmatmul.mubr.msk.bf16.gmra.mrb[4].mxu0 %vm709_vm12, %v1216_v34 }
  0xeb   : > { %8019 = vmatprep.mubr.msk.bf16.mxu0 %vm709_vm12, %v9216_v40 }
  0xf2   : > { %8020 = vmatmul.mubr.msk.bf16.gmra.mrb[8].mxu0 %vm709_vm12, %v1220_v21 }
  0xf3   : > { %8025 = vmatprep.mubr.msk.bf16.mxu0 %vm709_vm12, %v9249_v61 }
  0xfa   : > { %8026 = vmatmul.mubr.msk.bf16.vlgmr.msra.gmra.mrb[0].mxu0 %vm709_vm12, %v9255_v63 }
  0xfb   : > { %8038 = vmatpush3.bf16.msra.mxu0 %v1532_v29  ;;  %8029 = vmatprep.mubr.msk.bf16.mxu0 %vm709_vm12, %v9271_v7  ;;  %v10289_v29 = vrot.slane %v9180_v19, 3  ;;  %v8830_v19 = vmov 1983009808  }
  0xfd   : > { %v1512_v40 = vsel %vm1499_vm1, %v10289_v29, %v1511_v15  ;;  %vm2567_vm1 = vcmask 519168  }
 0x102   : > { %8030 = vmatmul.mubr.msk.bf16.gmra.mrb[4].mxu0 %vm709_vm12, %v9284_v33 }
 0x103   : > { %8033 = vmatprep.mubr.msk.bf16.mxu0 %vm709_vm12, %v9292_v42 }
 0x10a   : > { %8034 = vmatmul.mubr.msk.bf16.gmra.mrb[8].mxu0 %vm709_vm12, %v1378_v23 }
 0x10b   : > { %8039 = vmatprep.mubr.msk.bf16.mxu0 %vm709_vm12, %v9299_v49  ;;  %v1672_v49 = vunpack.c.l.s4 %v8830_v19 }
 0x10d   : > { %v1673_v57 = vunpack.c.0.s8 %v1672_v49 }
 0x112   : > { %8040 = vmatmul.mubr.msk.bf16.vlgmr.msra.gmra.mrb[0].mxu0 %vm709_vm12, %v9302_v54  ;;  %v1674_v54 = vlaneseq }
 0x113   : > { %8043 = vmatprep.mubr.msk.bf16.mxu0 %vm709_vm12, %v9315_v1 }
 0x114   : > { %v9478_v1 = vshrl.u32 %v1674_v54, 7 }
 0x116   : > { %v9487_v12 = vsub.s32 %v1673_v57, %v9478_v1 }
 0x11a   : > { %8044 = vmatmul.mubr.msk.bf16.gmra.mrb[4].mxu0 %vm709_vm12, %v9322_v5 }
 0x11b   : > { %8047 = vmatprep.mubr.msk.bf16.mxu0 %vm709_vm12, %v9346_v43 }
 0x122   : > { %8048 = vmatmul.mubr.msk.bf16.gmra.mrb[8].mxu0 %vm709_vm12, %v1512_v40  ;;  %vm2511_vm12 = vcmask 1047559  }
 0x173   : > { %v9462_v51 = vpop.f32.mrb[0].mxu1 }
 0x174   : > { %v9464_v61 = vpop.f32.mrb[1].mxu1 }
 0x175   : > { %v9466_v63 = vpop.f32.mrb[2].mxu1 }
 0x176   : > { %v9468_v7 = vpop.f32.mrb[3].mxu1 }
 0x17b   : > { %v9470_v10 = vpop.f32.mrb[4].mxu1 }
 0x17c   : > { %v9472_v33 = vpop.f32.mrb[5].mxu1 }
 0x17d   : > { %v9474_v42 = vpop.f32.mrb[6].mxu1 }
 0x17e   : > { %v9476_v47 = vpop.f32.mrb[7].mxu1 }
 0x1e5   : > { %v8041_v5 = vpop.f32.mrb[0].mxu0 }
 0x1e6   : > { %v1636_v8 = vadd.f32 %v8041_v5, %v9483_v17  ;;  %v1568_v35 = vpop.f32.mrb[1].mxu0 }
 0x1e7   : > { %v1634_v41 = vadd.f32 %v9483_v17, %v1568_v35  ;;  %v8042_v56 = vpop.f32.mrb[2].mxu0 }
 0x1e8   : > { %v1648_v46 = vmax.f32 %v1636_v8, 0.0  ;;  %v1637_v52 = vadd.f32 %v8042_v56, %v9483_v17  ;;  %v1571_v58 = vpop.f32.mrb[3].mxu0 }
 0x1e9   : > { %v1646_v43 = vmax.f32 %v1634_v41, 0.0 }
 0x1ea   : > { %v1704_v62 = vcombine.high %v1648_v46, %v1648_v46  ;;  %v1711_v2 = vrot.slane %v1648_v46, %v9487_v12  ;;  %v9497_v26 = vmax.f32 %v1637_v52, 0.0 }
 0x1eb   : > { %v1670_v45 = vcombine.high %v1646_v43, %v1646_v43  ;;  %v1677_v53 = vrot.slane %v1646_v43, %v9487_v12 }
 0x1ec   : > { %v1718_v55 = vrot.slane %v1704_v62, %v9487_v12  ;;  %v1719_v22 = vcombine.high %v1711_v2, %v1711_v2  ;;  %v1979_v9 = vsel %vm1922_vm5, %v1711_v2, -inf }
 0x1ed   : > { %v1980_v11 = vrot.slane %v1979_v9, 4  ;;  %v1684_v15 = vrot.slane %v1670_v45, %v9487_v12  ;;  %v1685_v59 = vcombine.high %v1677_v53, %v1677_v53  ;;  %v1923_v16 = vsel %vm1922_vm5, %v1677_v53, -inf  ;;  %v9501_v30 = vpop.f32.mrb[4].mxu0 }
 0x1ee   : > { %v1720_v50 = vcombine.high %v1718_v55, %v1718_v55  ;;  %v1986_v25 = vsel %vm1922_vm5, %v1719_v22, -inf  ;;  %v1993_v60 = vsel %vm1922_vm5, %v1718_v55, -inf  ;;  %v1924_v4 = vrot.slane %v1923_v16, 4  ;;  %v9505_v6 = vpop.f32.mrb[5].mxu0 }
 0x1ef   : > { %v1981_v13 = vmax.f32 %v1979_v9, %v1980_v11  ;;  %v1987_v24 = vrot.slane %v1986_v25, 4  ;;  %v1994_v32 = vrot.slane %v1993_v60, 4  ;;  %v1686_v38 = vcombine.high %v1684_v15, %v1684_v15  ;;  %v9507_v37 = vpop.f32.mrb[6].mxu0 }
 0x1f0   : > { %v2000_v20 = vsel %vm1922_vm5, %v1720_v50, -inf  ;;  %v1925_v36 = vmax.f32 %v1923_v16, %v1924_v4  ;;  %v1930_v48 = vsel %vm1922_vm5, %v1685_v59, -inf  ;;  %v1937_v27 = vsel %vm1922_vm5, %v1684_v15, -inf  ;;  %v9512_v44 = vpop.f32.mrb[7].mxu0 }
 0x1f1   : > { %v1982_v0 = vrot.slane %v1981_v13, 2  ;;  %v1988_v28 = vmax.f32 %v1986_v25, %v1987_v24  ;;  %v1995_v31 = vmax.f32 %v1993_v60, %v1994_v32  ;;  %v2001_v18 = vrot.slane %v2000_v20, 4 }
 0x1f2   : > { %v1926_v34 = vrot.slane %v1925_v36, 2  ;;  %v1931_v39 = vrot.slane %v1930_v48, 4  ;;  %v1938_v21 = vrot.slane %v1937_v27, 4  ;;  %v1944_v14 = vsel %vm1922_vm5, %v1686_v38, -inf }
 0x1f3   : > { %v1983_v23 = vmax.f32 %v1981_v13, %v1982_v0  ;;  %v1989_v29 = vrot.slane %v1988_v28, 2  ;;  %v1996_v40 = vrot.slane %v1995_v31, 2  ;;  %v2002_v19 = vmax.f32 %v2000_v20, %v2001_v18 }
 0x1f4   : > { %v1927_v49 = vmax.f32 %v1925_v36, %v1926_v34  ;;  %v1932_v54 = vmax.f32 %v1930_v48, %v1931_v39  ;;  %v1939_v57 = vmax.f32 %v1937_v27, %v1938_v21  ;;  %v1945_v5 = vrot.slane %v1944_v14, 4 }
 0x1f5   : > { %v1984_v8 = vrot.slane %v1983_v23, 1  ;;  %v1990_v35 = vmax.f32 %v1988_v28, %v1989_v29  ;;  %v1997_v41 = vmax.f32 %v1995_v31, %v1996_v40  ;;  %v2003_v56 = vrot.slane %v2002_v19, 2  ;;  %v9515_v46 = vpop.f32.mrb[8].mxu0 }
 0x1f6   : > { %v1928_v52 = vrot.slane %v1927_v49, 1  ;;  %v1933_v43 = vrot.slane %v1932_v54, 2  ;;  %v1940_v62 = vrot.slane %v1939_v57, 2  ;;  %v1946_v2 = vmax.f32 %v1944_v14, %v1945_v5  ;;  %v9517_v45 = vpop.f32.mrb[9].mxu0 }
 0x1f7   : > { %v1635_v53 = vadd.f32 %v9483_v17, %v1571_v58  ;;  %v9520_v55 = vpop.f32.mrb[10].mxu0  ;;  %v1991_v22 = vrot.slane %v1990_v35, 1  ;;  %v1998_v9 = vrot.slane %v1997_v41, 1  ;;  %v2004_v11 = vmax.f32 %v2002_v19, %v2003_v56 }
 0x1f8   : > { %v1934_v15 = vmax.f32 %v1932_v54, %v1933_v43  ;;  %v9522_v59 = vpop.f32.mrb[11].mxu0  ;;  %v1985_v16 = vmax.f32 %v1983_v23, %v1984_v8  ;;  %v1929_v50 = vmax.f32 %v1927_v49, %v1928_v52  ;;  %v1941_v25 = vmax.f32 %v1939_v57, %v1940_v62 }
 0x1f9   : > { %v1947_v60 = vrot.slane %v1946_v2, 2  ;;  %v1721_v4 = vcombine.high %v9497_v26, %v9497_v26  ;;  %v1647_v24 = vmax.f32 %v1635_v53, 0.0  ;;  %v9526_v32 = vmax.f32 %v1990_v35, %v1991_v22 }
 0x1fa   : > { %v1935_v13 = vrot.slane %v1934_v15, 1  ;;  %v9528_v58 = vmax.f32 %v1997_v41, %v1998_v9  ;;  %v2005_v38 = vrot.slane %v2004_v11, 1  ;;  %v7519_v20 = vpack.c.bf16 %v1985_v16, %v1985_v16 }
 0x1fb   : > { %v1728_v36 = vrot.slane %v9497_v26, %v9487_v12  ;;  %v1942_v48 = vrot.slane %v1941_v25, 1  ;;  %v1948_v27 = vmax.f32 %v1946_v2, %v1947_v60  ;;  %v7511_v0 = vpack.c.bf16 %v1929_v50, %v1929_v50 }
 0x1fc   : > { %v1735_v28 = vrot.slane %v1721_v4, %v9487_v12  ;;  %v1936_v31 = vmax.f32 %v1934_v15, %v1935_v13  ;;  %v1687_v39 = vcombine.high %v1647_v24, %v1647_v24  ;;  %v9534_v21 = vmax.f32 %v2004_v11, %v2005_v38 }
 0x1fd   : > { %v1736_v18 = vcombine.high %v1728_v36, %v1728_v36  ;;  %v2007_v34 = vsel %vm1922_vm5, %v1728_v36, -inf  ;;  %v7520_v14 = vpack.c.bf16 %v9526_v32, %v9526_v32  ;;  %v7521_v23 = vpack.c.bf16 %v9528_v58, %v9528_v58 }
 0x1fe   : > { %v1737_v26 = vcombine.high %v1735_v28, %v1735_v28  ;;  %v2008_v29 = vrot.slane %v2007_v34, 4  ;;  %v2021_v19 = vsel %vm1922_vm5, %v1735_v28, -inf  ;;  %v1694_v49 = vrot.slane %v1647_v24, %v9487_v12 }
 0x1ff   : > { %v2014_v40 = vsel %vm1922_vm5, %v1736_v18, -inf  ;;  %v1943_v54 = vmax.f32 %v1941_v25, %v1942_v48  ;;  %v1949_v57 = vrot.slane %v1948_v27, 1  ;;  %v2022_v8 = vrot.slane %v2021_v19, 4 }
 0x200   : > { %v2015_v5 = vrot.slane %v2014_v40, 4  ;;  %v9543_v35 = vunpack.c.l.b16 %v7519_v20  ;;  %v7512_v41 = vpack.c.bf16 %v1936_v31, %v1936_v31  ;;  %v2009_v56 = vmax.f32 %v2007_v34, %v2008_v29 }
 0x201   : > { %v1701_v52 = vrot.slane %v1687_v39, %v9487_v12  ;;  %v2023_v62 = vmax.f32 %v2021_v19, %v2022_v8  ;;  %v2028_v2 = vsel %vm1922_vm5, %v1737_v26, -inf  ;;  %v1702_v53 = vcombine.high %v1694_v49, %v1694_v49 }
 0x202   : > { %v2016_v43 = vmax.f32 %v2014_v40, %v2015_v5  ;;  %v2010_v22 = vrot.slane %v2009_v56, 2  ;;  %v1951_v11 = vsel %vm1922_vm5, %v1694_v49, -inf  ;;  %v1950_v16 = vmax.f32 %v1948_v27, %v1949_v57 }
 0x203   : > { %v1703_v9 = vcombine.high %v1701_v52, %v1701_v52  ;;  %v1965_v15 = vsel %vm1922_vm5, %v1701_v52, -inf  ;;  %v7513_v50 = vpack.c.bf16 %v1943_v54, %v1943_v54  ;;  %v2455_v25 = vunpack.c.l.b16 %v7511_v0 }
 0x204   : > { %v1952_v60 = vrot.slane %v1951_v11, 4  ;;  %v2456_v4 = vunpack.c.l.b16 %v7512_v41  ;;  %v1958_v13 = vsel %vm1922_vm5, %v1702_v53, -inf  ;;  %v1966_v24 = vrot.slane %v1965_v15, 4 }
 0x205   : > { %v1972_v32 = vsel %vm1922_vm5, %v1703_v9, -inf  ;;  %v2017_v58 = vrot.slane %v2016_v43, 2  ;;  %v2024_v38 = vrot.slane %v2023_v62, 2  ;;  %v2029_v20 = vrot.slane %v2028_v2, 4 }
 0x206   : > { %v1953_v36 = vmax.f32 %v1951_v11, %v1952_v60  ;;  %v2011_v48 = vmax.f32 %v2009_v56, %v2010_v22  ;;  %v1959_v28 = vrot.slane %v1958_v13, 4  ;;  %v1967_v31 = vmax.f32 %v1965_v15, %v1966_v24 }
 0x207   : > { %v1973_v18 = vrot.slane %v1972_v32, 4  ;;  %v7522_v27 = vpack.c.bf16 %v9534_v21, %v9534_v21  ;;  %v7514_v0 = vpack.c.bf16 %v1950_v16, %v1950_v16  ;;  %v2457_v34 = vunpack.c.l.b16 %v7513_v50 }
 0x208   : > { %v1954_v39 = vrot.slane %v1953_v36, 2  ;;  %v2504_v26 = vsel %vm2503_vm6, %v2456_v4, %v2455_v25  ;;  %v1960_v29 = vmax.f32 %v1958_v13, %v1959_v28  ;;  %v1968_v40 = vrot.slane %v1967_v31, 2 }
 0x209   : > { %v1974_v19 = vmax.f32 %v1972_v32, %v1973_v18  ;;  %v2018_v49 = vmax.f32 %v2016_v43, %v2017_v58  ;;  %v9554_v54 = vmax.f32 %v2023_v62, %v2024_v38  ;;  %v2030_v57 = vmax.f32 %v2028_v2, %v2029_v20 }
 0x20a   : > { %v1955_v5 = vmax.f32 %v1953_v36, %v1954_v39  ;;  %v2012_v8 = vrot.slane %v2011_v48, 1  ;;  %v1961_v41 = vrot.slane %v1960_v29, 2  ;;  %v1969_v56 = vmax.f32 %v1967_v31, %v1968_v40 }
 0x20b   : > { %v1975_v52 = vrot.slane %v1974_v19, 2  ;;  %v2464_v53 = vunpack.c.l.b16 %v7520_v14  ;;  %v2465_v22 = vunpack.c.l.b16 %v7521_v23  ;;  %v2458_v9 = vunpack.c.l.b16 %v7514_v0 }
 0x20c   : > { %v1956_v11 = vrot.slane %v1955_v5, 1  ;;  %v2506_v15 = vsel %vm2505_vm7, %v2457_v34, %v2504_v26  ;;  %v1962_v16 = vmax.f32 %v1960_v29, %v1961_v41  ;;  %v1970_v50 = vrot.slane %v1969_v56, 1 }
 0x20d   : > { %v1976_v25 = vmax.f32 %v1974_v19, %v1975_v52  ;;  %v2019_v43 = vrot.slane %v2018_v49, 1  ;;  %v2026_v62 = vrot.slane %v9554_v54, 1  ;;  %v2031_v2 = vrot.slane %v2030_v57, 2 }
 0x20e   : > { %v1957_v60 = vmax.f32 %v1955_v5, %v1956_v11  ;;  %v2013_v4 = vmax.f32 %v2011_v48, %v2012_v8  ;;  %v1963_v13 = vrot.slane %v1962_v16, 1  ;;  %v1971_v24 = vmax.f32 %v1969_v56, %v1970_v50 }
 0x20f   : > { %v1977_v14 = vrot.slane %v1976_v25, 1  ;;  %v2508_v32 = vsel %vm2507_vm8, %v2458_v9, %v2506_v15  ;;  %v8173_v58 = vadd.f32 %v9501_v30, %v9462_v51  ;;  %v8174_v38 = vadd.f32 %v9505_v6, %v9464_v61 }
 0x210   : > { %v7515_v23 = vpack.c.bf16 %v1957_v60, %v1957_v60  ;;  %v1964_v20 = vmax.f32 %v1962_v16, %v1963_v13  ;;  %v7517_v28 = vpack.c.bf16 %v1971_v24, %v1971_v24  ;;  %v8175_v31 = vadd.f32 %v9507_v37, %v9466_v63 }
 0x211   : > { %v1978_v36 = vmax.f32 %v1976_v25, %v1977_v14  ;;  %v2020_v48 = vmax.f32 %v2018_v49, %v2019_v43  ;;  %v1640_v0 = vadd.f32 %v8173_v58, %v9483_v17  ;;  %v1638_v34 = vadd.f32 %v8174_v38, %v9483_v17 }
 0x212   : > { %v2459_v18 = vunpack.c.l.b16 %v7515_v23  ;;  %v2032_v39 = vmax.f32 %v2030_v57, %v2031_v2  ;;  %v7523_v26 = vpack.c.bf16 %v2013_v4, %v2013_v4  ;;  %v7516_v29 = vpack.c.bf16 %v1964_v20, %v1964_v20 }
 0x213   : > { %v7518_v40 = vpack.c.bf16 %v1978_v36, %v1978_v36  ;;  %v1652_v30 = vmax.f32 %v1640_v0, 0.0  ;;  %v1650_v61 = vmax.f32 %v1638_v34, 0.0  ;;  %v9570_v6 = vadd.f32 %v9512_v44, %v9468_v7 }
 0x214   : > { %v2510_v51 = vsel %vm2509_vm9, %v2459_v18, %v2508_v32  ;;  %v2460_v19 = vunpack.c.l.b16 %v7516_v29  ;;  %v2461_v63 = vunpack.c.l.b16 %v7517_v28  ;;  %v9574_v49 = vadd.f32 %v9515_v46, %v9470_v10 }
 0x215   : > { %v2462_v37 = vunpack.c.l.b16 %v7518_v40  ;;  %v7524_v5 = vpack.c.bf16 %v2020_v48, %v2020_v48  ;;  %v1772_v57 = vcombine.high %v1652_v30, %v1652_v30  ;;  %v1779_v8 = vrot.slane %v1652_v30, %v9487_v12 }
 0x216   : > { %v1738_v41 = vcombine.high %v1650_v61, %v1650_v61  ;;  %v2033_v56 = vrot.slane %v2032_v39, 1  ;;  %v2512_v52 = vsel %vm2511_vm12, %v2460_v19, %v2510_v51  ;;  %v1745_v7 = vrot.slane %v1650_v61, %v9487_v12 }
 0x217   : > { %v2514_v9 = vsel %vm2513_vm10, %v2462_v37, %v2461_v63  ;;  %v2551_v11 = vpack.c.b16 %v2512_v52, %v2512_v52  ;;  %v1786_v15 = vrot.slane %v1772_v57, %v9487_v12  ;;  %v1787_v10 = vcombine.high %v1779_v8, %v1779_v8 }
 0x218   : > { %v2516_v44 = vsel %vm2515_vm13, %v9543_v35, %v2514_v9  ;;  %v2466_v46 = vunpack.c.l.b16 %v7522_v27  ;;  %v2091_v50 = vsel %vm1922_vm5, %v1779_v8, -inf  ;;  %v1752_v25 = vrot.slane %v1738_v41, %v9487_v12 }
 0x219   : > { %v2517_v16 = vsel %vm2503_vm6, %v2464_v53, %v2516_v44  ;;  %v2467_v43 = vunpack.c.l.b16 %v7523_v26  ;;  %v2468_v2 = vunpack.c.l.b16 %v7524_v5  ;;  %2566 = vst.msk [vmem:[#allocation3] sm:$0xe] %vm2565_vm0, %v2551_v11  ;;  %v2098_v35 = vsel %vm1922_vm5, %v1787_v10, -inf }
 0x21a   : > { %v2518_v60 = vsel %vm2505_vm7, %v2465_v22, %v2517_v16  ;;  %v1788_v13 = vcombine.high %v1786_v15, %v1786_v15  ;;  %v2092_v24 = vrot.slane %v2091_v50, 4  ;;  %v1753_v21 = vcombine.high %v1745_v7, %v1745_v7 }
 0x21b   : > { %v2519_v4 = vsel %vm2507_vm8, %v2466_v46, %v2518_v60  ;;  %v2027_v27 = vmax.f32 %v9554_v54, %v2026_v62  ;;  %v2034_v53 = vmax.f32 %v2032_v39, %v2033_v56  ;;  %v2099_v32 = vrot.slane %v2098_v35, 4 }
 0x21c   : > { %v2520_v14 = vsel %vm2509_vm9, %v2467_v43, %v2519_v4  ;;  %v1754_v58 = vcombine.high %v1752_v25, %v1752_v25  ;;  %v2035_v22 = vsel %vm1922_vm5, %v1745_v7, -inf  ;;  %v2105_v20 = vsel %vm1922_vm5, %v1786_v15, -inf }
 0x21d   : > { %v2521_v23 = vsel %vm2511_vm12, %v2468_v2, %v2520_v14  ;;  %v2036_v36 = vrot.slane %v2035_v22, 4  ;;  %v1641_v28 = vadd.f32 %v8175_v31, %v9483_v17  ;;  %v2093_v48 = vmax.f32 %v2091_v50, %v2092_v24 }
 0x21e   : > { %v2552_v38 = vpack.c.b16 %v2521_v23, %v2521_v23  ;;  %v2112_v18 = vsel %vm1922_vm5, %v1788_v13, -inf  ;;  %v2042_v54 = vsel %vm1922_vm5, %v1753_v21, -inf  ;;  %v2049_v62 = vsel %vm1922_vm5, %v1752_v25, -inf }
 0x21f   : > { %v7525_v0 = vpack.c.bf16 %v2027_v27, %v2027_v27  ;;  %v7526_v34 = vpack.c.bf16 %v2034_v53, %v2034_v53  ;;  %v2037_v39 = vmax.f32 %v2035_v22, %v2036_v36  ;;  %v2043_v26 = vrot.slane %v2042_v54, 4 }
 0x220   : > { %2568 = vst.msk [vmem:[#allocation3 + $0x4] sm:$0xf] %vm2567_vm1, %v2552_v38  ;;  %v2100_v29 = vmax.f32 %v2098_v35, %v2099_v32  ;;  %v2106_v40 = vrot.slane %v2105_v20, 4  ;;  %v2050_v51 = vrot.slane %v2049_v62, 4  ;;  %v2056_v30 = vsel %vm1922_vm5, %v1754_v58, -inf }
 0x221   : > { %v2113_v61 = vrot.slane %v2112_v18, 4  ;;  %v2038_v31 = vrot.slane %v2037_v39, 2  ;;  %v2044_v19 = vmax.f32 %v2042_v54, %v2043_v26  ;;  %v1653_v63 = vmax.f32 %v1641_v28, 0.0 }
 0x222   : > { %v2094_v37 = vrot.slane %v2093_v48, 2  ;;  %v2051_v5 = vmax.f32 %v2049_v62, %v2050_v51  ;;  %v2057_v57 = vrot.slane %v2056_v30, 4  ;;  %v2469_v8 = vunpack.c.l.b16 %v7525_v0 }
 0x223   : > { %v2470_v41 = vunpack.c.l.b16 %v7526_v34  ;;  %v2039_v56 = vmax.f32 %v2037_v39, %v2038_v31  ;;  %v2045_v52 = vrot.slane %v2044_v19, 2  ;;  %v2101_v9 = vrot.slane %v2100_v29, 2 }
 0x224   : > { %v2107_v7 = vmax.f32 %v2105_v20, %v2106_v40  ;;  %v2052_v44 = vrot.slane %v2051_v5, 2  ;;  %v2058_v11 = vmax.f32 %v2056_v30, %v2057_v57  ;;  %v2114_v15 = vmax.f32 %v2112_v18, %v2113_v61 }
 0x225   : > { %v2040_v10 = vrot.slane %v2039_v56, 1  ;;  %v2046_v46 = vmax.f32 %v2044_v19, %v2045_v52  ;;  %v1789_v16 = vcombine.high %v1653_v63, %v1653_v63  ;;  %v2095_v50 = vmax.f32 %v2093_v48, %v2094_v37 }
 0x226   : > { %v2053_v25 = vmax.f32 %v2051_v5, %v2052_v44  ;;  %v2059_v43 = vrot.slane %v2058_v11, 2  ;;  %v1796_v2 = vrot.slane %v1653_v63, %v9487_v12  ;;  %v2522_v60 = vsel %vm2513_vm10, %v2470_v41, %v2469_v8 }
 0x227   : > { %v2041_v35 = vmax.f32 %v2039_v56, %v2040_v10  ;;  %v2047_v4 = vrot.slane %v2046_v46, 1  ;;  %v2102_v13 = vmax.f32 %v2100_v29, %v2101_v9  ;;  %v2108_v24 = vrot.slane %v2107_v7, 2 }
 0x228   : > { %v2054_v21 = vrot.slane %v2053_v25, 1  ;;  %v2060_v27 = vmax.f32 %v2058_v11, %v2059_v43  ;;  %v2115_v53 = vrot.slane %v2114_v15, 2  ;;  %v1803_v32 = vrot.slane %v1789_v16, %v9487_v12 }
 0x229   : > { %v2048_v14 = vmax.f32 %v2046_v46, %v2047_v4  ;;  %v7527_v23 = vpack.c.bf16 %v2041_v35, %v2041_v35  ;;  %v2096_v58 = vrot.slane %v2095_v50, 1  ;;  %v1804_v20 = vcombine.high %v1796_v2, %v1796_v2 }
 0x22a   : > { %v2055_v22 = vmax.f32 %v2053_v25, %v2054_v21  ;;  %v2061_v38 = vrot.slane %v2060_v27, 1  ;;  %v1805_v48 = vcombine.high %v1803_v32, %v1803_v32  ;;  %v2119_v18 = vsel %vm1922_vm5, %v1796_v2, -inf }
 0x22b   : > { %v7528_v36 = vpack.c.bf16 %v2048_v14, %v2048_v14  ;;  %v2471_v28 = vunpack.c.l.b16 %v7527_v23  ;;  %v2109_v54 = vmax.f32 %v2107_v7, %v2108_v24  ;;  %v2126_v34 = vsel %vm1922_vm5, %v1804_v20, -inf }
 0x22c   : > { %v2062_v62 = vmax.f32 %v2060_v27, %v2061_v38  ;;  %v7529_v0 = vpack.c.bf16 %v2055_v22, %v2055_v22  ;;  %v2120_v29 = vrot.slane %v2119_v18, 4  ;;  %v2133_v40 = vsel %vm1922_vm5, %v1803_v32, -inf }
 0x22d   : > { %v2472_v39 = vunpack.c.l.b16 %v7528_v36  ;;  %v2523_v26 = vsel %vm2515_vm13, %v2471_v28, %v2522_v60  ;;  %v2103_v51 = vrot.slane %v2102_v13, 1  ;;  %v2116_v30 = vmax.f32 %v2114_v15, %v2115_v53 }
 0x22e   : > { %v7530_v61 = vpack.c.bf16 %v2062_v62, %v2062_v62  ;;  %v2473_v31 = vunpack.c.l.b16 %v7529_v0  ;;  %v2127_v63 = vrot.slane %v2126_v34, 4  ;;  %v2140_v37 = vsel %vm1922_vm5, %v1805_v48, -inf }
 0x22f   : > { %v2524_v19 = vsel %vm2503_vm6, %v2472_v39, %v2523_v26  ;;  %v1639_v5 = vadd.f32 %v9570_v6, %v9483_v17  ;;  %v2097_v57 = vmax.f32 %v2095_v50, %v2096_v58  ;;  %v2134_v56 = vrot.slane %v2133_v40, 4 }
 0x230   : > { %v2474_v8 = vunpack.c.l.b16 %v7530_v61  ;;  %v2525_v41 = vsel %vm2505_vm7, %v2473_v31, %v2524_v19  ;;  %v2110_v52 = vrot.slane %v2109_v54, 1  ;;  %v2121_v9 = vmax.f32 %v2119_v18, %v2120_v29 }
 0x231   : > { %v2141_v7 = vrot.slane %v2140_v37, 4  ;;  %v1651_v44 = vmax.f32 %v1639_v5, 0.0  ;;  %v2104_v11 = vmax.f32 %v2102_v13, %v2103_v51  ;;  %v2117_v15 = vrot.slane %v2116_v30, 1 }
 0x232   : > { %v9617_v10 = vsel %vm2507_vm8, %v2474_v8, %v2525_v41  ;;  %v9621_v46 = vadd.f32 %v9517_v45, %v9472_v33  ;;  %v2128_v16 = vmax.f32 %v2126_v34, %v2127_v63  ;;  %v2135_v43 = vmax.f32 %v2133_v40, %v2134_v56 }
 0x233   : > { %v2142_v6 = vmax.f32 %v2140_v37, %v2141_v7  ;;  %v1755_v50 = vcombine.high %v1651_v44, %v1651_v44  ;;  %v1762_v25 = vrot.slane %v1651_v44, %v9487_v12  ;;  %v1644_v2 = vadd.f32 %v9574_v49, %v9483_v17 }
 0x234   : > { %v2111_v60 = vmax.f32 %v2109_v54, %v2110_v52  ;;  %v2122_v35 = vrot.slane %v2121_v9, 2  ;;  %v9627_v24 = vmax.f32 %v2116_v30, %v2117_v15  ;;  %v7535_v21 = vpack.c.bf16 %v2097_v57, %v2097_v57 }
 0x235   : > { %v1769_v4 = vrot.slane %v1755_v50, %v9487_v12  ;;  %v1770_v13 = vcombine.high %v1762_v25, %v1762_v25  ;;  %v2143_v27 = vrot.slane %v2142_v6, 2  ;;  %v2063_v33 = vsel %vm1922_vm5, %v1762_v25, -inf }
 0x236   : > { %v7536_v45 = vpack.c.bf16 %v2104_v11, %v2104_v11  ;;  %v2129_v53 = vrot.slane %v2128_v16, 2  ;;  %v2064_v23 = vrot.slane %v2063_v33, 4  ;;  %v2136_v32 = vrot.slane %v2135_v43, 2 }
 0x237   : > { %v1771_v14 = vcombine.high %v1769_v4, %v1769_v4  ;;  %v2070_v58 = vsel %vm1922_vm5, %v1770_v13, -inf  ;;  %v2077_v49 = vsel %vm1922_vm5, %v1769_v4, -inf  ;;  %v1656_v22 = vmax.f32 %v1644_v2, 0.0 }
 0x238   : > { %v7537_v38 = vpack.c.bf16 %v2111_v60, %v2111_v60  ;;  %v2123_v20 = vmax.f32 %v2121_v9, %v2122_v35  ;;  %v2065_v36 = vmax.f32 %v2063_v33, %v2064_v23  ;;  %v2071_v28 = vrot.slane %v2070_v58, 4 }
 0x239   : > { %v9632_v48 = vunpack.c.l.b16 %v7535_v21  ;;  %v2144_v18 = vmax.f32 %v2142_v6, %v2143_v27  ;;  %v2078_v54 = vrot.slane %v2077_v49, 4  ;;  %v2084_v62 = vsel %vm1922_vm5, %v1771_v14, -inf }
 0x23a   : > { %v7538_v0 = vpack.c.bf16 %v9627_v24, %v9627_v24  ;;  %v2130_v34 = vmax.f32 %v2128_v16, %v2129_v53  ;;  %v2066_v39 = vrot.slane %v2065_v36, 2  ;;  %v2072_v26 = vmax.f32 %v2070_v58, %v2071_v28 }
 0x23b   : > { %v2137_v29 = vmax.f32 %v2135_v43, %v2136_v32  ;;  %v2079_v40 = vmax.f32 %v2077_v49, %v2078_v54  ;;  %v2085_v51 = vrot.slane %v2084_v62, 4  ;;  %v1847_v30 = vrot.slane %v1656_v22, %v9487_v12 }
 0x23c   : > { %v9638_v61 = vunpack.c.l.b16 %v7536_v45  ;;  %v2124_v31 = vrot.slane %v2123_v20, 1  ;;  %v2067_v19 = vmax.f32 %v2065_v36, %v2066_v39  ;;  %v2073_v63 = vrot.slane %v2072_v26, 2 }
 0x23d   : > { %v2145_v37 = vrot.slane %v2144_v18, 1  ;;  %v2080_v5 = vrot.slane %v2079_v40, 2  ;;  %v2086_v57 = vmax.f32 %v2084_v62, %v2085_v51  ;;  %v1855_v8 = vcombine.high %v1847_v30, %v1847_v30 }
 0x23e   : > { %v2131_v41 = vrot.slane %v2130_v34, 1  ;;  %v2068_v56 = vrot.slane %v2067_v19, 1  ;;  %v2074_v52 = vmax.f32 %v2072_v26, %v2073_v63  ;;  %v1840_v9 = vcombine.high %v1656_v22, %v1656_v22 }
 0x23f   : > { %v2138_v7 = vrot.slane %v2137_v29, 1  ;;  %v2081_v44 = vmax.f32 %v2079_v40, %v2080_v5  ;;  %v2087_v11 = vrot.slane %v2086_v57, 2  ;;  %v2203_v15 = vsel %vm1922_vm5, %v1847_v30, -inf }
 0x240   : > { %v2481_v16 = vunpack.c.l.b16 %v7537_v38  ;;  %v2125_v6 = vmax.f32 %v2123_v20, %v2124_v31  ;;  %v2069_v50 = vmax.f32 %v2067_v19, %v2068_v56  ;;  %v2075_v25 = vrot.slane %v2074_v52, 1 }
 0x241   : > { %v2146_v43 = vmax.f32 %v2144_v18, %v2145_v37  ;;  %v2082_v2 = vrot.slane %v2081_v44, 1  ;;  %v2088_v60 = vmax.f32 %v2086_v57, %v2087_v11  ;;  %v2210_v35 = vsel %vm1922_vm5, %v1855_v8, -inf }
 0x242   : > { %v2076_v4 = vmax.f32 %v2074_v52, %v2075_v25  ;;  %v7531_v13 = vpack.c.bf16 %v2069_v50, %v2069_v50  ;;  %v1854_v24 = vrot.slane %v1840_v9, %v9487_v12  ;;  %v2204_v21 = vrot.slane %v2203_v15, 4 }
 0x243   : > { %v2132_v27 = vmax.f32 %v2130_v34, %v2131_v41  ;;  %v2139_v33 = vmax.f32 %v2137_v29, %v2138_v7  ;;  %v2083_v45 = vmax.f32 %v2081_v44, %v2082_v2  ;;  %v2089_v53 = vrot.slane %v2088_v60, 1 }
 0x244   : > { %v7532_v14 = vpack.c.bf16 %v2076_v4, %v2076_v4  ;;  %v2475_v23 = vunpack.c.l.b16 %v7531_v13  ;;  %v2211_v32 = vrot.slane %v2210_v35, 4  ;;  %v1642_v58 = vadd.f32 %v9621_v46, %v9483_v17 }
 0x245   : > { %v2482_v49 = vunpack.c.l.b16 %v7538_v0  ;;  %v7542_v22 = vpack.c.bf16 %v2146_v43, %v2146_v43  ;;  %v2090_v38 = vmax.f32 %v2088_v60, %v2089_v53  ;;  %v7533_v20 = vpack.c.bf16 %v2083_v45, %v2083_v45 }
 0x246   : > { %v2476_v36 = vunpack.c.l.b16 %v7532_v14  ;;  %v2527_v28 = vsel %vm2509_vm9, %v2475_v23, %v9617_v10  ;;  %v2205_v18 = vmax.f32 %v2203_v15, %v2204_v21  ;;  %v2217_v54 = vsel %vm1922_vm5, %v1854_v24, -inf }
 0x247   : > { %v7539_v62 = vpack.c.bf16 %v2125_v6, %v2125_v6  ;;  %v7540_v34 = vpack.c.bf16 %v2132_v27, %v2132_v27  ;;  %v7541_v39 = vpack.c.bf16 %v2139_v33, %v2139_v33  ;;  %v7534_v26 = vpack.c.bf16 %v2090_v38, %v2090_v38 }
 0x248   : > { %v2528_v29 = vsel %vm2511_vm12, %v2476_v36, %v2527_v28  ;;  %v1856_v40 = vcombine.high %v1854_v24, %v1854_v24  ;;  %v2212_v51 = vmax.f32 %v2210_v35, %v2211_v32  ;;  %v1654_v46 = vmax.f32 %v1642_v58, 0.0  ;;  %v8349_v32 = vld [vmem:[#allocation6] sm:$0xff]  }
 0x249   : > { %v2477_v0 = vunpack.c.l.b16 %v7533_v20  ;;  %v2478_v30 = vunpack.c.l.b16 %v7534_v26  ;;  %v2553_v31 = vpack.c.b16 %v2528_v29, %v2528_v29  ;;  %v2218_v19 = vrot.slane %v2217_v54, 4  ;;  %v8353_v20 = vld [vmem:[#allocation6 + $0x20] sm:$0xff]  }
 0x24a   : > { %v2486_v63 = vunpack.c.l.b16 %v7542_v22  ;;  %v2206_v37 = vrot.slane %v2205_v18, 2  ;;  %v1806_v5 = vcombine.high %v1654_v46, %v1654_v46  ;;  %v1813_v10 = vrot.slane %v1654_v46, %v9487_v12 }
 0x24b   : > { %v2483_v57 = vunpack.c.l.b16 %v7539_v62  ;;  %v2485_v8 = vunpack.c.l.b16 %v7541_v39  ;;  %v2529_v41 = vsel %vm2513_vm10, %v2478_v30, %v2477_v0  ;;  %2569 = vst.msk [vmem:[#allocation3 + $0x8] sm:$0xf] %vm2567_vm1, %v2553_v31  ;;  %v8179_v56 = vadd.f32 %v9520_v55, %v9474_v42  ;;  %v8356_v31 = vld [vmem:[#allocation6 + $0x28] sm:$0xff]  }
 0x24c   : > { %v2530_v52 = vsel %vm2515_vm13, %v9632_v48, %v2529_v41  ;;  %v2213_v9 = vrot.slane %v2212_v51, 2  ;;  %v2224_v7 = vsel %vm1922_vm5, %v1856_v40, -inf  ;;  %v1820_v44 = vrot.slane %v1806_v5, %v9487_v12 }
 0x24d   : > { %v2484_v11 = vunpack.c.l.b16 %v7540_v34  ;;  %v2531_v15 = vsel %vm2503_vm6, %v9638_v61, %v2530_v52  ;;  %v2219_v6 = vmax.f32 %v2217_v54, %v2218_v19  ;;  %v1821_v50 = vcombine.high %v1813_v10, %v1813_v10 }
 0x24e   : > { %v9661_v25 = vsel %vm2513_vm10, %v2486_v63, %v2485_v8  ;;  %v2532_v43 = vsel %vm2505_vm7, %v2481_v16, %v2531_v15  ;;  %v2207_v42 = vmax.f32 %v2205_v18, %v2206_v37  ;;  %v1822_v55 = vcombine.high %v1820_v44, %v1820_v44 }
 0x24f   : > { %v2533_v48 = vsel %vm2507_vm8, %v2482_v49, %v2532_v43  ;;  %v2225_v2 = vrot.slane %v2224_v7, 4  ;;  %v2147_v60 = vsel %vm1922_vm5, %v1813_v10, -inf  ;;  %v2154_v35 = vsel %vm1922_vm5, %v1821_v50, -inf  ;;  %v8357_v50 = vld [vmem:[#allocation6 + $0x30] sm:$0xff]  }
 0x250   : > { %v2534_v4 = vsel %vm2509_vm9, %v2483_v57, %v2533_v48  ;;  %v9668_v13 = vmax.f32 %v2212_v51, %v2213_v9  ;;  %v2148_v61 = vrot.slane %v2147_v60, 4  ;;  %v2155_v24 = vrot.slane %v2154_v35, 4 }
 0x251   : > { %v2535_v21 = vsel %vm2511_vm12, %v2484_v11, %v2534_v4  ;;  %v2220_v27 = vrot.slane %v2219_v6, 2  ;;  %v2161_v16 = vsel %vm1922_vm5, %v1820_v44, -inf  ;;  %v2168_v33 = vsel %vm1922_vm5, %v1822_v55, -inf }
 0x252   : > { %v2554_v45 = vpack.c.b16 %v2535_v21, %v2535_v21  ;;  %v2149_v53 = vmax.f32 %v2147_v60, %v2148_v61  ;;  %v2156_v14 = vmax.f32 %v2154_v35, %v2155_v24  ;;  %v2162_v23 = vrot.slane %v2161_v16, 4  ;;  %v9702_v61 = vld [vmem:[#allocation3 + $0x4] sm:$0xf] }
 0x253   : > { %v2208_v58 = vrot.slane %v2207_v42, 1  ;;  %v2169_v49 = vrot.slane %v2168_v33, 4  ;;  %v1645_v22 = vadd.f32 %v8179_v56, %v9483_v17  ;;  %v8180_v38 = vadd.f32 %v9522_v59, %v9476_v47  ;;  %v8350_v59 = vld [vmem:[#allocation6 + $0x8] sm:$0xff]  }
 0x254   : > { %2570 = vst.msk [vmem:[#allocation3 + $0xc] sm:$0xf] %vm2567_vm1, %v2554_v45  ;;  %v2150_v36 = vrot.slane %v2149_v53, 2  ;;  %v2157_v28 = vrot.slane %v2156_v14, 2  ;;  %v2163_v18 = vmax.f32 %v2161_v16, %v2162_v23  ;;  %v9677_v54 = vmax.f32 %v2224_v7, %v2225_v2  ;;  %v8351_v7 = vld [vmem:[#allocation6 + $0x10] sm:$0xff]  }
 0x255   : > { %v2170_v62 = vmax.f32 %v2168_v33, %v2169_v49  ;;  %v1657_v34 = vmax.f32 %v1645_v22, 0.0  ;;  %v8832_v39 = vmov 0.0   ;;  %v1643_v47 = vadd.f32 %v8180_v38, %v9483_v17  ;;  %v8352_v33 = vld [vmem:[#allocation6 + $0x18] sm:$0xff]  }
 0x256   : > { %8071 = vmatprep.subr.bf16.mxu1 %v8832_v39  ;;  %8051 = vmatprep.subr.bf16.mxu0 %v8832_v39  ;;  %v2151_v26 = vmax.f32 %v2149_v53, %v2150_v36  ;;  %v2158_v29 = vmax.f32 %v2156_v14, %v2157_v28  ;;  %v2164_v40 = vrot.slane %v2163_v18, 2  ;;  %vm10256_vm0 = vmmov 0  }
 0x257   : > { %8072 = vmatpush3.bf16.msra.mxu1 %v8349_v32  ;;  %8079 = vmatprep.mubr.msk.bf16.mxu1 %vm10256_vm0, %v8832_v39  ;;  %v2215_v51 = vrot.slane %v9668_v13, 1  ;;  %v2171_v46 = vrot.slane %v2170_v62, 2  ;;  %v1857_v0 = vcombine.high %v1657_v34, %v1657_v34  ;;  %v1864_v30 = vrot.slane %v1657_v34, %v9487_v12  ;;  %v2574_v32 = vld [vmem:[#allocation3] sm:$0xf] }
 0x258   : > { %8073 = vmatprep.subr.bf16.mxu1 %v8832_v39  ;;  %8052 = vmatpush3.bf16.msra.mxu0 %v8353_v20  ;;  %v9687_v19 = vmax.f32 %v2219_v6, %v2220_v27  ;;  %v2152_v63 = vrot.slane %v2151_v26, 1  ;;  %v2159_v17 = vrot.slane %v2158_v29, 1  ;;  %v2165_v37 = vmax.f32 %v2163_v18, %v2164_v40  ;;  %v8360_v20 = vld [vmem:[#allocation6 + $0x38] sm:$0xff]  }
 0x259   : > { %8053 = vmatprep.subr.bf16.mxu0 %v8832_v39  ;;  %8059 = vmatprep.mubr.msk.bf16.mxu0 %vm10256_vm0, %v8832_v39  ;;  %v9692_v5 = vmax.f32 %v2207_v42, %v2208_v58  ;;  %v2172_v10 = vmax.f32 %v2170_v62, %v2171_v46  ;;  %v1871_v57 = vrot.slane %v1857_v0, %v9487_v12  ;;  %v1655_v9 = vmax.f32 %v1643_v47, 0.0 }
 0x25a   : > { %v1872_v8 = vcombine.high %v1864_v30, %v1864_v30  ;;  %v2153_v41 = vmax.f32 %v2151_v26, %v2152_v63  ;;  %v2160_v56 = vmax.f32 %v2158_v29, %v2159_v17  ;;  %v2166_v52 = vrot.slane %v2165_v37, 1 }
 0x25b   : > { %8074 = vmatpush3.bf16.msra.mxu1 %v8350_v59  ;;  %v2173_v44 = vrot.slane %v2172_v10, 1  ;;  %v1873_v11 = vcombine.high %v1871_v57, %v1871_v57  ;;  %v2231_v15 = vsel %vm1922_vm5, %v1864_v30, -inf  ;;  %v2245_v6 = vsel %vm1922_vm5, %v1871_v57, -inf }
 0x25c   : > { %8075 = vmatprep.subr.bf16.mxu1 %v8832_v39  ;;  %8054 = vmatpush3.bf16.msra.mxu0 %v8356_v31  ;;  %v2167_v43 = vmax.f32 %v2165_v37, %v2166_v52  ;;  %v7543_v42 = vpack.c.bf16 %v2153_v41, %v2153_v41  ;;  %v7544_v55 = vpack.c.bf16 %v2160_v56, %v2160_v56  ;;  %v2238_v48 = vsel %vm1922_vm5, %v1872_v8, -inf }
 0x25d   : > { %8055 = vmatprep.subr.bf16.mxu0 %v8832_v39  ;;  %v2227_v2 = vrot.slane %v9677_v54, 2  ;;  %v2174_v60 = vmax.f32 %v2172_v10, %v2173_v44  ;;  %v2246_v35 = vrot.slane %v2245_v6, 4  ;;  %v2252_v4 = vsel %vm1922_vm5, %v1873_v11, -inf }
 0x25e   : > { %v7545_v24 = vpack.c.bf16 %v2167_v43, %v2167_v43  ;;  %v2487_v21 = vunpack.c.l.b16 %v7543_v42  ;;  %v2488_v27 = vunpack.c.l.b16 %v7544_v55  ;;  %v2232_v16 = vrot.slane %v2231_v15, 4 }
 0x25f   : > { %8076 = vmatpush3.bf16.msra.mxu1 %v8351_v7  ;;  %v7546_v45 = vpack.c.bf16 %v2174_v60, %v2174_v60  ;;  %v2239_v53 = vrot.slane %v2238_v48, 4  ;;  %v2247_v14 = vmax.f32 %v2245_v6, %v2246_v35  ;;  %v2253_v23 = vrot.slane %v2252_v4, 4  ;;  %v9738_v60 = vld [vmem:[#allocation3 + $0x8] sm:$0xff]  }
 0x260   : > { %8077 = vmatprep.subr.bf16.mxu1 %v8832_v39  ;;  %8056 = vmatpush3.bf16.msra.mxu0 %v8357_v50  ;;  %v2489_v58 = vunpack.c.l.b16 %v7545_v24  ;;  %v2537_v49 = vsel %vm2515_vm13, %v2487_v21, %v9661_v25  ;;  %v1823_v22 = vcombine.high %v1655_v9, %v1655_v9  ;;  %v9708_v38 = vcombine.low %v2574_v32, %v9702_v61  ;;  %v8355_v25 = vld [vmem:[#allocation6 + $0x40] sm:$0xff]  }
 0x261   : > { %8057 = vmatprep.subr.bf16.mxu0 %v8832_v39  ;;  %v2490_v36 = vunpack.c.l.b16 %v7546_v45  ;;  %v2538_v28 = vsel %vm2503_vm6, %v2488_v27, %v2537_v49  ;;  %v2248_v18 = vrot.slane %v2247_v14, 2  ;;  %v2233_v34 = vmax.f32 %v2231_v15, %v2232_v16  ;;  %v8361_v27 = vld [vmem:[#allocation6 + $0x50] sm:$0xff]  }
 0x262   : > { %v2539_v62 = vsel %vm2505_vm7, %v2489_v58, %v2538_v28  ;;  %v2254_v26 = vmax.f32 %v2252_v4, %v2253_v23  ;;  %v1830_v29 = vrot.slane %v1655_v9, %v9487_v12  ;;  %v2240_v40 = vmax.f32 %v2238_v48, %v2239_v53 }
 0x263   : > { %8078 = vmatpush3.bf16.msra.mxu1 %v8352_v33  ;;  %v2249_v47 = vmax.f32 %v2247_v14, %v2248_v18  ;;  %v1837_v59 = vrot.slane %v1823_v22, %v9487_v12  ;;  %v9716_v46 = vsel %vm2507_vm8, %v2490_v36, %v2539_v62  ;;  %v9722_v0 = vmax.f32 %v9668_v13, %v2215_v51  ;;  %v8358_v51 = vld [vmem:[#allocation6 + $0x48] sm:$0xff]   ;;  %v8363_v18 = vld [vmem:[#allocation6 + $0x58] sm:$0xff]  }
 0x264   : > { %8091 = vmatprep.subr.bf16.mxu1 %v8832_v39  ;;  %v2255_v30 = vrot.slane %v2254_v26, 2  ;;  %v1838_v31 = vcombine.high %v1830_v29, %v1830_v29  ;;  %v2175_v63 = vsel %vm1922_vm5, %v1830_v29, -inf  ;;  %8058 = vmatpush3.bf16.msra.mxu0 %v8360_v20  ;;  %v2222_v17 = vrot.slane %v9687_v19, 1 }
 0x265   : > { %v2250_v37 = vrot.slane %v2249_v47, 1  ;;  %v1839_v10 = vcombine.high %v1837_v59, %v1837_v59  ;;  %v2176_v57 = vrot.slane %v2175_v63, 4  ;;  %v2234_v8 = vrot.slane %v2233_v34, 2 }
 0x266   : > { %8080 = vmatmul.mubr.msk.bf16.vlgmr.msra.gmra.mrb[8].mxu1 %vm2668_vm2, %v9708_v38  ;;  %v2256_v41 = vmax.f32 %v2254_v26, %v2255_v30  ;;  %v2182_v56 = vsel %vm1922_vm5, %v1838_v31, -inf  ;;  %v2189_v13 = vsel %vm1922_vm5, %v1837_v59, -inf  ;;  %v2241_v52 = vrot.slane %v2240_v40, 2 }
 0x267   : > { %8092 = vmatpush3.bf16.msra.mxu1 %v8355_v25  ;;  %8083 = vmatprep.mubr.msk.bf16.mxu1 %vm10256_vm0, %v8832_v39  ;;  %v2251_v9 = vmax.f32 %v2249_v47, %v2250_v37  ;;  %v2177_v7 = vmax.f32 %v2175_v63, %v2176_v57  ;;  %v2183_v44 = vrot.slane %v2182_v56, 4  ;;  %v2228_v11 = vmax.f32 %v9677_v54, %v2227_v2 }
 0x268   : > { %8093 = vmatprep.subr.bf16.mxu1 %v8832_v39  ;;  %v2257_v15 = vrot.slane %v2256_v41, 1  ;;  %v2190_v6 = vrot.slane %v2189_v13, 4  ;;  %v2196_v50 = vsel %vm1922_vm5, %v1839_v10, -inf  ;;  %v9736_v43 = vmax.f32 %v9687_v19, %v2222_v17 }
 0x269   : > { %v7557_v42 = vpack.c.bf16 %v2251_v9, %v2251_v9  ;;  %v2178_v55 = vrot.slane %v2177_v7, 2  ;;  %v2184_v48 = vmax.f32 %v2182_v56, %v2183_v44  ;;  %v2235_v35 = vmax.f32 %v2233_v34, %v2234_v8 }
 0x26a   : > { %v2258_v4 = vmax.f32 %v2256_v41, %v2257_v15  ;;  %v2191_v24 = vmax.f32 %v2189_v13, %v2190_v6  ;;  %v2197_v21 = vrot.slane %v2196_v50, 4  ;;  %v2242_v16 = vmax.f32 %v2240_v40, %v2241_v52 }
 0x26b   : > { %8094 = vmatpush3.bf16.msra.mxu1 %v8358_v51  ;;  %v2179_v54 = vmax.f32 %v2177_v7, %v2178_v55  ;;  %v2185_v2 = vrot.slane %v2184_v48, 2  ;;  %v2617_v33 = vshrl.u32 %v9708_v38, 16  ;;  %v2619_v14 = vshll.u32 %v9708_v38, 16 }
 0x26c   : > { %8095 = vmatprep.subr.bf16.mxu1 %v8832_v39  ;;  %v7558_v19 = vpack.c.bf16 %v2258_v4, %v2258_v4  ;;  %v2192_v45 = vrot.slane %v2191_v24, 2  ;;  %v2198_v53 = vmax.f32 %v2196_v50, %v2197_v21  ;;  %v2501_v23 = vunpack.c.l.b16 %v7557_v42  ;;  %v3072_v42 = vld [vmem:[#allocation3] sm:$0xc] }
 0x26d   : > { %v2180_v32 = vrot.slane %v2179_v54, 1  ;;  %v2186_v58 = vmax.f32 %v2184_v48, %v2185_v2  ;;  %v2624_v49 = vshll.u32 %v9738_v60, 16  ;;  %v2621_v28 = vrot.slane %v2619_v14, 1 }
 0x26e   : > { %8084 = vmatmul.mubr.msk.bf16.gmra.mrb[12].mxu1 %vm2668_vm2, %v9738_v60  ;;  %v2502_v22 = vunpack.c.l.b16 %v7558_v19  ;;  %v2193_v20 = vmax.f32 %v2191_v24, %v2192_v45  ;;  %v2199_v36 = vrot.slane %v2198_v53, 2  ;;  %v2229_v62 = vrot.slane %v2228_v11, 1 }
 0x26f   : > { %8096 = vmatpush3.bf16.msra.mxu1 %v8361_v27  ;;  %8087 = vmatprep.mubr.msk.bf16.mxu1 %vm10256_vm0, %v8832_v39  ;;  %v2181_v34 = vmax.f32 %v2179_v54, %v2180_v32  ;;  %v2187_v38 = vrot.slane %v2186_v58, 1  ;;  %v9750_v26 = vrot.slane %v2624_v49, 1  ;;  %v2622_v47 = vor.u32 %v2621_v28, %v2617_v33 }
 0x270   : > { %8097 = vmatprep.subr.bf16.mxu1 %v8832_v39  ;;  %v2550_v29 = vsel %vm2513_vm10, %v2502_v22, %v2501_v23  ;;  %v2194_v25 = vrot.slane %v2193_v20, 1  ;;  %v2200_v40 = vmax.f32 %v2198_v53, %v2199_v36  ;;  %v2236_v59 = vrot.slane %v2235_v35, 1 }
 0x271   : > { %v2557_v30 = vpack.c.b16 %v2550_v29, %v2550_v29  ;;  %v2188_v31 = vmax.f32 %v2186_v58, %v2187_v38  ;;  %v7547_v63 = vpack.c.bf16 %v2181_v34, %v2181_v34  ;;  %v2243_v17 = vrot.slane %v2242_v16, 1  ;;  %v2822_v34 = vld [vmem:[#allocation3] sm:$0xe] }
 0x272   : > { %v2195_v37 = vmax.f32 %v2193_v20, %v2194_v25  ;;  %v2201_v10 = vrot.slane %v2200_v40, 1  ;;  %v2627_v57 = vsel %vm656_vm11, %v2622_v47, %v9750_v26  ;;  %v2230_v8 = vmax.f32 %v2228_v11, %v2229_v62 }
 0x273   : > { %8098 = vmatpush3.bf16.msra.mxu1 %v8363_v18  ;;  %2573 = vst.msk [vmem:[#allocation3 + $0x18] sm:$0x1] %vm2259_vm4, %v2557_v30  ;;  %v7548_v41 = vpack.c.bf16 %v2188_v31, %v2188_v31  ;;  %v2491_v56 = vunpack.c.l.b16 %v7547_v63  ;;  %8060 = vmatmul.mubr.msk.bf16.vlgmr.msra.gmra.mrb[12].mxu0 %vm2668_vm2, %v2627_v57  ;;  %v7551_v52 = vpack.c.bf16 %v9692_v5, %v9692_v5  ;;  %v3086_v21 = vrot.slane %v9738_v60, 2  ;;  %v8365_v31 = vld [vmem:[#allocation6 + $0x60] sm:$0xff]  }
 0x274   : > { %8111 = vmatprep.subr.bf16.mxu1 %v8832_v39  ;;  %v2202_v13 = vmax.f32 %v2200_v40, %v2201_v10  ;;  %v7549_v51 = vpack.c.bf16 %v2195_v37, %v2195_v37  ;;  %8063 = vmatprep.mubr.msk.bf16.mxu0 %vm10256_vm0, %v8832_v39  ;;  %v2237_v9 = vmax.f32 %v2235_v35, %v2236_v59  ;;  %v2628_v18 = vshrl.u32 %v9738_v60, 16  ;;  %v8367_v37 = vld [vmem:[#allocation6 + $0x68] sm:$0xff]  }
 0x275   : > { %v2492_v7 = vunpack.c.l.b16 %v7548_v41  ;;  %v2541_v44 = vsel %vm2509_vm9, %v2491_v56, %v9716_v46  ;;  %v7552_v11 = vpack.c.bf16 %v9722_v0, %v9722_v0  ;;  %v7553_v15 = vpack.c.bf16 %v9736_v43, %v9736_v43  ;;  %v8368_v41 = vld [vmem:[#allocation6 + $0x70] sm:$0xff]  }
 0x276   : > { %v2244_v6 = vmax.f32 %v2242_v16, %v2243_v17  ;;  %v7550_v50 = vpack.c.bf16 %v2202_v13, %v2202_v13  ;;  %v7554_v55 = vpack.c.bf16 %v2230_v8, %v2230_v8  ;;  %v7198_v4 = vcombine.low %v3072_v42, %v9702_v61  ;;  %v8369_v13 = vld [vmem:[#allocation6 + $0x78] sm:$0xff]  }
 0x277   : > { %v2542_v48 = vsel %vm2511_vm12, %v2492_v7, %v2541_v44  ;;  %v2493_v5 = vunpack.c.l.b16 %v7549_v51  ;;  %v2495_v46 = vunpack.c.l.b16 %v7551_v52  ;;  %v7555_v27 = vpack.c.bf16 %v2237_v9, %v2237_v9 }
 0x278   : > { %v2494_v35 = vunpack.c.l.b16 %v7550_v50  ;;  %v2555_v24 = vpack.c.b16 %v2542_v48, %v2542_v48  ;;  %v3085_v54 = vrot.slane %v7198_v4, 2  ;;  %v2496_v0 = vunpack.c.l.b16 %v7552_v11 }
 0x279   : > { %v7556_v2 = vpack.c.bf16 %v2244_v6, %v2244_v6  ;;  %v2497_v16 = vunpack.c.l.b16 %v7553_v15  ;;  %v2498_v45 = vunpack.c.l.b16 %v7554_v55  ;;  %v2499_v14 = vunpack.c.l.b16 %v7555_v27  ;;  %v8370_v55 = vld [vmem:[#allocation6 + $0x80] sm:$0xff]  }
 0x27a   : > { %v2543_v43 = vsel %vm2513_vm10, %v2494_v35, %v2493_v5  ;;  %2571 = vst.msk [vmem:[#allocation3 + $0x10] sm:$0xf] %vm2567_vm1, %v2555_v24  ;;  %v9778_v19 = vsel %vm1207_vm14, %v3085_v54, %v3086_v21  ;;  %v7182_v38 = vcombine.low %v2822_v34, %v9702_v61  ;;  %v2630_v29 = vor.u32 %v2628_v18, %v9750_v26  ;;  %v8366_v40 = vld [vmem:[#allocation3 + $0x18] ss:$0 sps:$4 sm:$0x11]   ;;  %v8371_v35 = vld [vmem:[#allocation6 + $0x88] sm:$0xff]  }
 0x27b   : > { %v2544_v33 = vsel %vm2515_vm13, %v2495_v46, %v2543_v43  ;;  %v2500_v32 = vunpack.c.l.b16 %v7556_v2  ;;  %v2836_v47 = vrot.slane %v9738_v60, 1  ;;  %v2640_v17 = vshll.u32 %v8366_v40, 16  ;;  %v8372_v46 = vld [vmem:[#allocation6 + $0x90] sm:$0xff]  }
 0x27c   : > { %v2545_v53 = vsel %vm2503_vm6, %v2496_v0, %v2544_v33  ;;  %v2835_v30 = vrot.slane %v7182_v38, 1  ;;  %v2840_v51 = vrot.slane %v8366_v40, 1  ;;  %v2952_v52 = vshrl.u32 %v7182_v38, 16 }
 0x27d   : > { %v2546_v23 = vsel %vm2505_vm7, %v2497_v16, %v2545_v53  ;;  %v2642_v10 = vrot.slane %v2640_v17, 1  ;;  %v2955_v9 = vshll.u32 %v7182_v38, 16  ;;  %v2959_v7 = vrot.slane %v2628_v18, 1  ;;  %v8374_v16 = vld [vmem:[#allocation6 + $0x98] sm:$0xff]   ;;  %v8375_v17 = vld [vmem:[#allocation9 + $0x80] ss:$8 sps:$4 sm:$0xff]  }
 0x27e   : > { %v2547_v58 = vsel %vm2507_vm8, %v2498_v45, %v2546_v23  ;;  %v2837_v61 = vsel %vm915_vm15, %v2835_v30, %v2836_v47  ;;  %v2960_v11 = vrot.slane %v2624_v49, 2  ;;  %v2954_v15 = vrot.slane %v2952_v52, 1  ;;  %v8373_v49 = vld [vmem:[#allocation3 + $0x18] ss:$0 sps:$4 sm:$0x33]  }
 0x27f   : > { %v2548_v22 = vsel %vm2509_vm9, %v2499_v14, %v2547_v58  ;;  %v2957_v6 = vrot.slane %v2955_v9, 2  ;;  %v2968_v27 = vshrl.u32 %v8373_v49, 16  ;;  %v2971_v54 = vshll.u32 %v8373_v49, 16 }
 0x280   : > { %v2549_v20 = vsel %vm2511_vm12, %v2500_v32, %v2548_v22  ;;  %v2961_v50 = vor.u32 %v2960_v11, %v2959_v7  ;;  %v3090_v23 = vrot.slane %v8373_v49, 2  ;;  %vm3513_vm4 = vsmask.f32 7938 }
 0x281   : > { %v2556_v36 = vpack.c.b16 %v2549_v20, %v2549_v20  ;;  %v2958_v42 = vor.u32 %v2957_v6, %v2954_v15  ;;  %v2970_v2 = vrot.slane %v2968_v27, 1  ;;  %v2973_v43 = vrot.slane %v2971_v54, 2  ;;  %v8381_v6 = vld [vmem:[#allocation9 + $0xa0] ss:$8 sps:$4 sm:$0xff]  }
 0x283   : > { %2572 = vst.msk [vmem:[#allocation3 + $0x14] sm:$0xf] %vm2567_vm1, %v2556_v36  ;;  %v2962_v48 = vsel %vm1049_vm3, %v2958_v42, %v2961_v50  ;;  %v2974_v33 = vor.u32 %v2973_v43, %v2970_v2  ;;  %vm10292_vm1 = vcmask 1041408  }
 0x28a   : > { %v9786_v28 = vld [vmem:[#allocation3 + $0x10] sm:$0xff]  }
 0x28b   : > { %8088 = vmatmul.mubr.msk.bf16.gmra.mrb[16].mxu1 %vm2668_vm2, %v9786_v28  ;;  %v2632_v62 = vshll.u32 %v9786_v28, 16  ;;  %v2636_v63 = vshrl.u32 %v9786_v28, 16  ;;  %v2838_v57 = vrot.slane %v9786_v28, 1  ;;  %v3088_v53 = vrot.slane %v9786_v28, 2 }
 0x28c   : > { %8099 = vmatprep.mubr.msk.bf16.mxu1 %vm10256_vm0, %v8832_v39 }
 0x28d   : > { %v2634_v25 = vrot.slane %v2632_v62, 1  ;;  %v2839_v56 = vsel %vm915_vm15, %v2836_v47, %v2838_v57  ;;  %v2841_v44 = vsel %vm915_vm15, %v2838_v57, %v2840_v51  ;;  %v2963_v4 = vrot.slane %v2636_v63, 1  ;;  %v3510_v47 = vld [vmem:[#allocation4] sm:$0x1] }
 0x28e   : > { %v2964_v5 = vrot.slane %v2632_v62, 2  ;;  %v3089_v14 = vsel %vm1207_vm14, %v3086_v21, %v3088_v53  ;;  %v3091_v32 = vsel %vm1207_vm14, %v3088_v53, %v3090_v23  ;;  %vm3508_vm14 = vsmask.f32 256  ;;  %v8390_v23 = vld [vmem:[#allocation9 + $0xd0] ss:$8 sps:$4 sm:$0xff]  }
 0x28f   : > { %v2635_v59 = vsel %vm656_vm11, %v2630_v29, %v2634_v25  ;;  %v2638_v26 = vor.u32 %v2636_v63, %v2634_v25 }
 0x290   : > { %8064 = vmatmul.mubr.msk.bf16.gmra.mrb[16].mxu0 %vm2668_vm2, %v2635_v59  ;;  %v2965_v24 = vor.u32 %v2964_v5, %v2963_v4  ;;  %v8384_v5 = vld [vmem:[#allocation9 + $0xb0] ss:$8 sps:$4 sm:$0xff]  }
 0x291   : > { %8067 = vmatprep.mubr.msk.bf16.mxu0 %vm10256_vm0, %v8832_v39  ;;  %v2643_v8 = vsel %vm656_vm11, %v2638_v26, %v2642_v10  ;;  %v8380_v10 = vld [vmem:[#allocation9 + $0x94] ss:$8 sps:$4 sm:$0xff]  }
 0x292   : > { %v2966_v0 = vsel %vm1049_vm3, %v2961_v50, %v2965_v24  ;;  %v2975_v45 = vsel %vm1049_vm3, %v2965_v24, %v2974_v33  ;;  %vm10255_vm3 = vcmask 1040384  }
 0x293   : > { %8100 = vmatmul.mubr.msk.bf16.vlgmr.msra.gmra.mrb[20].mxu1 %vm2668_vm2, %v2837_v61  ;;  %vm3514_vm5 = vmand %vm10255_vm3, %vm3513_vm4 }
 0x294   : > { %8112 = vmatpush3.bf16.msra.mxu1 %v8365_v31  ;;  %8103 = vmatprep.mubr.msk.bf16.mxu1 %vm10256_vm0, %v8832_v39  ;;  %v8377_v31 = vld [vmem:[#allocation9 + $0x84] ss:$8 sps:$4 sm:$0xff]  }
 0x295   : > { %8113 = vmatprep.subr.bf16.mxu1 %v8832_v39 }
 0x298   : > { %8068 = vmatmul.mubr.msk.bf16.gmra.mrb[20].mxu0 %vm2668_vm2, %v2643_v8  ;;  %8114 = vmatpush3.bf16.msra.mxu1 %v8367_v37  ;;  %v3515_v37 = vld [vmem:[#allocation4 + $0xc] sm:$0x1] }
 0x299   : > { %8115 = vmatprep.subr.bf16.mxu1 %v8832_v39  ;;  %v3516_v8 = vsel %vm3514_vm5, 0, %v3515_v37  ;;  %vm10294_vm5 = vmmov %vm10292_vm1 }
 0x29a   : > { %3517 = vst [vmem:[#allocation4 + $0xc] sm:$0x1] %v3516_v8 }
 0x29b   : > { %8104 = vmatmul.mubr.msk.bf16.gmra.mrb[24].mxu1 %vm2668_vm2, %v2839_v56 }
 0x29c   : > { %8116 = vmatpush3.bf16.msra.mxu1 %v8368_v41  ;;  %8107 = vmatprep.mubr.msk.bf16.mxu1 %vm10256_vm0, %v8832_v39  ;;  %v8378_v41 = vld [vmem:[#allocation9 + $0x90] ss:$8 sps:$4 sm:$0xff]  }
 0x29d   : > { %8117 = vmatprep.subr.bf16.mxu1 %v8832_v39 }
 0x2a0   : > { %8118 = vmatpush3.bf16.msra.mxu1 %v8369_v13 }
 0x2a1   : > { %8131 = vmatprep.subr.bf16.mxu1 %v8832_v39 }
 0x2a3   : > { %8108 = vmatmul.mubr.msk.bf16.gmra.mrb[28].mxu1 %vm2668_vm2, %v2841_v44  ;;  %v8383_v44 = vld [vmem:[#allocation9 + $0xa4] ss:$8 sps:$4 sm:$0xff]  }
 0x2a4   : > { %8119 = vmatprep.mubr.msk.bf16.mxu1 %vm10256_vm0, %v8832_v39 }
 0x2ab   : > { %8120 = vmatmul.mubr.msk.bf16.vlgmr.msra.gmra.mrb[32].mxu1 %vm2668_vm2, %v2962_v48  ;;  %v8386_v48 = vld [vmem:[#allocation9 + $0xb4] ss:$8 sps:$4 sm:$0xff]  }
 0x2ac   : > { %8132 = vmatpush3.bf16.msra.mxu1 %v8370_v55  ;;  %8123 = vmatprep.mubr.msk.bf16.mxu1 %vm10256_vm0, %v8832_v39 }
 0x2ad   : > { %8133 = vmatprep.subr.bf16.mxu1 %v8832_v39 }
 0x2b0   : > { %8134 = vmatpush3.bf16.msra.mxu1 %v8371_v35 }
 0x2b1   : > { %8135 = vmatprep.subr.bf16.mxu1 %v8832_v39 }
 0x2b3   : > { %8124 = vmatmul.mubr.msk.bf16.gmra.mrb[36].mxu1 %vm2668_vm2, %v2966_v0  ;;  %v8389_v0 = vld [vmem:[#allocation9 + $0xc4] ss:$8 sps:$4 sm:$0xff]  }
 0x2b4   : > { %8136 = vmatpush3.bf16.msra.mxu1 %v8372_v46  ;;  %8127 = vmatprep.mubr.msk.bf16.mxu1 %vm10256_vm0, %v8832_v39 }
 0x2b5   : > { %8137 = vmatprep.subr.bf16.mxu1 %v8832_v39 }
 0x2b8   : > { %8138 = vmatpush3.bf16.msra.mxu1 %v8374_v16  ;;  %v8387_v16 = vld [vmem:[#allocation9 + $0xc0] ss:$8 sps:$4 sm:$0xff]  }
 0x2b9   : > { %3820 = vmatprep.subr.bf16.mxu1 %v8377_v31 }
 0x2bb   : > { %8128 = vmatmul.mubr.msk.bf16.gmra.mrb[40].mxu1 %vm2668_vm2, %v2975_v45  ;;  %v8392_v45 = vld [vmem:[#allocation9 + $0xd4] ss:$8 sps:$4 sm:$0xff]  }
 0x2bc   : > { %8139 = vmatprep.mubr.msk.bf16.mxu1 %vm10256_vm0, %v8832_v39 }
 0x2c3   : > { %8140 = vmatmul.mubr.msk.bf16.vlgmr.msra.gmra.mrb[44].mxu1 %vm2668_vm2, %v9778_v19 }
 0x2c4   : > { %8143 = vmatprep.mubr.msk.bf16.mxu1 %vm10256_vm0, %v8832_v39  ;;  %3821 = vmatpush1.bf16.msra.mxu1 %v8375_v17 }
 0x2c5   : > { %3822 = vmatprep.subr.bf16.mxu1 %v8380_v10 }
 0x2c8   : > { %3823 = vmatpush1.bf16.msra.mxu1 %v8378_v41 }
 0x2c9   : > { %3824 = vmatprep.subr.bf16.mxu1 %v8383_v44 }
 0x2cb   : > { %8144 = vmatmul.mubr.msk.bf16.gmra.mrb[48].mxu1 %vm2668_vm2, %v3089_v14 }
 0x2cc   : > { %8147 = vmatprep.mubr.msk.bf16.mxu1 %vm10256_vm0, %v8832_v39  ;;  %3825 = vmatpush1.bf16.msra.mxu1 %v8381_v6  ;;  %vm10296_vm0 = vmmov %vm10292_vm1 }
 0x2cd   : > { %3826 = vmatprep.subr.bf16.mxu1 %v8386_v48 }
 0x2d0   : > { %3827 = vmatpush1.bf16.msra.mxu1 %v8384_v5 }
 0x2d1   : > { %3828 = vmatprep.subr.bf16.mxu1 %v8389_v0 }
 0x2d3   : > { %8148 = vmatmul.mubr.msk.bf16.gmra.mrb[52].mxu1 %vm2668_vm2, %v3091_v32  ;;  %vm9853_vm2 = vmand %vm10255_vm3, %vm3508_vm14  ;;  %v8395_v32 = vld [vmem:[#allocation9 + $0xe4] ss:$8 sps:$4 sm:$0xff]  }
 0x2d4   : > { %3852 = vmatprep.mubr.bf16.mxu1 %v8831_v3  ;;  %v3511_v59 = vsel %vm9853_vm2, 0, %v3510_v47  ;;  %3829 = vmatpush1.bf16.msra.mxu1 %v8387_v16  ;;  %vm10293_vm14 = vmmov %vm10292_vm1 }
 0x2d5   : > { %3512 = vst [vmem:[#allocation4] sm:$0x1] %v3511_v59  ;;  %3830 = vmatprep.subr.bf16.mxu1 %v8392_v45  ;;  %vm10295_vm3 = vmmov %vm10292_vm1 }
 0x2d8   : > { %3831 = vmatpush1.bf16.msra.mxu1 %v8390_v23 }
 0x2d9   : > { %3832 = vmatprep.subr.bf16.mxu1 %v8395_v32 }
 0x339   : > { %v2799_v19 = vpop.f32.mrb[8].mxu1 }
 0x33a   : > { %v8081_v58 = vpop.f32.mrb[9].mxu1 }
 0x33b   : > { %v2802_v22 = vpop.f32.mrb[10].mxu1 }
 0x33c   : > { %v8082_v20 = vpop.f32.mrb[11].mxu1 }
 0x341   : > { %v2807_v36 = vpop.f32.mrb[12].mxu1 }
 0x342   : > { %v8085_v60 = vpop.f32.mrb[13].mxu1 }
 0x343   : > { %v2810_v28 = vpop.f32.mrb[14].mxu1 }
 0x344   : > { %v8086_v21 = vpop.f32.mrb[15].mxu1 }
 0x346   : > { %v2712_v18 = vpop.f32.mrb[12].mxu0 }
 0x347   : > { %v2800_v62 = vadd.f32 %v2799_v19, %v2712_v18  ;;  %v8061_v34 = vpop.f32.mrb[13].mxu0  ;;  %v8393_v19 = vld [vmem:[#allocation9 + $0xe0] ss:$8 sps:$4 sm:$0xff]   ;;  %v8396_v18 = vld [vmem:[#allocation9 + $0xf0] ss:$8 sps:$4 sm:$0xff]  }
 0x348   : > { %v2715_v38 = vpop.f32.mrb[14].mxu0  ;;  %3833 = vmatpush1.bf16.msra.mxu1 %v8393_v19 }
 0x349   : > { %v2803_v29 = vadd.f32 %v2802_v22, %v2715_v38  ;;  %v8062_v25 = vpop.f32.mrb[15].mxu0  ;;  %v8398_v22 = vld [vmem:[#allocation9 + $0xf4] ss:$8 sps:$4 sm:$0xff]  }
 0x34a   : > { %3834 = vmatprep.subr.bf16.mxu1 %v8398_v22 }
 0x34c   : > { %3835 = vmatpush1.bf16.msra.mxu1 %v8396_v18 }
 0x35e   : > { %v2815_v30 = vpop.f32.mrb[16].mxu1 }
 0x35f   : > { %v8089_v63 = vpop.f32.mrb[17].mxu1 }
 0x360   : > { %v2818_v61 = vpop.f32.mrb[18].mxu1 }
 0x361   : > { %v8090_v26 = vpop.f32.mrb[19].mxu1 }
 0x363   : > { %v2720_v57 = vpop.f32.mrb[16].mxu0 }
 0x364   : > { %v2808_v56 = vadd.f32 %v2807_v36, %v2720_v57  ;;  %v8065_v13 = vpop.f32.mrb[17].mxu0 }
 0x365   : > { %v2723_v51 = vpop.f32.mrb[18].mxu0 }
 0x366   : > { %v2811_v52 = vadd.f32 %v2810_v28, %v2723_v51  ;;  %v8066_v9 = vpop.f32.mrb[19].mxu0  ;;  %v2909_v7 = vpop.f32.mrb[20].mxu1  ;;  %v9870_v51 = vld [vmem:[%s10233_s4] ss:$0 sm:$0xff] }
 0x367   : > { %v2932_v11 = vadd.f32 %v2909_v7, %v2800_v62  ;;  %v8101_v15 = vpop.f32.mrb[21].mxu1  ;;  %v8401_v62 = vld [vmem:[#allocation9 + $0x4] ss:$8 sps:$4 sm:$0xff]  }
 0x368   : > { %v2912_v50 = vpop.f32.mrb[22].mxu1  ;;  %3954 = vmatprep.subr.bf16.mxu1 %v8401_v62 }
 0x369   : > { %v2933_v42 = vadd.f32 %v2912_v50, %v2803_v29  ;;  %v8102_v55 = vpop.f32.mrb[23].mxu1 }
 0x36b   : > { %v2728_v4 = vpop.f32.mrb[20].mxu0 }
 0x36c   : > { %v2816_v35 = vadd.f32 %v2815_v30, %v2728_v4  ;;  %v8069_v49 = vpop.f32.mrb[21].mxu0 }
 0x36d   : > { %v2731_v24 = vpop.f32.mrb[22].mxu0 }
 0x36e   : > { %v2819_v46 = vadd.f32 %v2818_v61, %v2731_v24  ;;  %v8070_v27 = vpop.f32.mrb[23].mxu0  ;;  %v2917_v54 = vpop.f32.mrb[24].mxu1 }
 0x36f   : > { %v2934_v2 = vadd.f32 %v2917_v54, %v2808_v56  ;;  %v8105_v43 = vpop.f32.mrb[25].mxu1 }
 0x370   : > { %v2920_v33 = vpop.f32.mrb[26].mxu1 }
 0x371   : > { %v2935_v53 = vadd.f32 %v2920_v33, %v2811_v52  ;;  %v8106_v14 = vpop.f32.mrb[27].mxu1 }
 0x376   : > { %v2925_v58 = vpop.f32.mrb[28].mxu1 }
 0x377   : > { %v2936_v20 = vadd.f32 %v2925_v58, %v2816_v35  ;;  %v8109_v36 = vpop.f32.mrb[29].mxu1 }
 0x378   : > { %v2928_v60 = vpop.f32.mrb[30].mxu1 }
 0x379   : > { %v2937_v28 = vadd.f32 %v2928_v60, %v2819_v46  ;;  %v8110_v21 = vpop.f32.mrb[31].mxu1 }
 0x37e   : > { %v3043_v34 = vpop.f32.mrb[32].mxu1 }
 0x37f   : > { %v3066_v38 = vadd.f32 %v3043_v34, %v2932_v11  ;;  %v8121_v29 = vpop.f32.mrb[33].mxu1 }
 0x380   : > { %v3046_v25 = vpop.f32.mrb[34].mxu1 }
 0x381   : > { %v3067_v47 = vadd.f32 %v3046_v25, %v2933_v42  ;;  %v8122_v59 = vpop.f32.mrb[35].mxu1 }
 0x386   : > { %v3051_v30 = vpop.f32.mrb[36].mxu1 }
 0x387   : > { %v3068_v31 = vadd.f32 %v3051_v30, %v2934_v2  ;;  %v8125_v63 = vpop.f32.mrb[37].mxu1 }
 0x388   : > { %v3054_v17 = vpop.f32.mrb[38].mxu1 }
 0x389   : > { %v9861_v61 = vadd.f32 %v3054_v17, %v2935_v53  ;;  %v8126_v26 = vpop.f32.mrb[39].mxu1 }
 0x38e   : > { %v3059_v37 = vpop.f32.mrb[40].mxu1 }
 0x38f   : > { %v9863_v10 = vadd.f32 %v3059_v37, %v2936_v20  ;;  %v8129_v57 = vpop.f32.mrb[41].mxu1 }
 0x390   : > { %v3062_v8 = vpop.f32.mrb[42].mxu1 }
 0x391   : > { %v9865_v41 = vadd.f32 %v3062_v8, %v2937_v28  ;;  %v8130_v56 = vpop.f32.mrb[43].mxu1 }
 0x396   : > { %v3159_v13 = vpop.f32.mrb[44].mxu1 }
 0x397   : > { %v3182_v52 = vadd.f32 %v3159_v13, %v3066_v38  ;;  %v8141_v9 = vpop.f32.mrb[45].mxu1 }
 0x398   : > { %v3162_v7 = vpop.f32.mrb[46].mxu1 }
 0x399   : > { %v3195_v44 = vadd.f32 %v9870_v51, %v3182_v52  ;;  %v3183_v11 = vadd.f32 %v3162_v7, %v3067_v47  ;;  %v8142_v15 = vpop.f32.mrb[47].mxu1 }
 0x39b   : > { %v3201_v6 = vmax.f32 %v3195_v44, 0.0  ;;  %v3196_v50 = vadd.f32 %v9870_v51, %v3183_v11 }
 0x39d   : > { %v3213_v42 = vcombine.high %v3201_v6, %v3201_v6  ;;  %v3220_v55 = vrot.slane %v3201_v6, %v9487_v12  ;;  %v3202_v48 = vmax.f32 %v3196_v50, 0.0 }
 0x39e   : > { %v3167_v4 = vpop.f32.mrb[48].mxu1 }
 0x39f   : > { %v3227_v5 = vrot.slane %v3213_v42, %v9487_v12  ;;  %v3228_v35 = vcombine.high %v3220_v55, %v3220_v55  ;;  %v3339_v49 = vsel %vm10292_vm1, %v3220_v55, -inf  ;;  %v3230_v24 = vcombine.high %v3202_v48, %v3202_v48  ;;  %v8145_v46 = vpop.f32.mrb[49].mxu1 }
 0x3a0   : > { %v3340_v27 = vrot.slane %v3339_v49, 4  ;;  %v3237_v54 = vrot.slane %v3202_v48, %v9487_v12  ;;  %v9878_v0 = vadd.f32 %v3167_v4, %v3068_v31  ;;  %v9880_v2 = vpop.f32.mrb[50].mxu1 }
 0x3a1   : > { %v3229_v43 = vcombine.high %v3227_v5, %v3227_v5  ;;  %v3346_v16 = vsel %vm10293_vm14, %v3228_v35, -inf  ;;  %v3353_v33 = vsel %vm10294_vm5, %v3227_v5, -inf  ;;  %v3244_v45 = vrot.slane %v3230_v24, %v9487_v12  ;;  %v8146_v53 = vpop.f32.mrb[51].mxu1  ;;  %vm10297_vm14 = vmmov %vm10296_vm0 }
 0x3a2   : > { %v3341_v14 = vmax.f32 %v3339_v49, %v3340_v27  ;;  %v3347_v23 = vrot.slane %v3346_v16, 4  ;;  %v3354_v32 = vrot.slane %v3353_v33, 4  ;;  %v3245_v19 = vcombine.high %v3237_v54, %v3237_v54  ;;  %vm10298_vm5 = vmmov %vm10296_vm0 }
 0x3a3   : > { %v3360_v58 = vsel %vm10292_vm1, %v3229_v43, -inf  ;;  %v3246_v22 = vcombine.high %v3244_v45, %v3244_v45  ;;  %v3367_v20 = vsel %vm10295_vm3, %v3237_v54, -inf  ;;  %v3381_v36 = vsel %vm10296_vm0, %v3244_v45, -inf  ;;  %vm10299_vm3 = vmmov %vm10296_vm0 }
 0x3a4   : > { %v3342_v60 = vrot.slane %v3341_v14, 2  ;;  %v3348_v28 = vmax.f32 %v3346_v16, %v3347_v23  ;;  %v3355_v21 = vmax.f32 %v3353_v33, %v3354_v32  ;;  %v3361_v18 = vrot.slane %v3360_v58, 4  ;;  %vm10300_vm1 = vmmov %vm10296_vm0 }
 0x3a5   : > { %v3368_v62 = vrot.slane %v3367_v20, 4  ;;  %v3374_v34 = vsel %vm10297_vm14, %v3245_v19, -inf  ;;  %v3382_v38 = vrot.slane %v3381_v36, 4  ;;  %v3388_v29 = vsel %vm10298_vm5, %v3246_v22, -inf  ;;  %vm10301_vm14 = vmmov %vm10296_vm0 }
 0x3a6   : > { %v3343_v25 = vmax.f32 %v3341_v14, %v3342_v60  ;;  %v3349_v47 = vrot.slane %v3348_v28, 2  ;;  %v3356_v59 = vrot.slane %v3355_v21, 2  ;;  %v3362_v30 = vmax.f32 %v3360_v58, %v3361_v18  ;;  %v9890_v31 = vpop.f32.mrb[52].mxu1  ;;  %vm10302_vm5 = vmmov %vm10296_vm0 }
 0x3a7   : > { %v3369_v63 = vmax.f32 %v3367_v20, %v3368_v62  ;;  %v3375_v17 = vrot.slane %v3374_v34, 4  ;;  %v3383_v26 = vmax.f32 %v3381_v36, %v3382_v38  ;;  %v3389_v37 = vrot.slane %v3388_v29, 4  ;;  %v8149_v57 = vpop.f32.mrb[53].mxu1 }
 0x3a8   : > { %v3344_v8 = vrot.slane %v3343_v25, 1  ;;  %v3350_v56 = vmax.f32 %v3348_v28, %v3349_v47  ;;  %v3357_v13 = vmax.f32 %v3355_v21, %v3356_v59  ;;  %v3363_v52 = vrot.slane %v3362_v30, 2  ;;  %v3178_v9 = vpop.f32.mrb[54].mxu1 }
 0x3a9   : > { %v3370_v7 = vrot.slane %v3369_v63, 2  ;;  %v3376_v44 = vmax.f32 %v3374_v34, %v3375_v17  ;;  %v3384_v11 = vrot.slane %v3383_v26, 2  ;;  %v3390_v15 = vmax.f32 %v3388_v29, %v3389_v37  ;;  %v8150_v6 = vpop.f32.mrb[55].mxu1 }
 0x3aa   : > { %v3345_v50 = vmax.f32 %v3343_v25, %v3344_v8  ;;  %v3351_v42 = vrot.slane %v3350_v56, 1  ;;  %v3358_v55 = vrot.slane %v3357_v13, 1  ;;  %v3364_v48 = vmax.f32 %v3362_v30, %v3363_v52 }
 0x3ab   : > { %v3371_v4 = vmax.f32 %v3369_v63, %v3370_v7  ;;  %v3377_v5 = vrot.slane %v3376_v44, 2  ;;  %v3385_v35 = vmax.f32 %v3383_v26, %v3384_v11  ;;  %v3391_v49 = vrot.slane %v3390_v15, 2 }
 0x3ac   : > { %v3352_v24 = vmax.f32 %v3350_v56, %v3351_v42  ;;  %v3359_v46 = vmax.f32 %v3357_v13, %v3358_v55  ;;  %v3365_v27 = vrot.slane %v3364_v48, 1  ;;  %v7559_v54 = vpack.c.bf16 %v3345_v50, %v3345_v50 }
 0x3ad   : > { %v3372_v43 = vrot.slane %v3371_v4, 1  ;;  %v3378_v16 = vmax.f32 %v3376_v44, %v3377_v5  ;;  %v3386_v33 = vrot.slane %v3385_v35, 1  ;;  %v3392_v45 = vmax.f32 %v3390_v15, %v3391_v49 }
 0x3ae   : > { %v3366_v53 = vmax.f32 %v3364_v48, %v3365_v27  ;;  %v7560_v14 = vpack.c.bf16 %v3352_v24, %v3352_v24  ;;  %v7561_v23 = vpack.c.bf16 %v3359_v46, %v3359_v46  ;;  %v3614_v32 = vunpack.c.l.b16 %v7559_v54 }
 0x3af   : > { %v3373_v19 = vmax.f32 %v3371_v4, %v3372_v43  ;;  %v3379_v58 = vrot.slane %v3378_v16, 1  ;;  %v3387_v22 = vmax.f32 %v3385_v35, %v3386_v33  ;;  %v3393_v20 = vrot.slane %v3392_v45, 1 }
 0x3b0   : > { %v7562_v36 = vpack.c.bf16 %v3366_v53, %v3366_v53  ;;  %v3615_v60 = vunpack.c.l.b16 %v7560_v14  ;;  %v3616_v28 = vunpack.c.l.b16 %v7561_v23  ;;  %v3197_v21 = vadd.f32 %v9870_v51, %v9878_v0 }
 0x3b1   : > { %v3380_v18 = vmax.f32 %v3378_v16, %v3379_v58  ;;  %v3394_v62 = vmax.f32 %v3392_v45, %v3393_v20  ;;  %v7563_v34 = vpack.c.bf16 %v3373_v19, %v3373_v19  ;;  %v7565_v38 = vpack.c.bf16 %v3387_v22, %v3387_v22 }
 0x3b2   : > { %v3617_v29 = vunpack.c.l.b16 %v7562_v36  ;;  %v3638_v25 = vsel %vm2515_vm13, %v3615_v60, %v3614_v32  ;;  %v3203_v47 = vmax.f32 %v3197_v21, 0.0  ;;  %v3185_v59 = vadd.f32 %v9880_v2, %v9861_v61 }
 0x3b3   : > { %v3639_v30 = vsel %vm2503_vm6, %v3616_v28, %v3638_v25  ;;  %v7564_v63 = vpack.c.bf16 %v3380_v18, %v3380_v18  ;;  %v3618_v17 = vunpack.c.l.b16 %v7563_v34  ;;  %v7566_v26 = vpack.c.bf16 %v3394_v62, %v3394_v62 }
 0x3b4   : > { %v3640_v37 = vsel %vm2505_vm7, %v3617_v29, %v3639_v30  ;;  %v3247_v57 = vcombine.high %v3203_v47, %v3203_v47  ;;  %v3254_v0 = vrot.slane %v3203_v47, %v9487_v12  ;;  %v3620_v56 = vunpack.c.l.b16 %v7565_v38 }
 0x3b5   : > { %v3619_v8 = vunpack.c.l.b16 %v7564_v63  ;;  %v3641_v13 = vsel %vm2507_vm8, %v3618_v17, %v3640_v37  ;;  %v3198_v52 = vadd.f32 %v9870_v51, %v3185_v59  ;;  %v3186_v2 = vadd.f32 %v9890_v31, %v9863_v10 }
 0x3b6   : > { %v3261_v7 = vrot.slane %v3247_v57, %v9487_v12  ;;  %v3262_v44 = vcombine.high %v3254_v0, %v3254_v0  ;;  %v3395_v61 = vsel %vm10296_vm0, %v3254_v0, -inf  ;;  %v9908_v50 = vadd.f32 %v3178_v9, %v9865_v41 }
 0x3b7   : > { %v3642_v11 = vsel %vm2509_vm9, %v3619_v8, %v3641_v13  ;;  %v3396_v15 = vrot.slane %v3395_v61, 4  ;;  %v3204_v6 = vmax.f32 %v3198_v52, 0.0  ;;  %v3621_v5 = vunpack.c.l.b16 %v7566_v26 }
 0x3b8   : > { %v9911_v42 = vsel %vm2511_vm12, %v3620_v56, %v3642_v11  ;;  %v3263_v55 = vcombine.high %v3261_v7, %v3261_v7  ;;  %v3402_v48 = vsel %vm10299_vm3, %v3262_v44, -inf  ;;  %v3409_v4 = vsel %vm10300_vm1, %v3261_v7, -inf  ;;  %vm10303_vm3 = vmmov %vm10296_vm0 }
 0x3b9   : > { %v3397_v35 = vmax.f32 %v3395_v61, %v3396_v15  ;;  %v3403_v49 = vrot.slane %v3402_v48, 4  ;;  %v3410_v24 = vrot.slane %v3409_v4, 4  ;;  %v3264_v31 = vcombine.high %v3204_v6, %v3204_v6  ;;  %vm10304_vm1 = vmmov %vm10296_vm0 }
 0x3ba   : > { %v3416_v10 = vsel %vm10301_vm14, %v3263_v55, -inf  ;;  %v3271_v46 = vrot.slane %v3204_v6, %v9487_v12  ;;  %v3199_v41 = vadd.f32 %v9870_v51, %v3186_v2  ;;  %vm3666_vm14 = vcmask 1043456  }
 0x3bb   : > { %v3398_v9 = vrot.slane %v3397_v35, 2  ;;  %v3404_v27 = vmax.f32 %v3402_v48, %v3403_v49  ;;  %v3411_v54 = vmax.f32 %v3409_v4, %v3410_v24  ;;  %v3417_v43 = vrot.slane %v3416_v10, 4 }
 0x3bc   : > { %v3278_v16 = vrot.slane %v3264_v31, %v9487_v12  ;;  %v3279_v33 = vcombine.high %v3271_v46, %v3271_v46  ;;  %v3423_v45 = vsel %vm10302_vm5, %v3271_v46, -inf  ;;  %v3205_v53 = vmax.f32 %v3199_v41, 0.0  ;;  %vm10305_vm5 = vmmov %vm10296_vm0 }
 0x3bd   : > { %v3399_v14 = vmax.f32 %v3397_v35, %v3398_v9  ;;  %v3405_v23 = vrot.slane %v3404_v27, 2  ;;  %v3412_v32 = vrot.slane %v3411_v54, 2  ;;  %v3418_v19 = vmax.f32 %v3416_v10, %v3417_v43 }
 0x3be   : > { %v3280_v58 = vcombine.high %v3278_v16, %v3278_v16  ;;  %v3424_v22 = vrot.slane %v3423_v45, 4  ;;  %v3430_v20 = vsel %vm10296_vm0, %v3279_v33, -inf  ;;  %v3437_v36 = vsel %vm10303_vm3, %v3278_v16, -inf  ;;  %vm10306_vm3 = vmmov %vm10296_vm0 }
 0x3bf   : > { %v3400_v60 = vrot.slane %v3399_v14, 1  ;;  %v3406_v28 = vmax.f32 %v3404_v27, %v3405_v23  ;;  %v3413_v21 = vmax.f32 %v3411_v54, %v3412_v32  ;;  %v3419_v18 = vrot.slane %v3418_v19, 2 }
 0x3c0   : > { %v3425_v62 = vmax.f32 %v3423_v45, %v3424_v22  ;;  %v3431_v34 = vrot.slane %v3430_v20, 4  ;;  %v3438_v38 = vrot.slane %v3437_v36, 4  ;;  %v3444_v29 = vsel %vm10304_vm1, %v3280_v58, -inf  ;;  %vm10307_vm1 = vmmov %vm10296_vm0 }
 0x3c1   : > { %v3401_v25 = vmax.f32 %v3399_v14, %v3400_v60  ;;  %v3407_v47 = vrot.slane %v3406_v28, 1  ;;  %v3414_v59 = vrot.slane %v3413_v21, 1  ;;  %v3420_v30 = vmax.f32 %v3418_v19, %v3419_v18 }
 0x3c2   : > { %v3426_v63 = vrot.slane %v3425_v62, 2  ;;  %v3432_v17 = vmax.f32 %v3430_v20, %v3431_v34  ;;  %v3439_v26 = vmax.f32 %v3437_v36, %v3438_v38  ;;  %v3445_v37 = vrot.slane %v3444_v29, 4 }
 0x3c3   : > { %v3408_v57 = vmax.f32 %v3406_v28, %v3407_v47  ;;  %v3415_v0 = vmax.f32 %v3413_v21, %v3414_v59  ;;  %v3421_v8 = vrot.slane %v3420_v30, 1  ;;  %v7567_v56 = vpack.c.bf16 %v3401_v25, %v3401_v25 }
 0x3c4   : > { %v3427_v13 = vmax.f32 %v3425_v62, %v3426_v63  ;;  %v3433_v52 = vrot.slane %v3432_v17, 2  ;;  %v3440_v7 = vrot.slane %v3439_v26, 2  ;;  %v3446_v44 = vmax.f32 %v3444_v29, %v3445_v37 }
 0x3c5   : > { %v3422_v61 = vmax.f32 %v3420_v30, %v3421_v8  ;;  %v7568_v2 = vpack.c.bf16 %v3408_v57, %v3408_v57  ;;  %v7569_v11 = vpack.c.bf16 %v3415_v0, %v3415_v0  ;;  %v3622_v15 = vunpack.c.l.b16 %v7567_v56  ;;  %v3668_v30 = vld [vmem:[#allocation4] sm:$0xf] }
 0x3c6   : > { %v3428_v6 = vrot.slane %v3427_v13, 1  ;;  %v3434_v55 = vmax.f32 %v3432_v17, %v3433_v52  ;;  %v3441_v48 = vmax.f32 %v3439_v26, %v3440_v7  ;;  %v3447_v4 = vrot.slane %v3446_v44, 2 }
 0x3c7   : > { %v7570_v35 = vpack.c.bf16 %v3422_v61, %v3422_v61  ;;  %v3623_v49 = vunpack.c.l.b16 %v7568_v2  ;;  %v3624_v24 = vunpack.c.l.b16 %v7569_v11  ;;  %v3644_v10 = vsel %vm2513_vm10, %v3622_v15, %v3621_v5 }
 0x3c8   : > { %v3429_v31 = vmax.f32 %v3427_v13, %v3428_v6  ;;  %v3435_v46 = vrot.slane %v3434_v55, 1  ;;  %v3442_v41 = vrot.slane %v3441_v48, 1  ;;  %v3448_v9 = vmax.f32 %v3446_v44, %v3447_v4 }
 0x3c9   : > { %v3625_v27 = vunpack.c.l.b16 %v7570_v35  ;;  %v3645_v54 = vsel %vm2515_vm13, %v3623_v49, %v3644_v10  ;;  %v3281_v43 = vcombine.high %v3205_v53, %v3205_v53  ;;  %v3288_v16 = vrot.slane %v3205_v53, %v9487_v12 }
 0x3ca   : > { %v3646_v33 = vsel %vm2503_vm6, %v3624_v24, %v3645_v54  ;;  %v3436_v45 = vmax.f32 %v3434_v55, %v3435_v46  ;;  %v3443_v14 = vmax.f32 %v3441_v48, %v3442_v41  ;;  %v7571_v23 = vpack.c.bf16 %v3429_v31, %v3429_v31 }
 0x3cb   : > { %v3647_v32 = vsel %vm2505_vm7, %v3625_v27, %v3646_v33  ;;  %v3295_v5 = vrot.slane %v3281_v43, %v9487_v12  ;;  %v3296_v19 = vcombine.high %v3288_v16, %v3288_v16  ;;  %v3449_v58 = vrot.slane %v3448_v9, 1 }
 0x3cc   : > { %v7572_v22 = vpack.c.bf16 %v3436_v45, %v3436_v45  ;;  %v7573_v20 = vpack.c.bf16 %v3443_v14, %v3443_v14  ;;  %v3451_v36 = vsel %vm10305_vm5, %v3288_v16, -inf  ;;  %v3626_v60 = vunpack.c.l.b16 %v7571_v23  ;;  %vm3667_vm5 = vmand %vm3666_vm14, %vm3513_vm4 }
 0x3cd   : > { %v3297_v28 = vcombine.high %v3295_v5, %v3295_v5  ;;  %v3452_v21 = vrot.slane %v3451_v36, 4  ;;  %v3458_v53 = vsel %vm10296_vm0, %v3296_v19, -inf  ;;  %v3658_v18 = vpack.c.b16 %v9911_v42, %v9911_v42  ;;  %vm10308_vm4 = vmmov %vm10296_vm0 }
 0x3ce   : > { %v3627_v62 = vunpack.c.l.b16 %v7572_v22  ;;  %v3628_v34 = vunpack.c.l.b16 %v7573_v20  ;;  %v3459_v38 = vrot.slane %v3458_v53, 4  ;;  %v3648_v29 = vsel %vm2507_vm8, %v3626_v60, %v3647_v32  ;;  %vm10309_vm14 = vmmov %vm10296_vm0 }
 0x3cf   : > { %v3453_v25 = vmax.f32 %v3451_v36, %v3452_v21  ;;  %v3465_v47 = vsel %vm10306_vm3, %v3295_v5, -inf  ;;  %v3472_v59 = vsel %vm10307_vm1, %v3297_v28, -inf  ;;  %v3450_v63 = vmax.f32 %v3448_v9, %v3449_v58  ;;  %vm10310_vm3 = vmmov %vm10296_vm0 }
 0x3d0   : > { %v3649_v17 = vsel %vm2509_vm9, %v3627_v62, %v3648_v29  ;;  %v3460_v26 = vmax.f32 %v3458_v53, %v3459_v38  ;;  %v3466_v37 = vrot.slane %v3465_v47, 4  ;;  %v3473_v0 = vrot.slane %v3472_v59, 4  ;;  %vm10314_vm1 = vmmov %vm10296_vm0 }
 0x3d1   : > { %v3650_v42 = vsel %vm2511_vm12, %v3628_v34, %v3649_v17  ;;  %v3454_v57 = vrot.slane %v3453_v25, 2  ;;  %v3200_v8 = vadd.f32 %v9870_v51, %v9908_v50  ;;  %v3669_v7 = vsel %vm3667_vm5, %v3658_v18, %v3668_v30  ;;  %vm10315_vm5 = vmmov %vm10296_vm0 }
 0x3d2   : > { %v3659_v56 = vpack.c.b16 %v3650_v42, %v3650_v42  ;;  %v3461_v13 = vrot.slane %v3460_v26, 2  ;;  %v3467_v52 = vmax.f32 %v3465_v47, %v3466_v37  ;;  %v3474_v61 = vmax.f32 %v3472_v59, %v3473_v0  ;;  %3670 = vst [vmem:[#allocation4] sm:$0xf] %v3669_v7 }
 0x3d3   : > { %v3455_v44 = vmax.f32 %v3453_v25, %v3454_v57  ;;  %v3206_v2 = vmax.f32 %v3200_v8, 0.0  ;;  %v7574_v11 = vpack.c.bf16 %v3450_v63, %v3450_v63 }
 0x3d4   : > { %3671 = vst [vmem:[#allocation4 + $0x4] sm:$0xf] %v3659_v56  ;;  %v3462_v15 = vmax.f32 %v3460_v26, %v3461_v13  ;;  %v3468_v6 = vrot.slane %v3467_v52, 2  ;;  %v3475_v48 = vrot.slane %v3474_v61, 2 }
 0x3d5   : > { %v3456_v55 = vrot.slane %v3455_v44, 1  ;;  %v3298_v4 = vcombine.high %v3206_v2, %v3206_v2  ;;  %v3305_v35 = vrot.slane %v3206_v2, %v9487_v12  ;;  %v3629_v46 = vunpack.c.l.b16 %v7574_v11 }
 0x3d6   : > { %v3463_v49 = vrot.slane %v3462_v15, 1  ;;  %v3469_v24 = vmax.f32 %v3467_v52, %v3468_v6  ;;  %v3476_v50 = vmax.f32 %v3474_v61, %v3475_v48 }
 0x3d7   : > { %v3457_v51 = vmax.f32 %v3455_v44, %v3456_v55  ;;  %v3312_v10 = vrot.slane %v3298_v4, %v9487_v12  ;;  %v3313_v31 = vcombine.high %v3305_v35, %v3305_v35  ;;  %v3479_v27 = vsel %vm10308_vm4, %v3305_v35, -inf  ;;  %vm10316_vm4 = vmmov %vm10296_vm0 }
 0x3d8   : > { %v3464_v41 = vmax.f32 %v3462_v15, %v3463_v49  ;;  %v3470_v9 = vrot.slane %v3469_v24, 1  ;;  %v3477_v54 = vrot.slane %v3476_v50, 1  ;;  %v3480_v33 = vrot.slane %v3479_v27, 4  ;;  %v3673_v49 = vld [vmem:[#allocation4 + $0xc] sm:$0x1] }
 0x3d9   : > { %v7575_v43 = vpack.c.bf16 %v3457_v51, %v3457_v51  ;;  %v3314_v16 = vcombine.high %v3312_v10, %v3312_v10  ;;  %v3486_v23 = vsel %vm10309_vm14, %v3313_v31, -inf  ;;  %v3493_v32 = vsel %vm10296_vm0, %v3312_v10, -inf  ;;  %vm10317_vm14 = vmmov %vm10296_vm0 }
 0x3da   : > { %v3471_v45 = vmax.f32 %v3469_v24, %v3470_v9  ;;  %v7576_v14 = vpack.c.bf16 %v3464_v41, %v3464_v41  ;;  %v3478_v5 = vmax.f32 %v3476_v50, %v3477_v54  ;;  %v3481_v58 = vmax.f32 %v3479_v27, %v3480_v33  ;;  %v3676_v9 = vld [vmem:[#allocation4] sm:$0xf] }
 0x3db   : > { %v3630_v19 = vunpack.c.l.b16 %v7575_v43  ;;  %v3487_v22 = vrot.slane %v3486_v23, 4  ;;  %v3494_v60 = vrot.slane %v3493_v32, 4  ;;  %v3500_v28 = vsel %vm10310_vm3, %v3314_v16, -inf  ;;  %v4005_v43 = vld [vmem:[#allocation4] sm:$0xe]  ;;  %vm10318_vm3 = vmmov %vm10296_vm0 }
 0x3dc   : > { %v7577_v20 = vpack.c.bf16 %v3471_v45, %v3471_v45  ;;  %v3631_v36 = vunpack.c.l.b16 %v7576_v14  ;;  %v7578_v21 = vpack.c.bf16 %v3478_v5, %v3478_v5  ;;  %v3482_v18 = vrot.slane %v3481_v58, 2 }
 0x3dd   : > { %v3651_v53 = vsel %vm2513_vm10, %v3630_v19, %v3629_v46  ;;  %v3488_v62 = vmax.f32 %v3486_v23, %v3487_v22  ;;  %v3495_v29 = vmax.f32 %v3493_v32, %v3494_v60  ;;  %v3501_v25 = vrot.slane %v3500_v28, 4  ;;  %v3677_v46 = vld [vmem:[#allocation4 + $0x4] sm:$0xf]  ;;  %v8406_v60 = vld [vmem:[#allocation9 + $0x14] ss:$8 sps:$4 sm:$0xff]  }
 0x3de   : > { %v3632_v34 = vunpack.c.l.b16 %v7577_v20  ;;  %v3652_v38 = vsel %vm2515_vm13, %v3631_v36, %v3651_v53  ;;  %v3633_v47 = vunpack.c.l.b16 %v7578_v21  ;;  %v3483_v59 = vmax.f32 %v3481_v58, %v3482_v18  ;;  %v8399_v58 = vld [vmem:[#allocation9] ss:$8 sps:$4 sm:$0xff]   ;;  %v8404_v21 = vld [vmem:[#allocation9 + $0x10] ss:$8 sps:$4 sm:$0xff]   ;;  %v8409_v53 = vld [vmem:[#allocation9 + $0x24] ss:$8 sps:$4 sm:$0xff]  }
 0x3df   : > { %v3489_v30 = vrot.slane %v3488_v62, 2  ;;  %v3496_v17 = vrot.slane %v3495_v29, 2  ;;  %v3502_v26 = vmax.f32 %v3500_v28, %v3501_v25  ;;  %v7232_v27 = vcombine.low %v3676_v9, %v3677_v46  ;;  %v8415_v25 = vld [vmem:[#allocation9 + $0x44] ss:$8 sps:$4 sm:$0xff]   ;;  %v8461_v9 = vld [vmem:[#allocation11 + $0x90] sm:$0xff]  }
 0x3e0   : > { %v3653_v63 = vsel %vm2503_vm6, %v3632_v34, %v3652_v38  ;;  %v3484_v37 = vrot.slane %v3483_v59, 1  ;;  %v7267_v16 = vcombine.low %v4005_v43, %v3677_v46  ;;  %v8412_v38 = vld [vmem:[#allocation9 + $0x34] ss:$8 sps:$4 sm:$0xff]   ;;  %v8458_v46 = vld [vmem:[#allocation11 + $0x108] sm:$0xff]  }
 0x3e1   : > { %v3490_v42 = vmax.f32 %v3488_v62, %v3489_v30  ;;  %v3654_v57 = vsel %vm2505_vm7, %v3633_v47, %v3653_v63  ;;  %v3497_v0 = vmax.f32 %v3495_v29, %v3496_v17  ;;  %v3503_v8 = vrot.slane %v3502_v26, 2  ;;  %v8407_v62 = vld [vmem:[#allocation9 + $0x20] ss:$8 sps:$4 sm:$0xff]   ;;  %v8410_v29 = vld [vmem:[#allocation9 + $0x30] ss:$8 sps:$4 sm:$0xff]  }
 0x3e2   : > { %v3485_v56 = vmax.f32 %v3483_v59, %v3484_v37  ;;  %v3726_v54 = vshll.u32 %v7232_v27, 16  ;;  %v3724_v32 = vshrl.u32 %v7232_v27, 16  ;;  %v4026_v5 = vrot.slane %v7267_v16, 1  ;;  %v8413_v47 = vld [vmem:[#allocation9 + $0x40] ss:$8 sps:$4 sm:$0xff]   ;;  %v8464_v43 = vld [vmem:[#allocation11 + $0x158] sm:$0xff]  }
 0x3e3   : > { %v3491_v13 = vrot.slane %v3490_v42, 1  ;;  %v3498_v52 = vrot.slane %v3497_v0, 1  ;;  %v3504_v7 = vmax.f32 %v3502_v26, %v3503_v8  ;;  %v8418_v59 = vld [vmem:[#allocation9 + $0x54] ss:$8 sps:$4 sm:$0xff]   ;;  %v8416_v30 = vld [vmem:[#allocation9 + $0x50] ss:$8 sps:$4 sm:$0xff]  }
 0x3e4   : > { %v7579_v61 = vpack.c.bf16 %v3485_v56, %v3485_v56  ;;  %v3728_v23 = vrot.slane %v3726_v54, 1  ;;  %v8421_v63 = vld [vmem:[#allocation9 + $0x64] ss:$8 sps:$4 sm:$0xff]   ;;  %v8419_v17 = vld [vmem:[#allocation9 + $0x60] ss:$8 sps:$4 sm:$0xff]   ;;  %v8463_v54 = vld [vmem:[#allocation11 + $0xd8] sm:$0xff]  }
 0x3e5   : > { %v3492_v44 = vmax.f32 %v3490_v42, %v3491_v13  ;;  %v3499_v2 = vmax.f32 %v3497_v0, %v3498_v52  ;;  %v3505_v11 = vrot.slane %v3504_v7, 1  ;;  %v8424_v26 = vld [vmem:[#allocation9 + $0x74] ss:$8 sps:$4 sm:$0xff]   ;;  %v8422_v37 = vld [vmem:[#allocation9 + $0x70] ss:$8 sps:$4 sm:$0xff]  }
 0x3e6   : > { %v3634_v6 = vunpack.c.l.b16 %v7579_v61  ;;  %v3729_v22 = vor.u32 %v3728_v23, %v3724_v32  ;;  %v8427_v42 = vld [vmem:[#allocation9 + $0x104] ss:$8 sps:$4 sm:$0xff]   ;;  %v8430_v0 = vld [vmem:[#allocation9 + $0x114] ss:$8 sps:$4 sm:$0xff]   ;;  %v8428_v8 = vld [vmem:[#allocation9 + $0x110] ss:$8 sps:$4 sm:$0xff]  }
 0x3e7   : > { %v7580_v15 = vpack.c.bf16 %v3492_v44, %v3492_v44  ;;  %v3506_v55 = vmax.f32 %v3504_v7, %v3505_v11  ;;  %v7581_v48 = vpack.c.bf16 %v3499_v2, %v3499_v2  ;;  %v8434_v56 = vld [vmem:[#allocation9 + $0x124] ss:$8 sps:$4 sm:$0xff]   ;;  %v8432_v13 = vld [vmem:[#allocation9 + $0x120] ss:$8 sps:$4 sm:$0xff]   ;;  %v8437_v7 = vld [vmem:[#allocation9 + $0x134] ss:$8 sps:$4 sm:$0xff]  }
 0x3e8   : > { %v3655_v35 = vsel %vm2507_vm8, %v3634_v6, %v3654_v57  ;;  %v8425_v57 = vld [vmem:[#allocation9 + $0x100] ss:$8 sps:$4 sm:$0xff]   ;;  %v8435_v44 = vld [vmem:[#allocation9 + $0x130] ss:$8 sps:$4 sm:$0xff]   ;;  %v8440_v61 = vld [vmem:[#allocation9 + $0x144] ss:$8 sps:$4 sm:$0xff]  }
 0x3e9   : > { %v3635_v4 = vunpack.c.l.b16 %v7580_v15  ;;  %v3636_v24 = vunpack.c.l.b16 %v7581_v48  ;;  %v7583_v51 = vpack.c.bf16 %v3506_v55, %v3506_v55  ;;  %v8438_v2 = vld [vmem:[#allocation9 + $0x140] ss:$8 sps:$4 sm:$0xff]   ;;  %v8443_v11 = vld [vmem:[#allocation9 + $0x154] ss:$8 sps:$4 sm:$0xff]   ;;  %v8441_v15 = vld [vmem:[#allocation9 + $0x150] ss:$8 sps:$4 sm:$0xff]  }
 0x3ea   : > { %v8446_v6 = vld [vmem:[#allocation9 + $0x164] ss:$8 sps:$4 sm:$0xff]   ;;  %v8444_v55 = vld [vmem:[#allocation9 + $0x160] ss:$8 sps:$4 sm:$0xff]   ;;  %v8449_v48 = vld [vmem:[#allocation9 + $0x174] ss:$8 sps:$4 sm:$0xff]  }
 0x3eb   : > { %v3656_v50 = vsel %vm2509_vm9, %v3635_v4, %v3655_v35  ;;  %v3674_v31 = vsel %vm9853_vm2, %v7583_v51, %v3673_v49  ;;  %v8447_v4 = vld [vmem:[#allocation9 + $0x170] ss:$8 sps:$4 sm:$0xff]   ;;  %v8451_v35 = vld [vmem:[#allocation11 + $0xc0] sm:$0xff]   ;;  %vm10313_vm2 = vmmov %vm10296_vm0 }
 0x3ec   : > { %v3657_v10 = vsel %vm2511_vm12, %v3636_v24, %v3656_v50  ;;  %3675 = vst [vmem:[#allocation4 + $0xc] sm:$0x1] %v3674_v31  ;;  %v8452_v49 = vld [vmem:[#allocation11 + $0x140] sm:$0xff]   ;;  %7680 = vmatprep.subr.bf16.mxu0 %v8451_v35  ;;  %v8455_v50 = vld [vmem:[#allocation11 + $0xc8] sm:$0xff]  }
 0x3ed   : > { %v3660_v41 = vpack.c.b16 %v3657_v10, %v3657_v10  ;;  %v8453_v24 = vld [vmem:[#allocation11 + $0x80] sm:$0xff]   ;;  %v8456_v10 = vld [vmem:[#allocation11 + $0x148] sm:$0xff]  }
 0x3ee   : > { %v8454_v51 = vld [vmem:[#allocation11 + $0x100] sm:$0xff]   ;;  %7681 = vmatpush3.bf16.msra.mxu0 %v8453_v24  ;;  %v8457_v31 = vld [vmem:[#allocation11 + $0x88] sm:$0xff]  }
 0x3ef   : > { %3672 = vst [vmem:[#allocation4 + $0x8] sm:$0xf] %v3660_v41  ;;  %7682 = vmatprep.subr.bf16.mxu0 %v8455_v50  ;;  %v8460_v41 = vld [vmem:[#allocation11 + $0x150] sm:$0xff]  }
 0x3f2   : > { %7683 = vmatpush3.bf16.msra.mxu0 %v8457_v31 }
 0x3f3   : > { %v3695_v45 = vld [vmem:[#allocation4 + $0xc] sm:$0x1] }
 0x3f6   : > { %v9957_v33 = vld [vmem:[#allocation4 + $0x8] sm:$0xf] }
 0x3f7   : > { %v9960_v14 = vcombine.low %v9957_v33, %v3695_v45  ;;  %v7250_v52 = vcombine.low %v9957_v33, %v9957_v33  ;;  %v8465_v33 = vld [vmem:[#allocation11 + $0x98] sm:$0xff]  }
 0x3f8   : > { %v8466_v45 = vld [vmem:[#allocation11 + $0x118] sm:$0xff]  }
 0x3f9   : > { %v3731_v40 = vshll.u32 %v9960_v14, 16  ;;  %v4027_v19 = vrot.slane %v9960_v14, 1  ;;  %v3735_v18 = vshrl.u32 %v9960_v14, 16 }
 0x3fb   : > { %v3733_v20 = vrot.slane %v3731_v40, 1  ;;  %v9967_v36 = vsel %vm915_vm15, %v4026_v5, %v4027_v19  ;;  %v8467_v40 = vld [vmem:[#allocation11 + $0xe0] sm:$0xff]   ;;  %vm10312_vm15 = vmmov %vm10296_vm0 }
 0x3fc   : > { %v8468_v5 = vld [vmem:[#allocation11 + $0x160] sm:$0xff]  }
 0x3fd   : > { %v3734_v28 = vsel %vm656_vm11, %v3729_v22, %v3733_v20  ;;  %v3737_v34 = vor.u32 %v3735_v18, %v3733_v20  ;;  %v8471_v22 = vld [vmem:[#allocation11 + $0xe8] sm:$0xff]   ;;  %v8478_v18 = vld [vmem:[#allocation11 + $0x130] sm:$0xff]   ;;  %vm10311_vm11 = vmmov %vm10296_vm0 }
 0x3fe   : > { %3853 = vmatmul.mubr.bf16.vlgmr.msra.gmra.mrb[56].mxu1 %v3734_v28  ;;  %v8472_v20 = vld [vmem:[#allocation11 + $0x168] sm:$0xff]   ;;  %v8475_v28 = vld [vmem:[#allocation11 + $0xf0] sm:$0xff]  }
 0x3ff   : > { %3955 = vmatpush1.bf16.msra.mxu1 %v8399_v58  ;;  %3862 = vmatprep.mubr.bf16.mxu1 %v8831_v3  ;;  %v8470_v58 = vld [vmem:[#allocation11 + $0x120] sm:$0xff]  }
 0x400   : > { %3956 = vmatprep.subr.bf16.mxu1 %v8406_v60  ;;  %v8474_v60 = vld [vmem:[#allocation11 + $0x128] sm:$0xff]  }
 0x403   : > { %3957 = vmatpush1.bf16.msra.mxu1 %v8404_v21  ;;  %v8476_v21 = vld [vmem:[#allocation11 + $0x170] sm:$0xff]  }
 0x404   : > { %3958 = vmatprep.subr.bf16.mxu1 %v8409_v53  ;;  %v8477_v53 = vld [vmem:[#allocation11 + $0xb0] sm:$0xff]  }
 0x406   : > { %3863 = vmatmul.mubr.bf16.gmra.mrb[60].mxu1 %v3737_v34  ;;  %v8480_v34 = vld [vmem:[#allocation11 + $0x178] sm:$0xff]  }
 0x407   : > { %3959 = vmatpush1.bf16.msra.mxu1 %v8407_v62  ;;  %3986 = vmatprep.mubr.bf16.mxu1 %v8831_v3  ;;  %v8479_v62 = vld [vmem:[#allocation11 + $0xf8] sm:$0xff]  }
 0x408   : > { %3960 = vmatprep.subr.bf16.mxu1 %v8412_v38  ;;  %v8481_v38 = vld [vmem:[#allocation11 + $0xb8] sm:$0xff]  }
 0x40b   : > { %3961 = vmatpush1.bf16.msra.mxu1 %v8410_v29  ;;  %v8482_v29 = vld [vmem:[#allocation11 + $0x138] sm:$0xff]  }
 0x40c   : > { %3962 = vmatprep.subr.bf16.mxu1 %v8415_v25  ;;  %v8485_v25 = vld [vmem:[#allocation11 + $0x40] sm:$0xff]  }
 0x40f   : > { %3963 = vmatpush1.bf16.msra.mxu1 %v8413_v47  ;;  %v8488_v47 = vld [vmem:[#allocation11 + $0x240] sm:$0xff]  }
 0x410   : > { %3964 = vmatprep.subr.bf16.mxu1 %v8418_v59 }
 0x413   : > { %3965 = vmatpush1.bf16.msra.mxu1 %v8416_v30 }
 0x414   : > { %3966 = vmatprep.subr.bf16.mxu1 %v8421_v63 }
 0x417   : > { %3967 = vmatpush1.bf16.msra.mxu1 %v8419_v17 }
 0x418   : > { %3968 = vmatprep.subr.bf16.mxu1 %v8424_v26 }
 0x41b   : > { %3969 = vmatpush1.bf16.msra.mxu1 %v8422_v37 }
 0x41c   : > { %4111 = vmatprep.subr.bf16.mxu1 %v8427_v42  ;;  %v4172_v42 = vsub.s32 0, %v9478_v1 }
 0x41e   : > { %3987 = vmatmul.mubr.bf16.vlgmr.msra.gmra.mrb[56].mxu1 %v7232_v27  ;;  %v8462_v27 = vld [vmem:[#allocation11 + $0x110] sm:$0xff]  }
 0x41f   : > { %4112 = vmatpush1.bf16.msra.mxu1 %v8425_v57  ;;  %3996 = vmatprep.mubr.bf16.mxu1 %v8831_v3  ;;  %v4168_v57 = vld [vmem:[%s10235_s6] sm:$0x3] }
 0x420   : > { %4113 = vmatprep.subr.bf16.mxu1 %v8430_v0  ;;  %v4176_v0 = vsub.s32 1, %v9478_v1 }
 0x423   : > { %4114 = vmatpush1.bf16.msra.mxu1 %v8428_v8  ;;  %v4173_v8 = vrot.slane %v4168_v57, %v4172_v42 }
 0x424   : > { %4115 = vmatprep.subr.bf16.mxu1 %v8434_v56  ;;  %v9986_v56 = vrot.slane %v4168_v57, %v4176_v0 }
 0x426   : > { %3997 = vmatmul.mubr.bf16.gmra.mrb[64].mxu1 %v7250_v52 }
 0x427   : > { %4116 = vmatpush1.bf16.msra.mxu1 %v8432_v13  ;;  %4143 = vmatprep.mubr.bf16.mxu1 %v8831_v3 }
 0x428   : > { %4117 = vmatprep.subr.bf16.mxu1 %v8437_v7 }
 0x42b   : > { %4118 = vmatpush1.bf16.msra.mxu1 %v8435_v44 }
 0x42c   : > { %4119 = vmatprep.subr.bf16.mxu1 %v8440_v61 }
 0x42f   : > { %4120 = vmatpush1.bf16.msra.mxu1 %v8438_v2 }
 0x430   : > { %4121 = vmatprep.subr.bf16.mxu1 %v8443_v11 }
 0x433   : > { %4122 = vmatpush1.bf16.msra.mxu1 %v8441_v15 }
 0x434   : > { %4123 = vmatprep.subr.bf16.mxu1 %v8446_v6 }
 0x437   : > { %4124 = vmatpush1.bf16.msra.mxu1 %v8444_v55 }
 0x438   : > { %4125 = vmatprep.subr.bf16.mxu1 %v8449_v48 }
 0x43b   : > { %4126 = vmatpush1.bf16.msra.mxu1 %v8447_v4 }
 0x43c   : > { %7724 = vmatprep.subr.bf16.mxu1 %v8452_v49 }
 0x43e   : > { %4144 = vmatmul.mubr.bf16.vlgmr.msra.gmra.mrb[56].mxu1 %v9967_v36  ;;  %v8473_v36 = vld [vmem:[#allocation11 + $0xa8] sm:$0xff]  }
 0x43f   : > { %4153 = vmatprep.mubr.bf16.mxu1 %v8831_v3  ;;  %7725 = vmatpush3.bf16.msra.mxu1 %v8454_v51  ;;  %v8459_v3 = vld [vmem:[#allocation11 + $0xd0] sm:$0xff]  }
 0x440   : > { %7726 = vmatprep.subr.bf16.mxu1 %v8456_v10  ;;  %7684 = vmatprep.subr.bf16.mxu0 %v8459_v3 }
 0x441   : > { %7685 = vmatpush3.bf16.msra.mxu0 %v8461_v9 }
 0x442   : > { %7686 = vmatprep.subr.bf16.mxu0 %v8463_v54 }
 0x443   : > { %7727 = vmatpush3.bf16.msra.mxu1 %v8458_v46 }
 0x444   : > { %7728 = vmatprep.subr.bf16.mxu1 %v8460_v41 }
 0x445   : > { %7687 = vmatpush3.bf16.msra.mxu0 %v8465_v33 }
 0x446   : > { %4154 = vmatmul.mubr.bf16.gmra.mrb[68].mxu1 %v4027_v19  ;;  %v8469_v19 = vld [vmem:[#allocation11 + $0xa0] sm:$0xff]   ;;  %7688 = vmatprep.subr.bf16.mxu0 %v8467_v40 }
 0x447   : > { %7729 = vmatpush3.bf16.msra.mxu1 %v8462_v27 }
 0x448   : > { %7730 = vmatprep.subr.bf16.mxu1 %v8464_v43 }
 0x449   : > { %7689 = vmatpush3.bf16.msra.mxu0 %v8469_v19 }
 0x44a   : > { %7690 = vmatprep.subr.bf16.mxu0 %v8471_v22 }
 0x44b   : > { %7731 = vmatpush3.bf16.msra.mxu1 %v8466_v45 }
 0x44c   : > { %7732 = vmatprep.subr.bf16.mxu1 %v8468_v5 }
 0x44d   : > { %7691 = vmatpush3.bf16.msra.mxu0 %v8473_v36 }
 0x44e   : > { %7692 = vmatprep.subr.bf16.mxu0 %v8475_v28 }
 0x44f   : > { %7733 = vmatpush3.bf16.msra.mxu1 %v8470_v58 }
 0x450   : > { %7734 = vmatprep.subr.bf16.mxu1 %v8472_v20 }
 0x451   : > { %7693 = vmatpush3.bf16.msra.mxu0 %v8477_v53 }
 0x452   : > { %7694 = vmatprep.subr.bf16.mxu0 %v8479_v62 }
 0x453   : > { %7735 = vmatpush3.bf16.msra.mxu1 %v8474_v60 }
 0x454   : > { %7736 = vmatprep.subr.bf16.mxu1 %v8476_v21 }
 0x455   : > { %7695 = vmatpush3.bf16.msra.mxu0 %v8481_v38 }
 0x456   : > { %7702 = vmatprep.subr.bf16.mxu0 %v8485_v25 }
 0x457   : > { %7737 = vmatpush3.bf16.msra.mxu1 %v8478_v18 }
 0x458   : > { %7738 = vmatprep.subr.bf16.mxu1 %v8480_v34 }
 0x45b   : > { %7739 = vmatpush3.bf16.msra.mxu1 %v8482_v29 }
 0x45c   : > { %7768 = vmatprep.subr.bf16.mxu1 %v8488_v47 }
 0x4d9   : > { %v3864_v16 = vpop.f32.mrb[60].mxu1 }
 0x4da   : > { %v3866_v14 = vpop.f32.mrb[61].mxu1 }
 0x4db   : > { %v3868_v23 = vpop.f32.mrb[62].mxu1 }
 0x4dc   : > { %v3869_v32 = vpop.f32.mrb[63].mxu1 }
 0x4f9   : > { %v3998_v59 = vpop.f32.mrb[64].mxu1 }
 0x4fa   : > { %v3999_v30 = vadd.f32 %v3998_v59, %v3864_v16  ;;  %v4000_v63 = vpop.f32.mrb[65].mxu1 }
 0x4fb   : > { %v4001_v17 = vadd.f32 %v4000_v63, %v3866_v14  ;;  %v4002_v26 = vpop.f32.mrb[66].mxu1 }
 0x4fc   : > { %v4003_v37 = vpop.f32.mrb[67].mxu1 }
 0x511   : > { %v4145_v13 = vpop.f32.mrb[56].mxu1 }
 0x512   : > { %v4180_v52 = vadd.f32 %v4173_v8, %v4145_v13  ;;  %v4147_v7 = vpop.f32.mrb[57].mxu1 }
 0x513   : > { %v4181_v44 = vadd.f32 %v9986_v56, %v4147_v7  ;;  %v4149_v61 = vpop.f32.mrb[58].mxu1 }
 0x514   : > { %v4186_v2 = vmax.f32 %v4180_v52, 0.0  ;;  %v4182_v11 = vadd.f32 %v4173_v8, %v4149_v61  ;;  %v4151_v15 = vpop.f32.mrb[59].mxu1 }
 0x515   : > { %v4187_v6 = vmax.f32 %v4181_v44, 0.0  ;;  %v4183_v55 = vadd.f32 %v9986_v56, %v4151_v15 }
 0x516   : > { %v4188_v48 = vmax.f32 %v4182_v11, 0.0 }
 0x517   : > { %v4198_v4 = vcombine.low %v4186_v2, %v4187_v6  ;;  %v4199_v35 = vcombine.high %v4186_v2, %v4187_v6  ;;  %v4189_v49 = vmax.f32 %v4183_v55, 0.0 }
 0x519   : > { %v4206_v1 = vrot.slane %v4198_v4, %v9487_v12  ;;  %v4213_v24 = vrot.slane %v4199_v35, %v9487_v12  ;;  %v4216_v51 = vcombine.low %v4188_v48, %v4189_v49  ;;  %v4217_v50 = vcombine.high %v4188_v48, %v4189_v49  ;;  %v4155_v10 = vpop.f32.mrb[68].mxu1 }
 0x51a   : > { %v4166_v31 = vadd.f32 %v4155_v10, %v3999_v30  ;;  %v4157_v46 = vpop.f32.mrb[69].mxu1 }
 0x51b   : > { %v4214_v3 = vcombine.high %v4206_v1, %v4206_v1  ;;  %v4215_v41 = vcombine.high %v4213_v24, %v4213_v24  ;;  %v4258_v9 = vrot.slane %v4206_v1, %v9487_v12  ;;  %v4274_v27 = vrot.slane %v4213_v24, %v9487_v12  ;;  %v4159_v54 = vpop.f32.mrb[70].mxu1 }
 0x51c   : > { %v9995_v43 = vrot.slane %v4216_v51, %v9487_v12  ;;  %v9998_v16 = vrot.slane %v4217_v50, %v9487_v12  ;;  %v10000_v33 = vadd.f32 %v4173_v8, %v4166_v31  ;;  %v10002_v45 = vadd.f32 %v4157_v46, %v4001_v17  ;;  %v4160_v14 = vpop.f32.mrb[71].mxu1 }
 0x51d   : > { %v4259_v23 = vcombine.high %v4258_v9, %v4258_v9  ;;  %v4266_v32 = vrot.slane %v4214_v3, %v9487_v12  ;;  %v4275_v40 = vcombine.high %v4274_v27, %v4274_v27  ;;  %v4282_v5 = vrot.slane %v4215_v41, %v9487_v12 }
 0x51e   : > { %v4372_v19 = vsel %vm10311_vm11, %v4258_v9, -inf  ;;  %v4400_v58 = vsel %vm10312_vm15, %v4274_v27, -inf  ;;  %v4232_v22 = vcombine.high %v9995_v43, %v9995_v43  ;;  %v4233_v20 = vcombine.high %v9998_v16, %v9998_v16  ;;  %vm10319_vm11 = vmmov %vm10296_vm0 }
 0x51f   : > { %v4267_v36 = vcombine.high %v4266_v32, %v4266_v32  ;;  %v4283_v60 = vcombine.high %v4282_v5, %v4282_v5  ;;  %v4373_v28 = vrot.slane %v4372_v19, 4  ;;  %v4379_v21 = vsel %vm10313_vm2, %v4259_v23, -inf  ;;  %vm10320_vm15 = vmmov %vm10296_vm0 }
 0x520   : > { %v4380_v53 = vrot.slane %v4379_v21, 4  ;;  %v4386_v18 = vsel %vm10314_vm1, %v4266_v32, -inf  ;;  %v4401_v62 = vrot.slane %v4400_v58, 4  ;;  %v4407_v34 = vsel %vm10315_vm5, %v4275_v40, -inf  ;;  %vm10321_vm2 = vmmov %vm10296_vm0 }
 0x521   : > { %v4374_v38 = vmax.f32 %v4372_v19, %v4373_v28  ;;  %v4387_v29 = vrot.slane %v4386_v18, 4  ;;  %v4393_v25 = vsel %vm10316_vm4, %v4267_v36, -inf  ;;  %v4408_v47 = vrot.slane %v4407_v34, 4  ;;  %vm10322_vm1 = vmmov %vm10296_vm0 }
 0x522   : > { %v4381_v59 = vmax.f32 %v4379_v21, %v4380_v53  ;;  %v4394_v30 = vrot.slane %v4393_v25, 4  ;;  %v4402_v63 = vmax.f32 %v4400_v58, %v4401_v62  ;;  %v4414_v17 = vsel %vm10317_vm14, %v4282_v5, -inf  ;;  %vm10323_vm5 = vmmov %vm10296_vm0 }
 0x523   : > { %v4375_v26 = vrot.slane %v4374_v38, 2  ;;  %v4388_v37 = vmax.f32 %v4386_v18, %v4387_v29  ;;  %v4409_v42 = vmax.f32 %v4407_v34, %v4408_v47  ;;  %v4415_v57 = vrot.slane %v4414_v17, 4  ;;  %vm10324_vm4 = vmmov %vm10296_vm0 }
 0x524   : > { %v4382_v0 = vrot.slane %v4381_v59, 2  ;;  %v4395_v8 = vmax.f32 %v4393_v25, %v4394_v30  ;;  %v4403_v13 = vrot.slane %v4402_v63, 2  ;;  %v4421_v52 = vsel %vm10296_vm0, %v4283_v60, -inf  ;;  %vm10325_vm14 = vmmov %vm10296_vm0 }
 0x525   : > { %v4376_v7 = vmax.f32 %v4374_v38, %v4375_v26  ;;  %v4389_v44 = vrot.slane %v4388_v37, 2  ;;  %v4410_v61 = vrot.slane %v4409_v42, 2  ;;  %v4416_v2 = vmax.f32 %v4414_v17, %v4415_v57 }
 0x526   : > { %v4383_v11 = vmax.f32 %v4381_v59, %v4382_v0  ;;  %v4396_v15 = vrot.slane %v4395_v8, 2  ;;  %v4404_v6 = vmax.f32 %v4402_v63, %v4403_v13  ;;  %v4422_v55 = vrot.slane %v4421_v52, 4 }
 0x527   : > { %v4377_v48 = vrot.slane %v4376_v7, 1  ;;  %v4390_v4 = vmax.f32 %v4388_v37, %v4389_v44  ;;  %v4411_v35 = vmax.f32 %v4409_v42, %v4410_v61  ;;  %v4417_v49 = vrot.slane %v4416_v2, 2 }
 0x528   : > { %v4384_v1 = vrot.slane %v4383_v11, 1  ;;  %v4397_v24 = vmax.f32 %v4395_v8, %v4396_v15  ;;  %v4405_v51 = vrot.slane %v4404_v6, 1  ;;  %v4423_v50 = vmax.f32 %v4421_v52, %v4422_v55 }
 0x529   : > { %v4378_v10 = vmax.f32 %v4376_v7, %v4377_v48  ;;  %v4391_v31 = vrot.slane %v4390_v4, 1  ;;  %v4412_v46 = vrot.slane %v4411_v35, 1  ;;  %v4418_v3 = vmax.f32 %v4416_v2, %v4417_v49 }
 0x52a   : > { %v4385_v41 = vmax.f32 %v4383_v11, %v4384_v1  ;;  %v4398_v9 = vrot.slane %v4397_v24, 1  ;;  %v4406_v27 = vmax.f32 %v4404_v6, %v4405_v51  ;;  %v4424_v54 = vrot.slane %v4423_v50, 2 }
 0x52b   : > { %v4392_v14 = vmax.f32 %v4390_v4, %v4391_v31  ;;  %v4413_v23 = vmax.f32 %v4411_v35, %v4412_v46  ;;  %v4419_v32 = vrot.slane %v4418_v3, 1  ;;  %v4290_v40 = vrot.slane %v9995_v43, %v9487_v12 }
 0x52c   : > { %v4399_v5 = vmax.f32 %v4397_v24, %v4398_v9  ;;  %v4425_v19 = vmax.f32 %v4423_v50, %v4424_v54  ;;  %v7584_v58 = vpack.c.bf16 %v4385_v41, %v4378_v10  ;;  %v4298_v36 = vrot.slane %v4232_v22, %v9487_v12 }
 0x52d   : > { %v4420_v60 = vmax.f32 %v4418_v3, %v4419_v32  ;;  %v7586_v28 = vpack.c.bf16 %v4413_v23, %v4406_v27  ;;  %v4291_v21 = vcombine.high %v4290_v40, %v4290_v40  ;;  %v4306_v53 = vrot.slane %v9998_v16, %v9487_v12 }
 0x52e   : > { %v4426_v18 = vrot.slane %v4425_v19, 1  ;;  %v7585_v62 = vpack.c.bf16 %v4399_v5, %v4392_v14  ;;  %v4624_v34 = vunpack.c.l.b16 %v7584_v58  ;;  %v4625_v38 = vunpack.c.h.b16 %v7584_v58 }
 0x52f   : > { %v4628_v29 = vunpack.c.l.b16 %v7586_v28  ;;  %v4629_v25 = vunpack.c.h.b16 %v7586_v28  ;;  %v4299_v47 = vcombine.high %v4298_v36, %v4298_v36  ;;  %v4307_v59 = vcombine.high %v4306_v53, %v4306_v53 }
 0x530   : > { %v4427_v43 = vmax.f32 %v4425_v19, %v4426_v18  ;;  %v4626_v30 = vunpack.c.l.b16 %v7585_v62  ;;  %v4627_v63 = vunpack.c.h.b16 %v7585_v62  ;;  %v4314_v22 = vrot.slane %v4233_v20, %v9487_v12 }
 0x531   : > { %v4428_v17 = vsel %vm10318_vm3, %v4290_v40, -inf  ;;  %v4435_v26 = vsel %vm10319_vm11, %v4291_v21, -inf  ;;  %v4442_v37 = vsel %vm10320_vm15, %v4298_v36, -inf  ;;  %v4449_v42 = vsel %vm10321_vm2, %v4299_v47, -inf  ;;  %vm10330_vm3 = vmmov %vm10296_vm0 }
 0x532   : > { %v7587_v57 = vpack.c.bf16 %v4427_v43, %v4420_v60  ;;  %v4648_v0 = vsel %vm2513_vm10, %v4626_v30, %v4624_v34  ;;  %v4655_v8 = vsel %vm2513_vm10, %v4627_v63, %v4625_v38  ;;  %v4315_v13 = vcombine.high %v4314_v22, %v4314_v22  ;;  %vm10331_vm11 = vmmov %vm10296_vm0 }
 0x533   : > { %v4649_v52 = vsel %vm2515_vm13, %v4628_v29, %v4648_v0  ;;  %v4656_v7 = vsel %vm2515_vm13, %v4629_v25, %v4655_v8  ;;  %v4429_v16 = vrot.slane %v4428_v17, 4  ;;  %v4436_v20 = vrot.slane %v4435_v26, 4  ;;  %vm10332_vm15 = vmmov %vm10296_vm0 }
 0x534   : > { %v4630_v44 = vunpack.c.l.b16 %v7587_v57  ;;  %v4631_v61 = vunpack.c.h.b16 %v7587_v57  ;;  %v4443_v2 = vrot.slane %v4442_v37, 4  ;;  %v4450_v11 = vrot.slane %v4449_v42, 4 }
 0x535   : > { %v4430_v15 = vmax.f32 %v4428_v17, %v4429_v16  ;;  %v4437_v6 = vmax.f32 %v4435_v26, %v4436_v20  ;;  %v4456_v55 = vsel %vm10322_vm1, %v4306_v53, -inf  ;;  %v4463_v48 = vsel %vm10323_vm5, %v4307_v59, -inf }
 0x536   : > { %v4650_v4 = vsel %vm2503_vm6, %v4630_v44, %v4649_v52  ;;  %v4657_v35 = vsel %vm2503_vm6, %v4631_v61, %v4656_v7  ;;  %v4444_v49 = vmax.f32 %v4442_v37, %v4443_v2  ;;  %v4451_v1 = vmax.f32 %v4449_v42, %v4450_v11 }
 0x537   : > { %v4431_v24 = vrot.slane %v4430_v15, 2  ;;  %v4438_v51 = vrot.slane %v4437_v6, 2  ;;  %v4457_v50 = vrot.slane %v4456_v55, 4  ;;  %v4464_v10 = vrot.slane %v4463_v48, 4 }
 0x538   : > { %v4445_v31 = vrot.slane %v4444_v49, 2  ;;  %v4452_v46 = vrot.slane %v4451_v1, 2  ;;  %v4470_v3 = vsel %vm10324_vm4, %v4314_v22, -inf  ;;  %v4477_v41 = vsel %vm10325_vm14, %v4315_v13, -inf }
 0x539   : > { %v4432_v9 = vmax.f32 %v4430_v15, %v4431_v24  ;;  %v4439_v27 = vmax.f32 %v4437_v6, %v4438_v51  ;;  %v4458_v54 = vmax.f32 %v4456_v55, %v4457_v50  ;;  %v4465_v14 = vmax.f32 %v4463_v48, %v4464_v10 }
 0x53a   : > { %v4446_v23 = vmax.f32 %v4444_v49, %v4445_v31  ;;  %v4453_v32 = vmax.f32 %v4451_v1, %v4452_v46  ;;  %v4471_v40 = vrot.slane %v4470_v3, 4  ;;  %v4478_v5 = vrot.slane %v4477_v41, 4 }
 0x53b   : > { %v4433_v19 = vrot.slane %v4432_v9, 1  ;;  %v4440_v58 = vrot.slane %v4439_v27, 1  ;;  %v4459_v36 = vrot.slane %v4458_v54, 2  ;;  %v4466_v60 = vrot.slane %v4465_v14, 2 }
 0x53c   : > { %v4447_v28 = vrot.slane %v4446_v23, 1  ;;  %v4454_v21 = vrot.slane %v4453_v32, 1  ;;  %v4472_v53 = vmax.f32 %v4470_v3, %v4471_v40  ;;  %v4479_v18 = vmax.f32 %v4477_v41, %v4478_v5 }
 0x53d   : > { %v4434_v62 = vmax.f32 %v4432_v9, %v4433_v19  ;;  %v4441_v34 = vmax.f32 %v4439_v27, %v4440_v58  ;;  %v4460_v38 = vmax.f32 %v4458_v54, %v4459_v36  ;;  %v4467_v29 = vmax.f32 %v4465_v14, %v4466_v60 }
 0x53e   : > { %v4448_v25 = vmax.f32 %v4446_v23, %v4447_v28  ;;  %v4455_v47 = vmax.f32 %v4453_v32, %v4454_v21  ;;  %v4473_v59 = vrot.slane %v4472_v53, 2  ;;  %v4480_v43 = vrot.slane %v4479_v18, 2 }
 0x53f   : > { %v4461_v30 = vrot.slane %v4460_v38, 1  ;;  %v4468_v63 = vrot.slane %v4467_v29, 1  ;;  %v7588_v22 = vpack.c.bf16 %v4441_v34, %v4434_v62  ;;  %v4190_v17 = vmax.f32 %v10000_v33, 0.0 }
 0x540   : > { %v4474_v26 = vmax.f32 %v4472_v53, %v4473_v59  ;;  %v4481_v37 = vmax.f32 %v4479_v18, %v4480_v43  ;;  %v7589_v42 = vpack.c.bf16 %v4455_v47, %v4448_v25  ;;  %v4185_v57 = vadd.f32 %v9986_v56, %v10002_v45 }
 0x541   : > { %v4462_v0 = vmax.f32 %v4460_v38, %v4461_v30  ;;  %v4469_v8 = vmax.f32 %v4467_v29, %v4468_v63  ;;  %v4632_v13 = vunpack.c.l.b16 %v7588_v22  ;;  %v4633_v52 = vunpack.c.h.b16 %v7588_v22 }
 0x542   : > { %v4475_v7 = vrot.slane %v4474_v26, 1  ;;  %v4482_v16 = vrot.slane %v4481_v37, 1  ;;  %v4634_v20 = vunpack.c.l.b16 %v7589_v42  ;;  %v4635_v44 = vunpack.c.h.b16 %v7589_v42 }
 0x543   : > { %v7590_v61 = vpack.c.bf16 %v4469_v8, %v4462_v0  ;;  %v4651_v2 = vsel %vm2505_vm7, %v4632_v13, %v4650_v4  ;;  %v4658_v11 = vsel %vm2505_vm7, %v4633_v52, %v4657_v35  ;;  %v4191_v33 = vmax.f32 %v4185_v57, 0.0  ;;  %vm10326_vm7 = vmmov %vm10296_vm0 }
 0x544   : > { %v4476_v15 = vmax.f32 %v4474_v26, %v4475_v7  ;;  %v4483_v6 = vmax.f32 %v4481_v37, %v4482_v16  ;;  %v4652_v55 = vsel %vm2507_vm8, %v4634_v20, %v4651_v2  ;;  %v4659_v56 = vsel %vm2507_vm8, %v4635_v44, %v4658_v11  ;;  %vm10327_vm8 = vmmov %vm10296_vm0 }
 0x545   : > { %v4636_v45 = vunpack.c.l.b16 %v7590_v61  ;;  %v4637_v48 = vunpack.c.h.b16 %v7590_v61  ;;  %v4234_v49 = vcombine.low %v4190_v17, %v4191_v33  ;;  %v4235_v1 = vcombine.high %v4190_v17, %v4191_v33 }
 0x546   : > { %v7591_v24 = vpack.c.bf16 %v4483_v6, %v4476_v15 }
 0x547   : > { %v4653_v51 = vsel %vm2509_vm9, %v4636_v45, %v4652_v55  ;;  %v4660_v50 = vsel %vm2509_vm9, %v4637_v48, %v4659_v56  ;;  %v4242_v4 = vrot.slane %v4234_v49, %v9487_v12  ;;  %v4249_v35 = vrot.slane %v4235_v1, %v9487_v12  ;;  %vm10328_vm9 = vmmov %vm10296_vm0 }
 0x548   : > { %v4638_v10 = vunpack.c.l.b16 %v7591_v24  ;;  %v4639_v31 = vunpack.c.h.b16 %v7591_v24 }
 0x549   : > { %v4250_v46 = vcombine.high %v4242_v4, %v4242_v4  ;;  %v4251_v3 = vcombine.high %v4249_v35, %v4249_v35  ;;  %v4322_v41 = vrot.slane %v4242_v4, %v9487_v12  ;;  %v4338_v9 = vrot.slane %v4249_v35, %v9487_v12 }
 0x54a   : > { %v4654_v27 = vsel %vm2511_vm12, %v4638_v10, %v4653_v51  ;;  %v4661_v54 = vsel %vm2511_vm12, %v4639_v31, %v4660_v50  ;;  %vm10329_vm12 = vmmov %vm10296_vm0 }
 0x54b   : > { %v4668_v14 = vpack.c.b16 %v4661_v54, %v4654_v27  ;;  %v4323_v23 = vcombine.high %v4322_v41, %v4322_v41  ;;  %v4330_v32 = vrot.slane %v4250_v46, %v9487_v12  ;;  %v4339_v40 = vcombine.high %v4338_v9, %v4338_v9 }
 0x54c   : > { %v4346_v5 = vrot.slane %v4251_v3, %v9487_v12  ;;  %v4484_v19 = vsel %vm10326_vm7, %v4322_v41, -inf  ;;  %v4512_v58 = vsel %vm10327_vm8, %v4338_v9, -inf }
 0x54d   : > { %4672 = vst [vmem:[#allocation5] sm:$0xff] %v4668_v14  ;;  %v4331_v36 = vcombine.high %v4330_v32, %v4330_v32  ;;  %v4485_v60 = vrot.slane %v4484_v19, 4  ;;  %v4491_v28 = vsel %vm10328_vm9, %v4323_v23, -inf  ;;  %v4498_v21 = vsel %vm10296_vm0, %v4330_v32, -inf }
 0x54e   : > { %v4347_v53 = vcombine.high %v4346_v5, %v4346_v5  ;;  %v4492_v18 = vrot.slane %v4491_v28, 4  ;;  %v4499_v62 = vrot.slane %v4498_v21, 4  ;;  %v4513_v34 = vrot.slane %v4512_v58, 4 }
 0x54f   : > { %v4486_v38 = vmax.f32 %v4484_v19, %v4485_v60  ;;  %v4505_v29 = vsel %vm10329_vm12, %v4331_v36, -inf  ;;  %v4519_v12 = vsel %vm10330_vm3, %v4339_v40, -inf  ;;  %v4526_v25 = vsel %vm10331_vm11, %v4346_v5, -inf }
 0x550   : > { %v4493_v47 = vmax.f32 %v4491_v28, %v4492_v18  ;;  %v4500_v59 = vmax.f32 %v4498_v21, %v4499_v62  ;;  %v4506_v43 = vrot.slane %v4505_v29, 4  ;;  %v4514_v30 = vmax.f32 %v4512_v58, %v4513_v34  ;;  %v8489_v21 = vld [vmem:[#allocation11] sm:$0xff]  }
 0x551   : > { %v4487_v63 = vrot.slane %v4486_v38, 2  ;;  %v4520_v22 = vrot.slane %v4519_v12, 4  ;;  %v4527_v17 = vrot.slane %v4526_v25, 4  ;;  %v4533_v26 = vsel %vm10332_vm15, %v4347_v53, -inf }
 0x552   : > { %v4494_v37 = vrot.slane %v4493_v47, 2  ;;  %v4501_v42 = vrot.slane %v4500_v59, 2  ;;  %v4507_v57 = vmax.f32 %v4505_v29, %v4506_v43  ;;  %v4515_v0 = vrot.slane %v4514_v30, 2 }
 0x553   : > { %v4488_v8 = vmax.f32 %v4486_v38, %v4487_v63  ;;  %v4521_v13 = vmax.f32 %v4519_v12, %v4520_v22  ;;  %v4528_v52 = vmax.f32 %v4526_v25, %v4527_v17  ;;  %v4534_v7 = vrot.slane %v4533_v26, 4  ;;  %v8493_v38 = vld [vmem:[#allocation11 + $0x48] sm:$0xff]   ;;  %v8490_v22 = vld [vmem:[#allocation11 + $0x200] sm:$0xff]  }
 0x554   : > { %v4495_v16 = vmax.f32 %v4493_v47, %v4494_v37  ;;  %v4502_v20 = vmax.f32 %v4500_v59, %v4501_v42  ;;  %v4508_v44 = vrot.slane %v4507_v57, 2  ;;  %v4516_v61 = vmax.f32 %v4514_v30, %v4515_v0  ;;  %v4674_v45 = vld [vmem:[#allocation5] sm:$0x11]  ;;  %v5027_v51 = vld [vmem:[#allocation5] sm:$0x22]  ;;  %v8494_v42 = vld [vmem:[#allocation11 + $0x248] sm:$0xff]  }
 0x555   : > { %v4489_v2 = vrot.slane %v4488_v8, 1  ;;  %v4522_v11 = vrot.slane %v4521_v13, 2  ;;  %v4529_v33 = vrot.slane %v4528_v52, 2  ;;  %v4535_v15 = vmax.f32 %v4533_v26, %v4534_v7  ;;  %v10071_v19 = vld [vmem:[#allocation5] sm:$0x44] }
 0x556   : > { %v4496_v6 = vrot.slane %v4495_v16, 1  ;;  %v4503_v55 = vrot.slane %v4502_v20, 1  ;;  %v4509_v56 = vmax.f32 %v4507_v57, %v4508_v44  ;;  %v4517_v48 = vrot.slane %v4516_v61, 1  ;;  %v8495_v57 = vld [vmem:[#allocation11 + $0x8] sm:$0xff]   ;;  %v8497_v7 = vld [vmem:[#allocation11 + $0x50] sm:$0xff]  }
 0x557   : > { %v4523_v49 = vmax.f32 %v4521_v13, %v4522_v11  ;;  %v4530_v1 = vmax.f32 %v4528_v52, %v4529_v33  ;;  %v4536_v24 = vrot.slane %v4535_v15, 2  ;;  %v4490_v50 = vmax.f32 %v4488_v8, %v4489_v2  ;;  %v8496_v44 = vld [vmem:[#allocation11 + $0x208] sm:$0xff]   ;;  %v8498_v2 = vld [vmem:[#allocation11 + $0x250] sm:$0xff]   ;;  %v8501_v33 = vld [vmem:[#allocation11 + $0x58] sm:$0xff]  }
 0x558   : > { %v4497_v4 = vmax.f32 %v4495_v16, %v4496_v6  ;;  %v4504_v35 = vmax.f32 %v4502_v20, %v4503_v55  ;;  %v4510_v10 = vrot.slane %v4509_v56, 1  ;;  %v10066_v41 = vcombine.low %v4674_v45, %v4674_v45  ;;  %v8499_v11 = vld [vmem:[#allocation11 + $0x10] sm:$0xff]   ;;  %v8502_v6 = vld [vmem:[#allocation11 + $0x258] sm:$0xff]  }
 0x559   : > { %v4524_v31 = vrot.slane %v4523_v49, 1  ;;  %v4531_v46 = vrot.slane %v4530_v1, 1  ;;  %v4537_v3 = vmax.f32 %v4535_v15, %v4536_v24  ;;  %v7297_v54 = vcombine.high %v4674_v45, %v4674_v45  ;;  %v8500_v15 = vld [vmem:[#allocation11 + $0x210] sm:$0xff]   ;;  %v8503_v55 = vld [vmem:[#allocation11 + $0x18] sm:$0xff]   ;;  %v8508_v24 = vld [vmem:[#allocation11 + $0x220] sm:$0xff]  }
 0x55a   : > { %v4511_v9 = vmax.f32 %v4509_v56, %v4510_v10  ;;  %v7592_v27 = vpack.c.bf16 %v4497_v4, %v4490_v50  ;;  %v10068_v14 = vcombine.low %v5027_v51, %v5027_v51  ;;  %v4518_v23 = vmax.f32 %v4516_v61, %v4517_v48  ;;  %v8505_v56 = vld [vmem:[#allocation11 + $0x60] sm:$0xff]   ;;  %v8504_v45 = vld [vmem:[#allocation11 + $0x218] sm:$0xff]   ;;  %v8511_v50 = vld [vmem:[#allocation11 + $0x28] sm:$0xff]  }
 0x55b   : > { %v4525_v32 = vmax.f32 %v4523_v49, %v4524_v31  ;;  %v4538_v40 = vrot.slane %v4537_v3, 1  ;;  %v4746_v5 = vshrl.u32 %v10066_v41, 16  ;;  %v4532_v58 = vmax.f32 %v4530_v1, %v4531_v46  ;;  %v8506_v48 = vld [vmem:[#allocation11 + $0x260] sm:$0xff]   ;;  %v8509_v1 = vld [vmem:[#allocation11 + $0x68] sm:$0xff]   ;;  %v8513_v4 = vld [vmem:[#allocation11 + $0x70] sm:$0xff]  }
 0x55c   : > { %v7593_v36 = vpack.c.bf16 %v4511_v9, %v4504_v35  ;;  %v4640_v60 = vunpack.c.l.b16 %v7592_v27  ;;  %v4749_v28 = vshrl.u32 %v7297_v54, 16  ;;  %v4641_v62 = vunpack.c.h.b16 %v7592_v27  ;;  %v8507_v49 = vld [vmem:[#allocation11 + $0x20] sm:$0xff]   ;;  %v8512_v35 = vld [vmem:[#allocation11 + $0x228] sm:$0xff]   ;;  %v8514_v10 = vld [vmem:[#allocation11 + $0x270] sm:$0xff]  }
 0x55d   : > { %v4539_v53 = vmax.f32 %v4537_v3, %v4538_v40  ;;  %v7594_v18 = vpack.c.bf16 %v4525_v32, %v4518_v23  ;;  %v10073_v34 = vcombine.high %v5027_v51, %v5027_v51  ;;  %v5066_v25 = vrot.slane %v10068_v14, 1  ;;  %v8510_v51 = vld [vmem:[#allocation11 + $0x268] sm:$0xff]   ;;  %v8515_v31 = vld [vmem:[#allocation11 + $0x30] sm:$0xff]   ;;  %v8517_v46 = vld [vmem:[#allocation11 + $0x78] sm:$0xff]  }
 0x55e   : > { %v4642_v29 = vunpack.c.l.b16 %v7593_v36  ;;  %v4643_v12 = vunpack.c.h.b16 %v7593_v36  ;;  %4881 = vmatprep.mubr.bf16.mxu0 %v4749_v28  ;;  %v10078_v47 = vcombine.high %v10071_v19, %v10071_v19  ;;  %v8516_v3 = vld [vmem:[#allocation11 + $0x230] sm:$0xff]   ;;  %v8518_v9 = vld [vmem:[#allocation11 + $0x278] sm:$0xff]   ;;  %v8523_v36 = vld [vmem:[#allocation11 + $0x180] sm:$0xff]  }
 0x55f   : > { %v7595_v59 = vpack.c.bf16 %v4539_v53, %v4532_v58  ;;  %v4644_v43 = vunpack.c.l.b16 %v7594_v18  ;;  %v4645_v30 = vunpack.c.h.b16 %v7594_v18  ;;  %v5067_v63 = vrot.slane %v10073_v34, 1  ;;  %4882 = vmatmul.mubr.bf16.vlgmr.msra.gmra.mrb[24].mxu0 %v4746_v5  ;;  %v8519_v27 = vld [vmem:[#allocation11 + $0x38] sm:$0xff]   ;;  %v10088_v23 = vld [vmem:[#allocation5] sm:$0x88]  ;;  %v8522_v58 = vld [vmem:[#allocation11 + $0x340] sm:$0xff]  }
 0x560   : > { %v4662_v17 = vsel %vm2513_vm10, %v4642_v29, %v4640_v60  ;;  %v4665_v26 = vsel %vm2513_vm10, %v4643_v12, %v4641_v62  ;;  %7703 = vmatpush3.bf16.msra.mxu0 %v8489_v21  ;;  %5019 = vmatprep.mubr.bf16.mxu0 %v7297_v54  ;;  %v5427_v37 = vrot.slane %v10078_v47, 2  ;;  %v8521_v54 = vld [vmem:[#allocation11 + $0x1c0] sm:$0xff]   ;;  %v8520_v32 = vld [vmem:[#allocation11 + $0x238] sm:$0xff]   ;;  %v5245_v40 = vshrl.u32 %v10073_v34, 16  ;;  %v8527_v28 = vld [vmem:[#allocation11 + $0x1c8] sm:$0xff]  }
 0x561   : > { %v4646_v0 = vunpack.c.l.b16 %v7595_v59  ;;  %v4647_v8 = vunpack.c.h.b16 %v7595_v59  ;;  %v4663_v13 = vsel %vm2515_vm13, %v4644_v43, %v4662_v17  ;;  %v4666_v52 = vsel %vm2515_vm13, %v4645_v30, %v4665_v26  ;;  %5198 = vmatprep.mubr.bf16.mxu1 %v5067_v63  ;;  %7704 = vmatprep.subr.bf16.mxu0 %v8493_v38  ;;  %v8524_v53 = vld [vmem:[#allocation11 + $0x300] sm:$0xff]   ;;  %v8529_v62 = vld [vmem:[#allocation11 + $0x188] sm:$0xff]   ;;  %v8531_v38 = vld [vmem:[#allocation11 + $0x1d0] sm:$0xff]  }
 0x562   : > { %5199 = vmatmul.mubr.bf16.vlgmr.msra.gmra.mrb[72].mxu1 %v5066_v25  ;;  %v10093_v5 = vcombine.low %v10071_v19, %v10071_v19  ;;  %v10097_v60 = vcombine.high %v10088_v23, %v10088_v23  ;;  %v5247_v21 = vrot.slane %v5245_v40, 1  ;;  %v8528_v19 = vld [vmem:[#allocation11 + $0x348] sm:$0xff]   ;;  %v8533_v12 = vld [vmem:[#allocation11 + $0x190] sm:$0xff]   ;;  %v8535_v25 = vld [vmem:[#allocation11 + $0x1d8] sm:$0xff]   ;;  %vm10334_vm10 = vcmask 1040384  }
 0x563   : > { %v4664_v16 = vsel %vm2503_vm6, %v4646_v0, %v4663_v13  ;;  %v4667_v20 = vsel %vm2503_vm6, %v4647_v8, %v4666_v52  ;;  %7769 = vmatpush3.bf16.msra.mxu1 %v8490_v22  ;;  %5558 = vmatprep.mubr.bf16.mxu1 %v5427_v37  ;;  %v8530_v29 = vld [vmem:[#allocation11 + $0x308] sm:$0xff]   ;;  %v8534_v59 = vld [vmem:[#allocation11 + $0x310] sm:$0xff]   ;;  %v8536_v43 = vld [vmem:[#allocation11 + $0x358] sm:$0xff]   ;;  %vm10333_vm6 = vmmov 0  }
 0x564   : > { %v4669_v61 = vpack.c.b16 %v4667_v20, %v4664_v16  ;;  %7770 = vmatprep.subr.bf16.mxu1 %v8494_v42  ;;  %7705 = vmatpush3.bf16.msra.mxu0 %v8495_v57  ;;  %v5426_v18 = vrot.slane %v10093_v5, 2  ;;  %v5787_v34 = vrot.slane %v10097_v60, 3  ;;  %v8537_v30 = vld [vmem:[#allocation11 + $0x198] sm:$0xff]   ;;  %v8539_v63 = vld [vmem:[#allocation11 + $0x1e0] sm:$0xff]   ;;  %v8543_v37 = vld [vmem:[#allocation11 + $0x1e8] sm:$0xff]  }
 0x565   : > { %7706 = vmatprep.subr.bf16.mxu0 %v8497_v7  ;;  %v8538_v22 = vld [vmem:[#allocation11 + $0x318] sm:$0xff]   ;;  %v8540_v17 = vld [vmem:[#allocation11 + $0x360] sm:$0xff]   ;;  %v8544_v57 = vld [vmem:[#allocation11 + $0x368] sm:$0xff]  }
 0x566   : > { %4673 = vst [vmem:[#allocation5 + $0x8] sm:$0x33] %v4669_v61  ;;  %v8541_v26 = vld [vmem:[#allocation11 + $0x1a0] sm:$0xff]   ;;  %v8545_v0 = vld [vmem:[#allocation11 + $0x1a8] sm:$0xff]   ;;  %v8547_v8 = vld [vmem:[#allocation11 + $0x1f0] sm:$0xff]  }
 0x567   : > { %7771 = vmatpush3.bf16.msra.mxu1 %v8496_v44  ;;  %v8542_v42 = vld [vmem:[#allocation11 + $0x320] sm:$0xff]   ;;  %v8546_v13 = vld [vmem:[#allocation11 + $0x328] sm:$0xff]   ;;  %v8548_v52 = vld [vmem:[#allocation11 + $0x370] sm:$0xff]  }
 0x568   : > { %7772 = vmatprep.subr.bf16.mxu1 %v8498_v2  ;;  %7707 = vmatpush3.bf16.msra.mxu0 %v8499_v11  ;;  %v8549_v7 = vld [vmem:[#allocation11 + $0x1b0] sm:$0xff]   ;;  %v8551_v16 = vld [vmem:[#allocation11 + $0x1f8] sm:$0xff]   ;;  %v5241_v2 = vshrl.u32 %v10068_v14, 16  ;;  %v8555_v11 = vld [vmem:[#allocation11 + $0x2c0] sm:$0xff]  }
 0x569   : > { %7708 = vmatprep.subr.bf16.mxu0 %v8501_v33  ;;  %v8550_v20 = vld [vmem:[#allocation11 + $0x330] sm:$0xff]   ;;  %v8552_v44 = vld [vmem:[#allocation11 + $0x378] sm:$0xff]   ;;  %v8575_v40 = vld [vmem:[#allocation11 + $0x2a0] sm:$0xff]  }
 0x56a   : > { %v8553_v61 = vld [vmem:[#allocation11 + $0x1b8] sm:$0xff]   ;;  %vm10335_vm13 = vmmov %vm10334_vm10 }
 0x56b   : > { %7773 = vmatpush3.bf16.msra.mxu1 %v8500_v15  ;;  %v8554_v33 = vld [vmem:[#allocation11 + $0x338] sm:$0xff]   ;;  %v5605_v15 = vshrl.u32 %v10078_v47, 16  ;;  %v8562_v47 = vld [vmem:[#allocation11 + $0x448] sm:$0xff]  }
 0x56c   : > { %7774 = vmatprep.subr.bf16.mxu1 %v8502_v6  ;;  %7709 = vmatpush3.bf16.msra.mxu0 %v8503_v55  ;;  %v10106_v6 = vcombine.low %v10088_v23, %v10088_v23  ;;  %v8556_v55 = vld [vmem:[#allocation11 + $0x440] sm:$0xff]   ;;  %v8572_v23 = vld [vmem:[#allocation11 + $0x418] sm:$0xff]  }
 0x56d   : > { %7710 = vmatprep.subr.bf16.mxu0 %v8505_v56  ;;  %v8557_v56 = vld [vmem:[#allocation11 + $0x280] sm:$0xff]   ;;  %v5607_v14 = vrot.slane %v5605_v15, 2 }
 0x56e   : > { %v8608_v15 = vld [vmem:[#allocation11 + $0x560] sm:$0xff]  }
 0x56f   : > { %7775 = vmatpush3.bf16.msra.mxu1 %v8504_v45  ;;  %v5243_v45 = vrot.slane %v5241_v2, 1  ;;  %v8605_v2 = vld [vmem:[#allocation11 + $0x398] sm:$0xff]  }
 0x570   : > { %7776 = vmatprep.subr.bf16.mxu1 %v8506_v48  ;;  %7711 = vmatpush3.bf16.msra.mxu0 %v8507_v49  ;;  %v8561_v48 = vld [vmem:[#allocation11 + $0x2c8] sm:$0xff]   ;;  %v10108_v49 = vld [vmem:[#allocation5 + $0x8] sm:$0x11] }
 0x571   : > { %7712 = vmatprep.subr.bf16.mxu0 %v8509_v1  ;;  %v8558_v1 = vld [vmem:[#allocation11 + $0x400] sm:$0xff]  }
 0x573   : > { %7777 = vmatpush3.bf16.msra.mxu1 %v8508_v24  ;;  %v5786_v24 = vrot.slane %v10106_v6, 3 }
 0x574   : > { %7778 = vmatprep.subr.bf16.mxu1 %v8510_v51  ;;  %7713 = vmatpush3.bf16.msra.mxu0 %v8511_v50  ;;  %v8563_v51 = vld [vmem:[#allocation11 + $0x288] sm:$0xff]   ;;  %v10113_v50 = vcombine.high %v10108_v49, %v10108_v49 }
 0x575   : > { %7714 = vmatprep.subr.bf16.mxu0 %v8513_v4  ;;  %v8565_v4 = vld [vmem:[#allocation11 + $0x2d0] sm:$0xff]  }
 0x577   : > { %7779 = vmatpush3.bf16.msra.mxu1 %v8512_v35  ;;  %v8564_v35 = vld [vmem:[#allocation11 + $0x408] sm:$0xff]  }
 0x578   : > { %7780 = vmatprep.subr.bf16.mxu1 %v8514_v10  ;;  %7715 = vmatpush3.bf16.msra.mxu0 %v8515_v31  ;;  %v8566_v10 = vld [vmem:[#allocation11 + $0x450] sm:$0xff]  }
 0x579   : > { %7716 = vmatprep.subr.bf16.mxu0 %v8517_v46  ;;  %v8567_v31 = vld [vmem:[#allocation11 + $0x290] sm:$0xff]   ;;  %v8569_v46 = vld [vmem:[#allocation11 + $0x2d8] sm:$0xff]  }
 0x57b   : > { %7781 = vmatpush3.bf16.msra.mxu1 %v8516_v3  ;;  %v8568_v3 = vld [vmem:[#allocation11 + $0x410] sm:$0xff]  }
 0x57c   : > { %7782 = vmatprep.subr.bf16.mxu1 %v8518_v9  ;;  %7717 = vmatpush3.bf16.msra.mxu0 %v8519_v27  ;;  %v8570_v9 = vld [vmem:[#allocation11 + $0x458] sm:$0xff]  }
 0x57d   : > { %7746 = vmatprep.subr.bf16.mxu0 %v8521_v54  ;;  %v8571_v27 = vld [vmem:[#allocation11 + $0x298] sm:$0xff]   ;;  %v8573_v54 = vld [vmem:[#allocation11 + $0x2e0] sm:$0xff]  }
 0x57f   : > { %7783 = vmatpush3.bf16.msra.mxu1 %v8520_v32  ;;  %5020 = vmatmul.mubr.bf16.vlgmr.msra.gmra.mrb[28].mxu0 %v10066_v41  ;;  %v8532_v41 = vld [vmem:[#allocation11 + $0x350] sm:$0xff]   ;;  %v8574_v32 = vld [vmem:[#allocation11 + $0x460] sm:$0xff]  }
 0x580   : > { %7812 = vmatprep.subr.bf16.mxu1 %v8522_v58  ;;  %7747 = vmatpush3.bf16.msra.mxu0 %v8523_v36  ;;  %v8577_v58 = vld [vmem:[#allocation11 + $0x2e8] sm:$0xff]   ;;  %v8576_v36 = vld [vmem:[#allocation11 + $0x420] sm:$0xff]  }
 0x581   : > { %5378 = vmatprep.mubr.bf16.mxu0 %v5247_v21  ;;  %7748 = vmatprep.subr.bf16.mxu0 %v8527_v28  ;;  %v8578_v28 = vld [vmem:[#allocation11 + $0x468] sm:$0xff]  }
 0x582   : > { %5559 = vmatmul.mubr.bf16.vlgmr.msra.gmra.mrb[76].mxu1 %v5426_v18  ;;  %v8579_v21 = vld [vmem:[#allocation11 + $0x2a8] sm:$0xff]  }
 0x583   : > { %7813 = vmatpush3.bf16.msra.mxu1 %v8524_v53  ;;  %5918 = vmatprep.mubr.bf16.mxu1 %v5787_v34  ;;  %v8581_v53 = vld [vmem:[#allocation11 + $0x2f0] sm:$0xff]   ;;  %v8580_v18 = vld [vmem:[#allocation11 + $0x428] sm:$0xff]   ;;  %v8585_v34 = vld [vmem:[#allocation11 + $0x2f8] sm:$0xff]  }
 0x584   : > { %7814 = vmatprep.subr.bf16.mxu1 %v8528_v19  ;;  %7749 = vmatpush3.bf16.msra.mxu0 %v8529_v62  ;;  %v8582_v19 = vld [vmem:[#allocation11 + $0x470] sm:$0xff]  }
 0x585   : > { %7750 = vmatprep.subr.bf16.mxu0 %v8531_v38  ;;  %v8583_v62 = vld [vmem:[#allocation11 + $0x2b0] sm:$0xff]  }
 0x586   : > { %v8584_v38 = vld [vmem:[#allocation11 + $0x430] sm:$0xff]  }
 0x587   : > { %7815 = vmatpush3.bf16.msra.mxu1 %v8530_v29  ;;  %v8586_v29 = vld [vmem:[#allocation11 + $0x478] sm:$0xff]  }
 0x588   : > { %7816 = vmatprep.subr.bf16.mxu1 %v8532_v41  ;;  %7751 = vmatpush3.bf16.msra.mxu0 %v8533_v12  ;;  %v8587_v41 = vld [vmem:[#allocation11 + $0x2b8] sm:$0xff]   ;;  %v5601_v12 = vshrl.u32 %v10093_v5, 16 }
 0x589   : > { %7752 = vmatprep.subr.bf16.mxu0 %v8535_v25  ;;  %v8589_v25 = vld [vmem:[#allocation11 + $0x3c0] sm:$0xff]  }
 0x58b   : > { %7817 = vmatpush3.bf16.msra.mxu1 %v8534_v59  ;;  %v10117_v59 = vld [vmem:[#allocation5 + $0x8] sm:$0x22] }
 0x58c   : > { %7818 = vmatprep.subr.bf16.mxu1 %v8536_v43  ;;  %7753 = vmatpush3.bf16.msra.mxu0 %v8537_v30  ;;  %v8588_v43 = vld [vmem:[#allocation11 + $0x438] sm:$0xff]   ;;  %v5965_v30 = vshrl.u32 %v10097_v60, 16  ;;  %v8596_v60 = vld [vmem:[#allocation11 + $0x548] sm:$0xff]  }
 0x58d   : > { %7754 = vmatprep.subr.bf16.mxu0 %v8539_v63  ;;  %v8590_v63 = vld [vmem:[#allocation11 + $0x540] sm:$0xff]  }
 0x58e   : > { %v5967_v5 = vrot.slane %v5965_v30, 3 }
 0x58f   : > { %7819 = vmatpush3.bf16.msra.mxu1 %v8538_v22  ;;  %v8591_v22 = vld [vmem:[#allocation11 + $0x380] sm:$0xff]  }
 0x590   : > { %7820 = vmatprep.subr.bf16.mxu1 %v8540_v17  ;;  %7755 = vmatpush3.bf16.msra.mxu0 %v8541_v26  ;;  %v5603_v17 = vrot.slane %v5601_v12, 2  ;;  %v10122_v26 = vcombine.high %v10117_v59, %v10117_v59 }
 0x591   : > { %7756 = vmatprep.subr.bf16.mxu0 %v8543_v37  ;;  %v8595_v37 = vld [vmem:[#allocation11 + $0x3c8] sm:$0xff]  }
 0x592   : > { %v6681_v12 = vshrl.u32 %v10122_v26, 16 }
 0x593   : > { %7821 = vmatpush3.bf16.msra.mxu1 %v8542_v42  ;;  %v8592_v42 = vld [vmem:[#allocation11 + $0x500] sm:$0xff]  }
 0x594   : > { %7822 = vmatprep.subr.bf16.mxu1 %v8544_v57  ;;  %7757 = vmatpush3.bf16.msra.mxu0 %v8545_v0  ;;  %v10126_v57 = vcombine.low %v10108_v49, %v10108_v49  ;;  %v8597_v0 = vld [vmem:[#allocation11 + $0x388] sm:$0xff]   ;;  %v6683_v30 = vrot.slane %v6681_v12, 1 }
 0x595   : > { %7758 = vmatprep.subr.bf16.mxu0 %v8547_v8  ;;  %v6503_v8 = vrot.slane %v10122_v26, 1  ;;  %v8613_v49 = vld [vmem:[#allocation11 + $0x3a8] sm:$0xff]   ;;  %v8647_v26 = vld [vmem:[#allocation11 + $0x5e0] sm:$0xff]  }
 0x597   : > { %7823 = vmatpush3.bf16.msra.mxu1 %v8546_v13  ;;  %v8599_v13 = vld [vmem:[#allocation11 + $0x3d0] sm:$0xff]  }
 0x598   : > { %7824 = vmatprep.subr.bf16.mxu1 %v8548_v52  ;;  %7759 = vmatpush3.bf16.msra.mxu0 %v8549_v7  ;;  %v8598_v52 = vld [vmem:[#allocation11 + $0x508] sm:$0xff]   ;;  %v8600_v7 = vld [vmem:[#allocation11 + $0x550] sm:$0xff]  }
 0x599   : > { %7760 = vmatprep.subr.bf16.mxu0 %v8551_v16  ;;  %v8601_v16 = vld [vmem:[#allocation11 + $0x390] sm:$0xff]  }
 0x59b   : > { %7825 = vmatpush3.bf16.msra.mxu1 %v8550_v20  ;;  %v8603_v20 = vld [vmem:[#allocation11 + $0x3d8] sm:$0xff]  }
 0x59c   : > { %7826 = vmatprep.subr.bf16.mxu1 %v8552_v44  ;;  %7761 = vmatpush3.bf16.msra.mxu0 %v8553_v61  ;;  %v8602_v44 = vld [vmem:[#allocation11 + $0x510] sm:$0xff]   ;;  %v8604_v61 = vld [vmem:[#allocation11 + $0x558] sm:$0xff]  }
 0x59d   : > { %7790 = vmatprep.subr.bf16.mxu0 %v8555_v11  ;;  %v8607_v11 = vld [vmem:[#allocation11 + $0x3e0] sm:$0xff]  }
 0x59f   : > { %7827 = vmatpush3.bf16.msra.mxu1 %v8554_v33  ;;  %5379 = vmatmul.mubr.bf16.vlgmr.msra.gmra.mrb[32].mxu0 %v5243_v45  ;;  %v8606_v33 = vld [vmem:[#allocation11 + $0x518] sm:$0xff]   ;;  %v8610_v45 = vld [vmem:[#allocation11 + $0x520] sm:$0xff]  }
 0x5a0   : > { %7856 = vmatprep.subr.bf16.mxu1 %v8556_v55  ;;  %7791 = vmatpush3.bf16.msra.mxu0 %v8557_v56  ;;  %v8609_v55 = vld [vmem:[#allocation11 + $0x3a0] sm:$0xff]   ;;  %v8611_v56 = vld [vmem:[#allocation11 + $0x3e8] sm:$0xff]  }
 0x5a1   : > { %5738 = vmatprep.mubr.bf16.mxu0 %v5607_v14  ;;  %7792 = vmatprep.subr.bf16.mxu0 %v8561_v48  ;;  %v8612_v48 = vld [vmem:[#allocation11 + $0x568] sm:$0xff]   ;;  %v8615_v14 = vld [vmem:[#allocation11 + $0x3f0] sm:$0xff]  }
 0x5a2   : > { %5919 = vmatmul.mubr.bf16.vlgmr.msra.gmra.mrb[80].mxu1 %v5786_v24  ;;  %v8616_v24 = vld [vmem:[#allocation11 + $0x570] sm:$0xff]  }
 0x5a3   : > { %7857 = vmatpush3.bf16.msra.mxu1 %v8558_v1  ;;  %6276 = vmatprep.mubr.bf16.mxu1 %v10113_v50  ;;  %v8614_v1 = vld [vmem:[#allocation11 + $0x528] sm:$0xff]  }
 0x5a4   : > { %7858 = vmatprep.subr.bf16.mxu1 %v8562_v47  ;;  %7793 = vmatpush3.bf16.msra.mxu0 %v8563_v51  ;;  %v8617_v47 = vld [vmem:[#allocation11 + $0x3b0] sm:$0xff]   ;;  %v8619_v51 = vld [vmem:[#allocation11 + $0x3f8] sm:$0xff]  }
 0x5a5   : > { %7794 = vmatprep.subr.bf16.mxu0 %v8565_v4  ;;  %v8618_v4 = vld [vmem:[#allocation11 + $0x530] sm:$0xff]  }
 0x5a7   : > { %7859 = vmatpush3.bf16.msra.mxu1 %v8564_v35  ;;  %v8620_v35 = vld [vmem:[#allocation11 + $0x578] sm:$0xff]  }
 0x5a8   : > { %7860 = vmatprep.subr.bf16.mxu1 %v8566_v10  ;;  %7795 = vmatpush3.bf16.msra.mxu0 %v8567_v31  ;;  %v8621_v10 = vld [vmem:[#allocation11 + $0x3b8] sm:$0xff]   ;;  %v5961_v31 = vshrl.u32 %v10106_v6, 16  ;;  %v8626_v6 = vld [vmem:[#allocation11 + $0x488] sm:$0xff]  }
 0x5a9   : > { %7796 = vmatprep.subr.bf16.mxu0 %v8569_v46  ;;  %v8623_v46 = vld [vmem:[#allocation11 + $0x4c0] sm:$0xff]  }
 0x5ab   : > { %7861 = vmatpush3.bf16.msra.mxu1 %v8568_v3  ;;  %v8622_v3 = vld [vmem:[#allocation11 + $0x538] sm:$0xff]  }
 0x5ac   : > { %7862 = vmatprep.subr.bf16.mxu1 %v8570_v9  ;;  %7797 = vmatpush3.bf16.msra.mxu0 %v8571_v27  ;;  %v10133_v9 = vcombine.low %v10117_v59, %v10117_v59  ;;  %v8624_v27 = vld [vmem:[#allocation11 + $0x480] sm:$0xff]   ;;  %v6319_v59 = vshrl.u32 %v10126_v57, 16 }
 0x5ad   : > { %7798 = vmatprep.subr.bf16.mxu0 %v8573_v54  ;;  %v5963_v54 = vrot.slane %v5961_v31, 3 }
 0x5af   : > { %7863 = vmatpush3.bf16.msra.mxu1 %v8572_v23  ;;  %v8625_v23 = vld [vmem:[#allocation11 + $0x4c8] sm:$0xff]  }
 0x5b0   : > { %7864 = vmatprep.subr.bf16.mxu1 %v8574_v32  ;;  %7799 = vmatpush3.bf16.msra.mxu0 %v8575_v40  ;;  %v6322_v32 = vshrl.u32 %v10113_v50, 16  ;;  %v6502_v40 = vrot.slane %v10133_v9, 1  ;;  %v8630_v50 = vld [vmem:[#allocation11 + $0x498] sm:$0xff]  }
 0x5b1   : > { %7800 = vmatprep.subr.bf16.mxu0 %v8577_v58  ;;  %v8627_v58 = vld [vmem:[#allocation11 + $0x4d0] sm:$0xff]  }
 0x5b3   : > { %7865 = vmatpush3.bf16.msra.mxu1 %v8576_v36  ;;  %v8628_v36 = vld [vmem:[#allocation11 + $0x490] sm:$0xff]  }
 0x5b4   : > { %7866 = vmatprep.subr.bf16.mxu1 %v8578_v28  ;;  %7801 = vmatpush3.bf16.msra.mxu0 %v8579_v21  ;;  %v8629_v28 = vld [vmem:[#allocation11 + $0x4d8] sm:$0xff]   ;;  %v8631_v21 = vld [vmem:[#allocation11 + $0x4e0] sm:$0xff]  }
 0x5b5   : > { %7802 = vmatprep.subr.bf16.mxu0 %v8581_v53  ;;  %v8632_v53 = vld [vmem:[#allocation11 + $0x4a0] sm:$0xff]  }
 0x5b7   : > { %7867 = vmatpush3.bf16.msra.mxu1 %v8580_v18  ;;  %v8633_v18 = vld [vmem:[#allocation11 + $0x4e8] sm:$0xff]  }
 0x5b8   : > { %7868 = vmatprep.subr.bf16.mxu1 %v8582_v19  ;;  %7803 = vmatpush3.bf16.msra.mxu0 %v8583_v62  ;;  %v8634_v19 = vld [vmem:[#allocation11 + $0x4a8] sm:$0xff]   ;;  %v8635_v62 = vld [vmem:[#allocation11 + $0x4f0] sm:$0xff]  }
 0x5b9   : > { %7804 = vmatprep.subr.bf16.mxu0 %v8585_v34  ;;  %v8636_v34 = vld [vmem:[#allocation11 + $0x4b0] sm:$0xff]  }
 0x5bb   : > { %7869 = vmatpush3.bf16.msra.mxu1 %v8584_v38  ;;  %v8637_v38 = vld [vmem:[#allocation11 + $0x4f8] sm:$0xff]  }
 0x5bc   : > { %7870 = vmatprep.subr.bf16.mxu1 %v8586_v29  ;;  %7805 = vmatpush3.bf16.msra.mxu0 %v8587_v41  ;;  %v8638_v29 = vld [vmem:[#allocation11 + $0x4b8] sm:$0xff]   ;;  %v8639_v41 = vld [vmem:[#allocation11 + $0x5c0] sm:$0xff]  }
 0x5bd   : > { %7834 = vmatprep.subr.bf16.mxu0 %v8589_v25  ;;  %v8640_v25 = vld [vmem:[#allocation11 + $0x580] sm:$0xff]  }
 0x5bf   : > { %7871 = vmatpush3.bf16.msra.mxu1 %v8588_v43  ;;  %5739 = vmatmul.mubr.bf16.vlgmr.msra.gmra.mrb[36].mxu0 %v5603_v17  ;;  %v8641_v43 = vld [vmem:[#allocation11 + $0x5c8] sm:$0xff]   ;;  %v8644_v17 = vld [vmem:[#allocation11 + $0x590] sm:$0xff]  }
 0x5c0   : > { %7900 = vmatprep.subr.bf16.mxu1 %v8590_v63  ;;  %7835 = vmatpush3.bf16.msra.mxu0 %v8591_v22  ;;  %v8642_v63 = vld [vmem:[#allocation11 + $0x588] sm:$0xff]   ;;  %v8643_v22 = vld [vmem:[#allocation11 + $0x5d0] sm:$0xff]  }
 0x5c1   : > { %6098 = vmatprep.mubr.bf16.mxu0 %v5967_v5  ;;  %7836 = vmatprep.subr.bf16.mxu0 %v8595_v37  ;;  %v8645_v37 = vld [vmem:[#allocation11 + $0x5d8] sm:$0xff]  }
 0x5c2   : > { %6277 = vmatmul.mubr.bf16.vlgmr.msra.gmra.mrb[84].mxu1 %v10126_v57  ;;  %v8646_v5 = vld [vmem:[#allocation11 + $0x598] sm:$0xff]   ;;  %v8649_v57 = vld [vmem:[#allocation11 + $0x5e8] sm:$0xff]  }
 0x5c3   : > { %7901 = vmatpush3.bf16.msra.mxu1 %v8592_v42  ;;  %6634 = vmatprep.mubr.bf16.mxu1 %v6503_v8  ;;  %v8648_v42 = vld [vmem:[#allocation11 + $0x5a0] sm:$0xff]   ;;  %v8652_v8 = vld [vmem:[#allocation11 + $0x5b0] sm:$0xff]  }
 0x5c4   : > { %7902 = vmatprep.subr.bf16.mxu1 %v8596_v60  ;;  %7837 = vmatpush3.bf16.msra.mxu0 %v8597_v0  ;;  %v8650_v60 = vld [vmem:[#allocation11 + $0x5a8] sm:$0xff]   ;;  %v8651_v0 = vld [vmem:[#allocation11 + $0x5f0] sm:$0xff]  }
 0x5c5   : > { %7838 = vmatprep.subr.bf16.mxu0 %v8599_v13  ;;  %v8653_v13 = vld [vmem:[#allocation11 + $0x5f8] sm:$0xff]  }
 0x5c7   : > { %7903 = vmatpush3.bf16.msra.mxu1 %v8598_v52  ;;  %v8654_v52 = vld [vmem:[#allocation11 + $0x5b8] sm:$0xff]  }
 0x5c8   : > { %7904 = vmatprep.subr.bf16.mxu1 %v8600_v7  ;;  %7839 = vmatpush3.bf16.msra.mxu0 %v8601_v16  ;;  %v6677_v7 = vshrl.u32 %v10133_v9, 16  ;;  %v8656_v9 = vld [vmem:[%s10238_s9 + $0x8] sm:$0xff]  }
 0x5c9   : > { %7840 = vmatprep.subr.bf16.mxu0 %v8603_v20 }
 0x5ca   : > { %v6679_v16 = vrot.slane %v6677_v7, 1 }
 0x5cb   : > { %7905 = vmatpush3.bf16.msra.mxu1 %v8602_v44 }
 0x5cc   : > { %7906 = vmatprep.subr.bf16.mxu1 %v8604_v61  ;;  %7841 = vmatpush3.bf16.msra.mxu0 %v8605_v2 }
 0x5cd   : > { %7842 = vmatprep.subr.bf16.mxu0 %v8607_v11 }
 0x5cf   : > { %7907 = vmatpush3.bf16.msra.mxu1 %v8606_v33 }
 0x5d0   : > { %7908 = vmatprep.subr.bf16.mxu1 %v8608_v15  ;;  %7843 = vmatpush3.bf16.msra.mxu0 %v8609_v55 }
 0x5d1   : > { %7844 = vmatprep.subr.bf16.mxu0 %v8611_v56 }
 0x5d3   : > { %7909 = vmatpush3.bf16.msra.mxu1 %v8610_v45 }
 0x5d4   : > { %7910 = vmatprep.subr.bf16.mxu1 %v8612_v48  ;;  %7845 = vmatpush3.bf16.msra.mxu0 %v8613_v49 }
 0x5d5   : > { %7846 = vmatprep.subr.bf16.mxu0 %v8615_v14 }
 0x5d7   : > { %7911 = vmatpush3.bf16.msra.mxu1 %v8614_v1 }
 0x5d8   : > { %7912 = vmatprep.subr.bf16.mxu1 %v8616_v24  ;;  %7847 = vmatpush3.bf16.msra.mxu0 %v8617_v47 }
 0x5d9   : > { %7848 = vmatprep.subr.bf16.mxu0 %v8619_v51 }
 0x5db   : > { %7913 = vmatpush3.bf16.msra.mxu1 %v8618_v4 }
 0x5dc   : > { %7914 = vmatprep.subr.bf16.mxu1 %v8620_v35  ;;  %7849 = vmatpush3.bf16.msra.mxu0 %v8621_v10  ;;  %v8655_v35 = vld [vmem:[%s10238_s9] sm:$0xff]  }
 0x5dd   : > { %7878 = vmatprep.subr.bf16.mxu0 %v8623_v46 }
 0x5df   : > { %7915 = vmatpush3.bf16.msra.mxu1 %v8622_v3  ;;  %6099 = vmatmul.mubr.bf16.vlgmr.msra.gmra.mrb[40].mxu0 %v5963_v54  ;;  %v8658_v54 = vld [vmem:[%s10238_s9 + $0x18] sm:$0xff]  }
 0x5e0   : > { %7879 = vmatpush3.bf16.msra.mxu0 %v8624_v27  ;;  %6454 = vmatprep.mubr.bf16.mxu0 %v6322_v32  ;;  %v8657_v27 = vld [vmem:[%s10238_s9 + $0x10] sm:$0xff]   ;;  %v8660_v32 = vld [vmem:[%s10238_s9 + $0x28] sm:$0xff]  }
 0x5e1   : > { %7880 = vmatprep.subr.bf16.mxu0 %v8625_v23  ;;  %8151 = vmatprep.subr.bf16.mxu1 %v8832_v39  ;;  %v8659_v23 = vld [vmem:[%s10238_s9 + $0x20] sm:$0xff]  }
 0x5e2   : > { %6635 = vmatmul.mubr.bf16.vlgmr.msra.gmra.mrb[88].mxu1 %v6502_v40 }
 0x5e3   : > { %8167 = vmatprep.mubr.msk.bf16.mxu1 %vm10333_vm6, %v8832_v39  ;;  %8152 = vmatpush3.bf16.msra.mxu1 %v8655_v35  ;;  %v6842_v35 = vld [vmem:[%s10239_s10] sm:$0x1] }
 0x5e4   : > { %7881 = vmatpush3.bf16.msra.mxu0 %v8626_v6  ;;  %8153 = vmatprep.subr.bf16.mxu1 %v8832_v39 }
 0x5e5   : > { %7882 = vmatprep.subr.bf16.mxu0 %v8627_v58 }
 0x5e7   : > { %8154 = vmatpush3.bf16.msra.mxu1 %v8656_v9 }
 0x5e8   : > { %7883 = vmatpush3.bf16.msra.mxu0 %v8628_v36  ;;  %8155 = vmatprep.subr.bf16.mxu1 %v8832_v39 }
 0x5e9   : > { %7884 = vmatprep.subr.bf16.mxu0 %v8629_v28 }
 0x5eb   : > { %8156 = vmatpush3.bf16.msra.mxu1 %v8657_v27 }
 0x5ec   : > { %7885 = vmatpush3.bf16.msra.mxu0 %v8630_v50  ;;  %8157 = vmatprep.subr.bf16.mxu1 %v8832_v39 }
 0x5ed   : > { %7886 = vmatprep.subr.bf16.mxu0 %v8631_v21 }
 0x5ef   : > { %8158 = vmatpush3.bf16.msra.mxu1 %v8658_v54 }
 0x5f0   : > { %7887 = vmatpush3.bf16.msra.mxu0 %v8632_v53  ;;  %8159 = vmatprep.subr.bf16.mxu1 %v8832_v39 }
 0x5f1   : > { %7888 = vmatprep.subr.bf16.mxu0 %v8633_v18 }
 0x5f3   : > { %8160 = vmatpush3.bf16.msra.mxu1 %v8659_v23 }
 0x5f4   : > { %7889 = vmatpush3.bf16.msra.mxu0 %v8634_v19  ;;  %8161 = vmatprep.subr.bf16.mxu1 %v8832_v39 }
 0x5f5   : > { %7890 = vmatprep.subr.bf16.mxu0 %v8635_v62 }
 0x5f7   : > { %8162 = vmatpush3.bf16.msra.mxu1 %v8660_v32 }
 0x5f8   : > { %7891 = vmatpush3.bf16.msra.mxu0 %v8636_v34  ;;  %8163 = vmatprep.subr.bf16.mxu1 %v8832_v39 }
 0x5f9   : > { %7892 = vmatprep.subr.bf16.mxu0 %v8637_v38  ;;  %v8661_v38 = vld [vmem:[%s10238_s9 + $0x30] sm:$0xff]  }
 0x5fb   : > { %8164 = vmatpush3.bf16.msra.mxu1 %v8661_v38 }
 0x5fc   : > { %7893 = vmatpush3.bf16.msra.mxu0 %v8638_v29  ;;  %v8662_v29 = vld [vmem:[%s10238_s9 + $0x38] sm:$0xff]   ;;  %8165 = vmatprep.subr.bf16.mxu1 %v8832_v39 }
 0x5fd   : > { %7922 = vmatprep.subr.bf16.mxu0 %v8639_v41 }
 0x5ff   : > { %6455 = vmatmul.mubr.bf16.vlgmr.msra.gmra.mrb[44].mxu0 %v6319_v59  ;;  %8166 = vmatpush3.bf16.msra.mxu1 %v8662_v29 }
 0x600   : > { %7923 = vmatpush3.bf16.msra.mxu0 %v8640_v25  ;;  %6814 = vmatprep.mubr.bf16.mxu0 %v6683_v30 }
 0x601   : > { %7924 = vmatprep.subr.bf16.mxu0 %v8641_v43 }
 0x604   : > { %7925 = vmatpush3.bf16.msra.mxu0 %v8642_v63 }
 0x605   : > { %7926 = vmatprep.subr.bf16.mxu0 %v8643_v22 }
 0x608   : > { %7927 = vmatpush3.bf16.msra.mxu0 %v8644_v17 }
 0x609   : > { %7928 = vmatprep.subr.bf16.mxu0 %v8645_v37 }
 0x60c   : > { %7929 = vmatpush3.bf16.msra.mxu0 %v8646_v5 }
 0x60d   : > { %7930 = vmatprep.subr.bf16.mxu0 %v8647_v26 }
 0x610   : > { %7931 = vmatpush3.bf16.msra.mxu0 %v8648_v42 }
 0x611   : > { %7932 = vmatprep.subr.bf16.mxu0 %v8649_v57 }
 0x614   : > { %7933 = vmatpush3.bf16.msra.mxu0 %v8650_v60 }
 0x615   : > { %7934 = vmatprep.subr.bf16.mxu0 %v8651_v0 }
 0x618   : > { %7935 = vmatpush3.bf16.msra.mxu0 %v8652_v8 }
 0x619   : > { %7936 = vmatprep.subr.bf16.mxu0 %v8653_v13 }
 0x61c   : > { %7937 = vmatpush3.bf16.msra.mxu0 %v8654_v52 }
 0x61f   : > { %6815 = vmatmul.mubr.bf16.vlgmr.msra.gmra.mrb[48].mxu0 %v6679_v16 }
 0x632   : > { %v7696_v20 = vpop.f32.mrb[24].mxu0 }
 0x633   : > { %v7697_v44 = vpop.f32.mrb[25].mxu0 }
 0x634   : > { %v7698_v61 = vadd.f32 %v7697_v44, %v7696_v20  ;;  %v7699_v2 = vpop.f32.mrb[26].mxu0 }
 0x635   : > { %v7740_v11 = vpop.f32.mrb[72].mxu1  ;;  %v7700_v33 = vpop.f32.mrb[27].mxu0 }
 0x636   : > { %v7741_v15 = vpop.f32.mrb[73].mxu1 }
 0x637   : > { %v7742_v55 = vadd.f32 %v7741_v15, %v7740_v11  ;;  %v7743_v56 = vpop.f32.mrb[74].mxu1 }
 0x638   : > { %v7744_v45 = vpop.f32.mrb[75].mxu1 }
 0x652   : > { %v7718_v48 = vpop.f32.mrb[28].mxu0 }
 0x653   : > { %v7719_v49 = vpop.f32.mrb[29].mxu0 }
 0x654   : > { %v7720_v14 = vadd.f32 %v7719_v49, %v7718_v48  ;;  %v7721_v1 = vpop.f32.mrb[30].mxu0 }
 0x655   : > { %v7784_v24 = vpop.f32.mrb[76].mxu1  ;;  %v7722_v47 = vpop.f32.mrb[31].mxu0  ;;  %v6823_v1 = vld [vmem:[%s10237_s8] sm:$0x1] }
 0x656   : > { %v5022_v51 = vadd.f32 %v7720_v14, %v7698_v61  ;;  %v7785_v4 = vpop.f32.mrb[77].mxu1 }
 0x657   : > { %v7786_v10 = vadd.f32 %v7785_v4, %v7784_v24  ;;  %v7787_v31 = vpop.f32.mrb[78].mxu1 }
 0x658   : > { %v7788_v46 = vpop.f32.mrb[79].mxu1  ;;  %v5206_v3 = vadd.f32 %v7742_v55, %v5022_v51 }
 0x672   : > { %v7762_v40 = vpop.f32.mrb[32].mxu0 }
 0x673   : > { %v7763_v6 = vpop.f32.mrb[33].mxu0 }
 0x674   : > { %v7764_v58 = vadd.f32 %v7763_v6, %v7762_v40  ;;  %v7765_v36 = vpop.f32.mrb[34].mxu0 }
 0x675   : > { %v7828_v28 = vpop.f32.mrb[80].mxu1  ;;  %v7766_v50 = vpop.f32.mrb[35].mxu0 }
 0x676   : > { %v5386_v21 = vadd.f32 %v7764_v58, %v5206_v3  ;;  %v7829_v53 = vpop.f32.mrb[81].mxu1 }
 0x677   : > { %v7830_v18 = vadd.f32 %v7829_v53, %v7828_v28  ;;  %v7831_v19 = vpop.f32.mrb[82].mxu1 }
 0x678   : > { %v7832_v62 = vpop.f32.mrb[83].mxu1  ;;  %v5566_v34 = vadd.f32 %v7786_v10, %v5386_v21 }
 0x692   : > { %v7806_v41 = vpop.f32.mrb[36].mxu0 }
 0x693   : > { %v7807_v12 = vpop.f32.mrb[37].mxu0 }
 0x694   : > { %v7808_v25 = vadd.f32 %v7807_v12, %v7806_v41  ;;  %v7809_v59 = vpop.f32.mrb[38].mxu0 }
 0x695   : > { %v7872_v43 = vpop.f32.mrb[84].mxu1  ;;  %v7810_v30 = vpop.f32.mrb[39].mxu0 }
 0x696   : > { %v5746_v63 = vadd.f32 %v7808_v25, %v5566_v34  ;;  %v7873_v22 = vpop.f32.mrb[85].mxu1 }
 0x697   : > { %v7874_v17 = vadd.f32 %v7873_v22, %v7872_v43  ;;  %v7875_v37 = vpop.f32.mrb[86].mxu1 }
 0x698   : > { %v7876_v5 = vpop.f32.mrb[87].mxu1  ;;  %v5926_v26 = vadd.f32 %v7830_v18, %v5746_v63 }
 0x6b2   : > { %v7850_v42 = vpop.f32.mrb[40].mxu0 }
 0x6b3   : > { %v7851_v57 = vpop.f32.mrb[41].mxu0 }
 0x6b4   : > { %v7852_v60 = vadd.f32 %v7851_v57, %v7850_v42  ;;  %v7853_v0 = vpop.f32.mrb[42].mxu0 }
 0x6b5   : > { %v7916_v8 = vpop.f32.mrb[88].mxu1  ;;  %v7854_v13 = vpop.f32.mrb[43].mxu0 }
 0x6b6   : > { %v6106_v39 = vadd.f32 %v7852_v60, %v5926_v26  ;;  %v7917_v52 = vpop.f32.mrb[89].mxu1 }
 0x6b7   : > { %v7918_v7 = vadd.f32 %v7917_v52, %v7916_v8  ;;  %v7919_v16 = vpop.f32.mrb[90].mxu1 }
 0x6b8   : > { %v7920_v20 = vpop.f32.mrb[91].mxu1  ;;  %v6284_v44 = vadd.f32 %v7874_v17, %v6106_v39 }
 0x6d2   : > { %v7894_v61 = vpop.f32.mrb[44].mxu0 }
 0x6d3   : > { %v7895_v2 = vpop.f32.mrb[45].mxu0 }
 0x6d4   : > { %v7896_v11 = vadd.f32 %v7895_v2, %v7894_v61  ;;  %v7897_v33 = vpop.f32.mrb[46].mxu0 }
 0x6d5   : > { %v7898_v15 = vpop.f32.mrb[47].mxu0 }
 0x6d6   : > { %v6462_v55 = vadd.f32 %v7896_v11, %v6284_v44 }
 0x6d8   : > { %v6642_v56 = vadd.f32 %v7918_v7, %v6462_v55 }
 0x6f2   : > { %v7938_v45 = vpop.f32.mrb[48].mxu0 }
 0x6f3   : > { %v7939_v48 = vpop.f32.mrb[49].mxu0 }
 0x6f4   : > { %v7940_v49 = vadd.f32 %v7939_v48, %v7938_v45  ;;  %v7941_v14 = vpop.f32.mrb[50].mxu0 }
 0x6f5   : > { %v7942_v24 = vpop.f32.mrb[51].mxu0 }
 0x6f6   : > { %v6822_v47 = vadd.f32 %v7940_v49, %v6642_v56 }
 0x6f8   : > { %v6824_v51 = vadd.f32 %v6823_v1, %v6822_v47 }
 0x6fa   : > { %v6825_v4 = vpack.c.bf16 %v6824_v51, %v6824_v51 }
 0x6fc   : > { %8168 = vmatmul.mubr.bf16.vlgmr.msra.gmra.mrb[92].mxu1 %v6825_v4 }
 0x7cf   : > { %v6925_v10 = vpop.f32.mrb[92].mxu1 }
 0x7d0   : > { %v6926_v31 = vadd.f32 %v6925_v10, %v6842_v35  ;;  %v8169_v46 = vpop.f32.mrb[93].mxu1 }
 0x7d1   : > { %v6928_v3 = vpop.f32.mrb[94].mxu1 }
 0x7d2   : > { %v8170_v9 = vpop.f32.mrb[95].mxu1  ;;  %v6932_v27 = vsel %vm10334_vm10, %v6926_v31, -inf }
 0x7d3   : > { %6933 = vmax.xlane.f32.xlu0 %v6932_v27 }
 0x860   : > { %v6934_v54 = vpop.xlane.xlu0 %6933 }
 0x861   : > { %v6935_v23 = vsub.f32 %v6926_v31, %v6934_v54 }
 0x863   : > { %v6936_v32 = vmul.f32 1.442695, %v6935_v23 }
 0x865   : > { %8663 = vpow2.f32 %v6936_v32 }
 0x86f   : > { %v8664_v40 = vpop.eup %8663 }
 0x870   : > { %v6938_v6 = vsel %vm10335_vm13, %v8664_v40, 0.0 }
 0x871   : > { %6939 = vadd.xlane.f32.xlu0 %v6938_v6 }
 0x8fe   : > { %v6940_v58 = vpop.xlane.xlu0 %6939 }
 0x8ff   : > { %8665 = vlog2.f32 %v6940_v58 }
 0x909   : > { %v8666_v36 = vpop.eup %8665 }
 0x90a   : > { %v6942_v28 = vmul.f32 0.6931472, %v8666_v36 }
 0x90c   : > { %v6943_v50 = vsub.f32 %v6935_v23, %v6942_v28 }
 0x90e   : > { %6944 = vst [vmem:[%s422_s12] sm:$0x1] %v6943_v50 }
 0x90f   : > { %8764 = shalt.err (!%p8761_p11)
}
 0x910   : > { %s8765_s20 = scalar_lea.hbm %s10187_s5, 16  ;;  %s8769_s19 = scalar_lea.hbm %s10240_s11, 32 }
 0x911   : > { %p8766_p13 = scmp.ne.s32.totalorder %s10187_s5, %s8765_s20  ;;  %p8770_p6 = scmp.lt.u32.totalorder %s10187_s5, %s10240_s11 }
 0x912   : > { %p8771_p9 = scmp.lt.u32.totalorder %s8769_s19, %s8765_s20  ;;  %p8773_p12 = scmp.lt.u32.totalorder %s8765_s20, %s10187_s5 }
 0x913   : > { %p8767_p5 = pnand %p8766_p13, %p10336_p1 }
 0x914   : > { %p8772_p10 = por %p8771_p9, %p8770_p6 }
 0x915   : > { %p8768_p0 = pneg %p8767_p5 }
 0x916   : > { %p8774_p2 = por %p8773_p12, %p8772_p10 }
 0x918   : > { %p8775_p3 = pnand %p8774_p2, %p8768_p0 }
 0x91a   : > { %8778 = shalt.err (!%p8775_p3)
}
 0x91b   : > { %8274 = dma.vmem_to_hbm [thread:$0]  (%p10336_p1), %s10189_s15, 16, %s10187_s5, %s6946_s29  }
 0x91c PF: > { %s10337_s14 = sld [smem:[#allocation18_spill]]  ;;  %s10338_s16 = sld [smem:[#allocation16_spill]] }
 0x91d   : > { %s10339_s12 = sld [smem:[#allocation21_spill]] }
 0x922   : > { %p8296_p4 = scmp.ge.s32.totalorder %s10337_s14, 2  ;;  %s6970_s23 = sand.u32 1, %s10338_s16  }
 0x923   : > { %p10340_p7 = scmp.ne.s32.totalorder %s10339_s12, 0  ;;  %s6971_s28 = scalar_lea.sflag [#allocation8], %s6970_s23 }
 0x925   : > { %p8287_p8 = pnand %p8296_p4, %p10340_p7 }
 0x927   : > { %8804 = dma.done.wait (!%p8287_p8), %s6971_s28, 16  }
 0x928   : > { %8806 = vsyncadd (!%p8287_p8), %s6971_s28, 4294967280  ;;  %s10341_s20 = sld [smem:[#allocation19_spill]]  ;;  %s10342_s13 = sld [smem:[#allocation17_spill]] }
 0x929   : > { %s10343_s19 = sld [smem:[#allocation20_spill]]  ;;  %s10344_s17 = smov %s8813_s18 }
 0x92e   : > { %p23_p11 = scmp.ge.s32.totalorder %s10341_s20, 4   ;;  %s10345_s18 = smov %s10342_s13 }
 0x930   :  { %25 = sbr.rel (!%p23_p11) target bundleno = 7 (0x7), region = 135 }
 0x937   :  { %6975 = vsyncpa [#allocation7], 1 }
 0x938   :  { %6977 = vsyncpa [#allocation7 + $0x1], 1 }
 0x939   :  { %6978 = vsyncpa [#allocation10], 1 }
 0x93a   :  { %6979 = vsyncpa [#allocation8], 1 }
 0x93b   :  { %6981 = vsyncpa [#allocation8 + $0x1], 1 }

</bundles_post_ra>
